<compile_context>
chip_gen: v5e
topology: v5e:2x2
jax: 0.10.0
libtpu: 0.0.40
codegen_flags: <defaults>
</compile_context>

<pallas_src>
import jax
import jax.numpy as jnp
from jax import lax
from jax.experimental import pallas as pl
from jax.experimental.pallas import tpu as pltpu


# ----------------------------------------------------------------------------
# Parameter preparation helpers (plain JAX, run in the wrapper)
# ----------------------------------------------------------------------------
def fold_bn(bias, bn, eps=1e-5):
    """Fold (conv/linear bias) + eval-mode BatchNorm into scale & shift."""
    gamma, beta, mean, var = bn
    s = gamma / jnp.sqrt(var + eps)
    return s, s * (bias - mean) + beta


def _build_band(w_oihw, scale, chan_stride, lane_stride, width_in, l_in):
    """Banded weight matrices for one conv stage.

    Returns band of shape (K, l_in, Co*Wo) with
      band[kh, ci*chan_stride + (wo+kw)*lane_stride, co*Wo + wo]
          = w[co, ci, kh, kw] * scale[co]
    so that (input_row @ band[kh])[co*Wo + wo] performs the W-window sum, the
    input-channel sum and the per-output-channel scale in one MXU contraction.
    Input lanes that carry no valid data (pooling "holes") get zero weight.
    """
    co_n, ci_n, k, _ = w_oihw.shape
    wo = width_in - k + 1
    co, ci, kh, kw, woi = jnp.meshgrid(
        jnp.arange(co_n), jnp.arange(ci_n), jnp.arange(k), jnp.arange(k),
        jnp.arange(wo), indexing="ij")
    vals = (w_oihw * scale[:, None, None, None])[co, ci, kh, kw]
    rows = ci * chan_stride + (woi + kw) * lane_stride
    cols = co * wo + woi
    band = jnp.zeros((k, l_in, co_n * wo), jnp.float32)
    return band.at[kh, rows, cols].add(vals)


# ----------------------------------------------------------------------------
# Fused forward pass
# ----------------------------------------------------------------------------
def convnn_pt6_small_forward(x_nchw, p, block_b=None):
    n, cin, hin, win = x_nchw.shape
    eps = 1e-5  # PyTorch BatchNorm default

    # ---- static architecture bookkeeping -------------------------------
    co1, _, k1, _ = p["conv1_w"].shape
    co2, _, k2, _ = p["conv2_w"].shape
    co3, _, k3, _ = p["conv3_w"].shape
    wo1 = win - k1 + 1; wp1 = wo1 // 2           # W sizes after conv / pool
    wo2 = wp1 - k2 + 1; wp2 = wo2 // 2
    wo3 = wp2 - k3 + 1; wp3 = wo3 // 2
    ho1 = hin - k1 + 1; hp1 = ho1 // 2           # H sizes after conv / pool
    ho2 = hp1 - k2 + 1; hp2 = ho2 // 2
    ho3 = hp2 - k3 + 1; hp3 = ho3 // 2
    l_in1 = cin * win
    l1, l2, l3 = co1 * wo1, co2 * wo2, co3 * wo3
    nh = p["fc1_w"].shape[0]
    n_out = p["fc2_w"].shape[0]
    assert co3 * hp3 * wp3 == p["fc1_w"].shape[1], "input size incompatible with fc1"
    # even pooling inputs (reviewer concern) + packed-constant lane budget
    assert wo1 % 2 == 0 and wo2 % 2 == 0 and wo3 % 2 == 0
    assert ho1 % 2 == 0 and ho2 % 2 == 0 and ho3 % 2 == 0
    assert max(l1, l2, l3) <= 128 and max(nh, n_out) <= 128
    rs_head = 8  # row stride of valid data after three 2x2 pools

    # ---- fold eval-mode BN + biases, build banded weights ---------------
    s1, t1 = fold_bn(p["conv1_b"], p["bn1"], eps)
    s2, t2 = fold_bn(p["conv2_b"], p["bn2"], eps)
    s3 = jnp.ones((co3,), jnp.float32)            # conv3 has no BatchNorm
    t3 = p["conv3_b"]
    sf, tf = fold_bn(p["fc1_b"], p["bnf"], eps)

    band1 = _build_band(p["conv1_w"], s1, win, 1, win, l_in1)   # (k1,162,104)
    band2 = _build_band(p["conv2_w"], s2, wo1, 2, wp1, l1)      # (k2,104,120)
    band3 = _build_band(p["conv3_w"], s3, wo2, 2, wp2, l2)      # (k3,120, 80)

    # packed per-channel shifts (bias + BN shift), one row per stage
    shifts = jnp.zeros((3, 128), jnp.float32)
    shifts = shifts.at[0, :l1].set(jnp.repeat(t1, wo1))
    shifts = shifts.at[1, :l2].set(jnp.repeat(t2, wo2))
    shifts = shifts.at[2, :l3].set(jnp.repeat(t3, wo3))

    # ---- batching: B images per grid step, stacked along the row axis ---
    if block_b is None:
        block_b = min(4, n)      # ~4 images keep the working set in the vreg file
    g = -(-n // block_b)
    n_pad = g * block_b
    rows = block_b * hin

    # fc1 head: row-selector matrices (gather the hp3 valid pooled rows of every
    # image with one MXU matmul each) and BN-scale-folded fc1 weights laid out
    # on the sparse (co*wo3 + 2*wp) lane pattern of the pooled conv3 output.
    hh, bb = jnp.meshgrid(jnp.arange(hp3), jnp.arange(block_b), indexing="ij")
    sel = jnp.zeros((hp3, block_b, rows), jnp.float32)
    sel = sel.at[hh, bb, bb * hin + rs_head * hh].set(1.0)

    hpz, coz, wpz, oz = jnp.meshgrid(jnp.arange(hp3), jnp.arange(co3),
                                     jnp.arange(wp3), jnp.arange(nh),
                                     indexing="ij")
    w1s = p["fc1_w"] * sf[:, None]                     # (nh, co3*hp3*wp3)
    vvals = w1s[oz, coz * (hp3 * wp3) + hpz * wp3 + wpz]
    vmat = jnp.zeros((hp3, l3, nh), jnp.float32)
    vmat = vmat.at[hpz, coz * wo3 + 2 * wpz, oz].set(vvals)

    # packed fc-head constants: row 0 = fc_BN shift, rows 1..nh = fc2 W^T, last = fc2 b
    misc = jnp.zeros((2 + nh, max(n_out, nh)), jnp.float32)
    misc = misc.at[0, :nh].set(tf)
    misc = misc.at[1:1 + nh, :n_out].set(p["fc2_w"].T)
    misc = misc.at[1 + nh, :n_out].set(p["fc2_b"])

    # ---- input: NCHW -> per-image (H, C*W) slab, B images stacked per block
    x = jnp.transpose(x_nchw.astype(jnp.float32), (0, 2, 1, 3)).reshape(n, hin, l_in1)
    if n_pad > n:
        x = jnp.concatenate([x, jnp.zeros((n_pad - n, hin, l_in1), jnp.float32)], 0)
    x = x.reshape(g, rows, l_in1)

    # ------------------------------------------------------------------
    # Kernel (closure over the static sizes above)
    # ------------------------------------------------------------------
    def kernel(x_ref, b1_ref, b2_ref, b3_ref, sh_ref, sel_ref, v_ref, m_ref, o_ref):
        f32 = jnp.float32

        def shift_rows(a, s):
            # result[r, :] = a[r + s, :]  (rows wrap; wrapped rows are never
            # valid output rows for the shift amounts used here)
            if s == 0:
                return a
            return jnp.concatenate([a[s:, :], a[:s, :]], axis=0)

        def shift_lanes1(a):
            # result[:, j] = a[:, j + 1]; done as an MXU matmul with a
            # sub-diagonal 0/1 matrix (no unaligned lane slicing needed).
            l = a.shape[1]
            i = lax.broadcasted_iota(jnp.int32, (l, l), 0)
            j = lax.broadcasted_iota(jnp.int32, (l, l), 1)
            return jnp.dot(a, (i == j + 1).astype(a.dtype),
                           preferred_element_type=f32)

        def conv_bn_relu_pool(y, band_ref, bias_row, k, step):
            # y: (rows, l_in). One matmul per kernel row kh; the W-window,
            # channel sum and folded BN scale live inside the band matrix.
            acc = None
            for kh in range(k):
                prod = jnp.dot(y, band_ref[kh], preferred_element_type=f32)
                prod = shift_rows(prod, kh * step)
                acc = prod if acc is None else acc + prod
            y = jnp.maximum(acc + bias_row, 0.0)
            # 2x2 max-pool on values: W-pairs (lane shift), H-pairs (row shift).
            # Valid data remains at every 2nd lane / every 2*step-th row; the
            # next stage's weights give the in-between positions zero weight.
            y = jnp.maximum(y, shift_lanes1(y))
            y = jnp.maximum(y, shift_rows(y, step))
            return y

        y = x_ref[...]                                               # (rows, cin*win)
        y = conv_bn_relu_pool(y, b1_ref, sh_ref[0:1, :l1], k1, 1)    # (rows, l1)
        y = conv_bn_relu_pool(y, b2_ref, sh_ref[1:2, :l2], k2, 2)    # (rows, l2)
        y = conv_bn_relu_pool(y, b3_ref, sh_ref[2:3, :l3], k3, 4)    # (rows, l3)

        # fc1 (+ folded BN1d) + ReLU: one selector matmul per valid row group,
        # one weight matmul each; no per-feature micro-dots.
        h = None
        for hp in range(hp3):
            feat = jnp.dot(sel_ref[hp], y, preferred_element_type=f32)   # (B, l3)
            part = jnp.dot(feat, v_ref[hp], preferred_element_type=f32)  # (B, nh)
            h = part if h is None else h + part
        h = jnp.maximum(h + m_ref[0:1, :nh], 0.0)
        # fc2
        o_ref[...] = (jnp.dot(h, m_ref[1:1 + nh, :n_out],
                              preferred_element_type=f32)
                      + m_ref[1 + nh:2 + nh, :n_out])

    out = pl.pallas_call(
        kernel,
        out_shape=jax.ShapeDtypeStruct((g, block_b, n_out), jnp.float32),
        grid=(g,),
        in_specs=[
            pl.BlockSpec((None, rows, l_in1), lambda i: (i, 0, 0)),   # x block
            pl.BlockSpec(band1.shape, lambda i: (0, 0, 0)),
            pl.BlockSpec(band2.shape, lambda i: (0, 0, 0)),
            pl.BlockSpec(band3.shape, lambda i: (0, 0, 0)),
            pl.BlockSpec(shifts.shape, lambda i: (0, 0)),
            pl.BlockSpec(sel.shape, lambda i: (0, 0, 0)),
            pl.BlockSpec(vmat.shape, lambda i: (0, 0, 0)),
            pl.BlockSpec(misc.shape, lambda i: (0, 0)),
        ],
        out_specs=pl.BlockSpec((None, block_b, n_out), lambda i: (i, 0, 0)),
        compiler_params=pltpu.CompilerParams(
            dimension_semantics=("parallel",)),
    )(x, band1, band2, band3, shifts, sel, vmat, misc)
    return out.reshape(n_pad, n_out)[:n]


# ----------------------------------------------------------------------------
# Pure-JAX reference (eval-mode BN), used only for a correctness check
# ----------------------------------------------------------------------------
def reference_forward(x, p, eps=1e-5):
    hi = lax.Precision.HIGHEST

    def conv(y, w, b):
        out = lax.conv_general_dilated(
            y, w, window_strides=(1, 1), padding="VALID",
            dimension_numbers=("NCHW", "OIHW", "NCHW"), precision=hi)
        return out + b[None, :, None, None]

    def bn2d(y, bnp):
        gm, bt, mu, var = bnp
        inv = gm / jnp.sqrt(var + eps)
        return (y - mu[None, :, None, None]) * inv[None, :, None, None] + bt[None, :, None, None]

    def pool(y):
        return lax.reduce_window(y, -jnp.inf, lax.max,
                                 (1, 1, 2, 2), (1, 1, 2, 2), "VALID")

    y = pool(jax.nn.relu(bn2d(conv(x, p["conv1_w"], p["conv1_b"]), p["bn1"])))
    y = pool(jax.nn.relu(bn2d(conv(y, p["conv2_w"], p["conv2_b"]), p["bn2"])))
    y = pool(jax.nn.relu(conv(y, p["conv3_w"], p["conv3_b"])))
    f = y.reshape(y.shape[0], -1)
    z = jnp.dot(f, p["fc1_w"].T, precision=hi) + p["fc1_b"]
    gm, bt, mu, var = p["bnf"]
    z = jax.nn.relu((z - mu) * (gm / jnp.sqrt(var + eps)) + bt)
    return jnp.dot(z, p["fc2_w"].T, precision=hi) + p["fc2_b"]


# ----------------------------------------------------------------------------
# Parameters (deterministic, synthetic), matching ConvNN_pt6_small
# ----------------------------------------------------------------------------
def init_params(key):
    ks = jax.random.split(key, 12)

    def conv_w(k, co, ci, kk):
        return (jax.random.normal(k, (co, ci, kk, kk), jnp.float32)
                / jnp.sqrt(ci * kk * kk))

    def lin_w(k, o, i):
        return jax.random.normal(k, (o, i), jnp.float32) / jnp.sqrt(i)

    def bn(k, c):
        g = 1.0 + 0.1 * jax.random.normal(k, (c,), jnp.float32)
        b = 0.1 * jax.random.normal(jax.random.fold_in(k, 1), (c,), jnp.float32)
        mu = 0.1 * jax.random.normal(jax.random.fold_in(k, 2), (c,), jnp.float32)
        var = 1.0 + jax.random.uniform(jax.random.fold_in(k, 3), (c,), jnp.float32)
        return (g, b, mu, var)

    return dict(
        conv1_w=conv_w(ks[0], 2, 3, 3),
        conv1_b=0.1 * jax.random.normal(ks[1], (2,), jnp.float32),
        bn1=bn(ks[2], 2),
        conv2_w=conv_w(ks[3], 5, 2, 3),
        conv2_b=0.1 * jax.random.normal(ks[4], (5,), jnp.float32),
        bn2=bn(ks[5], 5),
        conv3_w=conv_w(ks[6], 10, 5, 5),
        conv3_b=0.1 * jax.random.normal(ks[7], (10,), jnp.float32),
        fc1_w=lin_w(ks[8], 3, 10 * 4 * 4),
        fc1_b=0.1 * jax.random.normal(ks[9], (3,), jnp.float32),
        bnf=bn(ks[10], 3),
        fc2_w=lin_w(ks[11], 10, 3),
        fc2_b=0.1 * jax.random.normal(jax.random.fold_in(ks[11], 7), (10,),
                                      jnp.float32),
    )


# ----------------------------------------------------------------------------
if __name__ == "__main__":
    key = jax.random.PRNGKey(0)
    pkey, xkey = jax.random.split(key)
    params = init_params(pkey)

    # Spatial size 54 is forced by fc1 = Linear(10*4*4, 3):
    # 54 -conv3x3-> 52 -pool-> 26 -conv3x3-> 24 -pool-> 12 -conv5x5-> 8 -pool-> 4.
    x = jax.random.normal(xkey, (2, 3, 54, 54), jnp.float32)

    fwd = jax.jit(convnn_pt6_small_forward)
    out = fwd(x, params)
    jax.block_until_ready(out)
    assert out.shape == (2, 10), out.shape
    assert bool(jnp.all(jnp.isfinite(out)))

    ref = reference_forward(x, params)
    err = float(jnp.max(jnp.abs(out - ref)))
    # loose tolerance: absorbs MXU/XLA f32 pass-precision differences while
    # still catching any structural / index error (which would be O(1)).
    assert err < 3e-2, f"max |kernel - reference| = {err}"
    print("KERNEL_OK")
</pallas_src>

<mosaic_0001>
module attributes {stable_mosaic.version = 11 : i64} {
  func.func @kernel(%arg0: i32, %arg1: memref<1x108x162xf32, #tpu.memory_space<vmem>>, %arg2: memref<3x162x104xf32, #tpu.memory_space<vmem>>, %arg3: memref<3x104x120xf32, #tpu.memory_space<vmem>>, %arg4: memref<5x120x80xf32, #tpu.memory_space<vmem>>, %arg5: memref<3x128xf32, #tpu.memory_space<vmem>>, %arg6: memref<4x2x108xf32, #tpu.memory_space<vmem>>, %arg7: memref<4x80x3xf32, #tpu.memory_space<vmem>>, %arg8: memref<5x10xf32, #tpu.memory_space<vmem>>, %arg9: memref<1x2x10xf32, #tpu.memory_space<vmem>>) attributes {dimension_semantics = [#tpu.dimension_semantics<parallel>], iteration_bounds = array<i64: 1>, scalar_prefetch = 0 : i64, scratch_operands = 0 : i64, tpu.core_type = #tpu.core_type<tc>, window_params = [{transform_indices = @transform_0, window_bounds = array<i64: 1, 108, 162>}, {pipeline_mode = #tpu.pipeline_mode<synchronous>, transform_indices = @transform_1, window_bounds = array<i64: 3, 162, 104>}, {pipeline_mode = #tpu.pipeline_mode<synchronous>, transform_indices = @transform_2, window_bounds = array<i64: 3, 104, 120>}, {pipeline_mode = #tpu.pipeline_mode<synchronous>, transform_indices = @transform_3, window_bounds = array<i64: 5, 120, 80>}, {pipeline_mode = #tpu.pipeline_mode<synchronous>, transform_indices = @transform_4, window_bounds = array<i64: 3, 128>}, {pipeline_mode = #tpu.pipeline_mode<synchronous>, transform_indices = @transform_5, window_bounds = array<i64: 4, 2, 108>}, {pipeline_mode = #tpu.pipeline_mode<synchronous>, transform_indices = @transform_6, window_bounds = array<i64: 4, 80, 3>}, {pipeline_mode = #tpu.pipeline_mode<synchronous>, transform_indices = @transform_7, window_bounds = array<i64: 5, 10>}, {transform_indices = @transform_8, window_bounds = array<i64: 1, 2, 10>}]} {
    %c0 = arith.constant 0 : index
    %c0_0 = arith.constant 0 : index
    %c0_1 = arith.constant 0 : index
    %0 = vector.load %arg1[%c0, %c0_0, %c0_1] : memref<1x108x162xf32, #tpu.memory_space<vmem>>, vector<1x108x162xf32>
    %1 = vector.shape_cast %0 : vector<1x108x162xf32> to vector<108x162xf32>
    %c0_2 = arith.constant 0 : index
    %c0_3 = arith.constant 0 : index
    %2 = vector.load %arg5[%c0_2, %c0_3] : memref<3x128xf32, #tpu.memory_space<vmem>>, vector<1x104xf32>
    %c0_4 = arith.constant 0 : index
    %c0_5 = arith.constant 0 : index
    %c0_6 = arith.constant 0 : index
    %3 = vector.load %arg2[%c0_4, %c0_5, %c0_6] : memref<3x162x104xf32, #tpu.memory_space<vmem>>, vector<1x162x104xf32>
    %4 = vector.shape_cast %3 : vector<1x162x104xf32> to vector<162x104xf32>
    %cst = arith.constant dense<0.000000e+00> : vector<108x104xf32>
    %5 = tpu.matmul %1, %4, %cst {dimension_numbers = #tpu.dot_dimension_numbers<[1], [0], [0], [1], [0, 0, 1, 1], [], []>} : vector<108x162xf32>, vector<162x104xf32>, vector<108x104xf32> -> vector<108x104xf32>
    %c1 = arith.constant 1 : index
    %c0_7 = arith.constant 0 : index
    %c0_8 = arith.constant 0 : index
    %6 = vector.load %arg2[%c1, %c0_7, %c0_8] : memref<3x162x104xf32, #tpu.memory_space<vmem>>, vector<1x162x104xf32>
    %7 = vector.shape_cast %6 : vector<1x162x104xf32> to vector<162x104xf32>
    %cst_9 = arith.constant dense<0.000000e+00> : vector<108x104xf32>
    %8 = tpu.matmul %1, %7, %cst_9 {dimension_numbers = #tpu.dot_dimension_numbers<[1], [0], [0], [1], [0, 0, 1, 1], [], []>} : vector<108x162xf32>, vector<162x104xf32>, vector<108x104xf32> -> vector<108x104xf32>
    %9 = vector.extract_strided_slice %8 {offsets = [1, 0], sizes = [107, 104], strides = [1, 1]} : vector<108x104xf32> to vector<107x104xf32>
    %10 = vector.extract_strided_slice %8 {offsets = [0, 0], sizes = [1, 104], strides = [1, 1]} : vector<108x104xf32> to vector<1x104xf32>
    %11 = tpu.concatenate %9, %10 in 0 : vector<107x104xf32>, vector<1x104xf32> -> vector<108x104xf32>
    %12 = arith.addf %5, %11 : vector<108x104xf32>
    %c2 = arith.constant 2 : index
    %c0_10 = arith.constant 0 : index
    %c0_11 = arith.constant 0 : index
    %13 = vector.load %arg2[%c2, %c0_10, %c0_11] : memref<3x162x104xf32, #tpu.memory_space<vmem>>, vector<1x162x104xf32>
    %14 = vector.shape_cast %13 : vector<1x162x104xf32> to vector<162x104xf32>
    %cst_12 = arith.constant dense<0.000000e+00> : vector<108x104xf32>
    %15 = tpu.matmul %1, %14, %cst_12 {dimension_numbers = #tpu.dot_dimension_numbers<[1], [0], [0], [1], [0, 0, 1, 1], [], []>} : vector<108x162xf32>, vector<162x104xf32>, vector<108x104xf32> -> vector<108x104xf32>
    %16 = vector.extract_strided_slice %15 {offsets = [2, 0], sizes = [106, 104], strides = [1, 1]} : vector<108x104xf32> to vector<106x104xf32>
    %17 = vector.extract_strided_slice %15 {offsets = [0, 0], sizes = [2, 104], strides = [1, 1]} : vector<108x104xf32> to vector<2x104xf32>
    %18 = tpu.concatenate %16, %17 in 0 : vector<106x104xf32>, vector<2x104xf32> -> vector<108x104xf32>
    %19 = arith.addf %12, %18 : vector<108x104xf32>
    %20 = vector.broadcast %2 : vector<1x104xf32> to vector<108x104xf32>
    %21 = arith.addf %19, %20 : vector<108x104xf32>
    %cst_13 = arith.constant 0.000000e+00 : f32
    %22 = vector.broadcast %cst_13 : f32 to vector<108x104xf32>
    %23 = arith.maximumf %21, %22 : vector<108x104xf32>
    %24 = tpu.iota {dimensions = array<i32: 0>} : vector<104x104xi32>
    %25 = tpu.iota {dimensions = array<i32: 1>} : vector<104x104xi32>
    %c1_i32 = arith.constant 1 : i32
    %26 = vector.broadcast %c1_i32 : i32 to vector<104x104xi32>
    %27 = arith.addi %25, %26 : vector<104x104xi32>
    %28 = arith.cmpi eq, %24, %27 : vector<104x104xi32>
    %29 = arith.extui %28 : vector<104x104xi1> to vector<104x104xi32>
    %30 = arith.sitofp %29 : vector<104x104xi32> to vector<104x104xf32>
    %cst_14 = arith.constant dense<0.000000e+00> : vector<108x104xf32>
    %31 = tpu.matmul %23, %30, %cst_14 {dimension_numbers = #tpu.dot_dimension_numbers<[1], [0], [0], [1], [0, 0, 1, 1], [], []>} : vector<108x104xf32>, vector<104x104xf32>, vector<108x104xf32> -> vector<108x104xf32>
    %32 = arith.maximumf %23, %31 : vector<108x104xf32>
    %33 = vector.extract_strided_slice %32 {offsets = [1, 0], sizes = [107, 104], strides = [1, 1]} : vector<108x104xf32> to vector<107x104xf32>
    %34 = vector.extract_strided_slice %32 {offsets = [0, 0], sizes = [1, 104], strides = [1, 1]} : vector<108x104xf32> to vector<1x104xf32>
    %35 = tpu.concatenate %33, %34 in 0 : vector<107x104xf32>, vector<1x104xf32> -> vector<108x104xf32>
    %36 = arith.maximumf %32, %35 : vector<108x104xf32>
    %c1_15 = arith.constant 1 : index
    %c0_16 = arith.constant 0 : index
    %37 = vector.load %arg5[%c1_15, %c0_16] : memref<3x128xf32, #tpu.memory_space<vmem>>, vector<1x120xf32>
    %c0_17 = arith.constant 0 : index
    %c0_18 = arith.constant 0 : index
    %c0_19 = arith.constant 0 : index
    %38 = vector.load %arg3[%c0_17, %c0_18, %c0_19] : memref<3x104x120xf32, #tpu.memory_space<vmem>>, vector<1x104x120xf32>
    %39 = vector.shape_cast %38 : vector<1x104x120xf32> to vector<104x120xf32>
    %cst_20 = arith.constant dense<0.000000e+00> : vector<108x120xf32>
    %40 = tpu.matmul %36, %39, %cst_20 {dimension_numbers = #tpu.dot_dimension_numbers<[1], [0], [0], [1], [0, 0, 1, 1], [], []>} : vector<108x104xf32>, vector<104x120xf32>, vector<108x120xf32> -> vector<108x120xf32>
    %c1_21 = arith.constant 1 : index
    %c0_22 = arith.constant 0 : index
    %c0_23 = arith.constant 0 : index
    %41 = vector.load %arg3[%c1_21, %c0_22, %c0_23] : memref<3x104x120xf32, #tpu.memory_space<vmem>>, vector<1x104x120xf32>
    %42 = vector.shape_cast %41 : vector<1x104x120xf32> to vector<104x120xf32>
    %cst_24 = arith.constant dense<0.000000e+00> : vector<108x120xf32>
    %43 = tpu.matmul %36, %42, %cst_24 {dimension_numbers = #tpu.dot_dimension_numbers<[1], [0], [0], [1], [0, 0, 1, 1], [], []>} : vector<108x104xf32>, vector<104x120xf32>, vector<108x120xf32> -> vector<108x120xf32>
    %44 = vector.extract_strided_slice %43 {offsets = [2, 0], sizes = [106, 120], strides = [1, 1]} : vector<108x120xf32> to vector<106x120xf32>
    %45 = vector.extract_strided_slice %43 {offsets = [0, 0], sizes = [2, 120], strides = [1, 1]} : vector<108x120xf32> to vector<2x120xf32>
    %46 = tpu.concatenate %44, %45 in 0 : vector<106x120xf32>, vector<2x120xf32> -> vector<108x120xf32>
    %47 = arith.addf %40, %46 : vector<108x120xf32>
    %c2_25 = arith.constant 2 : index
    %c0_26 = arith.constant 0 : index
    %c0_27 = arith.constant 0 : index
    %48 = vector.load %arg3[%c2_25, %c0_26, %c0_27] : memref<3x104x120xf32, #tpu.memory_space<vmem>>, vector<1x104x120xf32>
    %49 = vector.shape_cast %48 : vector<1x104x120xf32> to vector<104x120xf32>
    %cst_28 = arith.constant dense<0.000000e+00> : vector<108x120xf32>
    %50 = tpu.matmul %36, %49, %cst_28 {dimension_numbers = #tpu.dot_dimension_numbers<[1], [0], [0], [1], [0, 0, 1, 1], [], []>} : vector<108x104xf32>, vector<104x120xf32>, vector<108x120xf32> -> vector<108x120xf32>
    %51 = vector.extract_strided_slice %50 {offsets = [4, 0], sizes = [104, 120], strides = [1, 1]} : vector<108x120xf32> to vector<104x120xf32>
    %52 = vector.extract_strided_slice %50 {offsets = [0, 0], sizes = [4, 120], strides = [1, 1]} : vector<108x120xf32> to vector<4x120xf32>
    %53 = tpu.concatenate %51, %52 in 0 : vector<104x120xf32>, vector<4x120xf32> -> vector<108x120xf32>
    %54 = arith.addf %47, %53 : vector<108x120xf32>
    %55 = vector.broadcast %37 : vector<1x120xf32> to vector<108x120xf32>
    %56 = arith.addf %54, %55 : vector<108x120xf32>
    %cst_29 = arith.constant 0.000000e+00 : f32
    %57 = vector.broadcast %cst_29 : f32 to vector<108x120xf32>
    %58 = arith.maximumf %56, %57 : vector<108x120xf32>
    %59 = tpu.iota {dimensions = array<i32: 0>} : vector<120x120xi32>
    %60 = tpu.iota {dimensions = array<i32: 1>} : vector<120x120xi32>
    %c1_i32_30 = arith.constant 1 : i32
    %61 = vector.broadcast %c1_i32_30 : i32 to vector<120x120xi32>
    %62 = arith.addi %60, %61 : vector<120x120xi32>
    %63 = arith.cmpi eq, %59, %62 : vector<120x120xi32>
    %64 = arith.extui %63 : vector<120x120xi1> to vector<120x120xi32>
    %65 = arith.sitofp %64 : vector<120x120xi32> to vector<120x120xf32>
    %cst_31 = arith.constant dense<0.000000e+00> : vector<108x120xf32>
    %66 = tpu.matmul %58, %65, %cst_31 {dimension_numbers = #tpu.dot_dimension_numbers<[1], [0], [0], [1], [0, 0, 1, 1], [], []>} : vector<108x120xf32>, vector<120x120xf32>, vector<108x120xf32> -> vector<108x120xf32>
    %67 = arith.maximumf %58, %66 : vector<108x120xf32>
    %68 = vector.extract_strided_slice %67 {offsets = [2, 0], sizes = [106, 120], strides = [1, 1]} : vector<108x120xf32> to vector<106x120xf32>
    %69 = vector.extract_strided_slice %67 {offsets = [0, 0], sizes = [2, 120], strides = [1, 1]} : vector<108x120xf32> to vector<2x120xf32>
    %70 = tpu.concatenate %68, %69 in 0 : vector<106x120xf32>, vector<2x120xf32> -> vector<108x120xf32>
    %71 = arith.maximumf %67, %70 : vector<108x120xf32>
    %c2_32 = arith.constant 2 : index
    %c0_33 = arith.constant 0 : index
    %72 = vector.load %arg5[%c2_32, %c0_33] : memref<3x128xf32, #tpu.memory_space<vmem>>, vector<1x80xf32>
    %c0_34 = arith.constant 0 : index
    %c0_35 = arith.constant 0 : index
    %c0_36 = arith.constant 0 : index
    %73 = vector.load %arg4[%c0_34, %c0_35, %c0_36] : memref<5x120x80xf32, #tpu.memory_space<vmem>>, vector<1x120x80xf32>
    %74 = vector.shape_cast %73 : vector<1x120x80xf32> to vector<120x80xf32>
    %cst_37 = arith.constant dense<0.000000e+00> : vector<108x80xf32>
    %75 = tpu.matmul %71, %74, %cst_37 {dimension_numbers = #tpu.dot_dimension_numbers<[1], [0], [0], [1], [0, 0, 1, 1], [], []>} : vector<108x120xf32>, vector<120x80xf32>, vector<108x80xf32> -> vector<108x80xf32>
    %c1_38 = arith.constant 1 : index
    %c0_39 = arith.constant 0 : index
    %c0_40 = arith.constant 0 : index
    %76 = vector.load %arg4[%c1_38, %c0_39, %c0_40] : memref<5x120x80xf32, #tpu.memory_space<vmem>>, vector<1x120x80xf32>
    %77 = vector.shape_cast %76 : vector<1x120x80xf32> to vector<120x80xf32>
    %cst_41 = arith.constant dense<0.000000e+00> : vector<108x80xf32>
    %78 = tpu.matmul %71, %77, %cst_41 {dimension_numbers = #tpu.dot_dimension_numbers<[1], [0], [0], [1], [0, 0, 1, 1], [], []>} : vector<108x120xf32>, vector<120x80xf32>, vector<108x80xf32> -> vector<108x80xf32>
    %79 = vector.extract_strided_slice %78 {offsets = [4, 0], sizes = [104, 80], strides = [1, 1]} : vector<108x80xf32> to vector<104x80xf32>
    %80 = vector.extract_strided_slice %78 {offsets = [0, 0], sizes = [4, 80], strides = [1, 1]} : vector<108x80xf32> to vector<4x80xf32>
    %81 = tpu.concatenate %79, %80 in 0 : vector<104x80xf32>, vector<4x80xf32> -> vector<108x80xf32>
    %82 = arith.addf %75, %81 : vector<108x80xf32>
    %c2_42 = arith.constant 2 : index
    %c0_43 = arith.constant 0 : index
    %c0_44 = arith.constant 0 : index
    %83 = vector.load %arg4[%c2_42, %c0_43, %c0_44] : memref<5x120x80xf32, #tpu.memory_space<vmem>>, vector<1x120x80xf32>
    %84 = vector.shape_cast %83 : vector<1x120x80xf32> to vector<120x80xf32>
    %cst_45 = arith.constant dense<0.000000e+00> : vector<108x80xf32>
    %85 = tpu.matmul %71, %84, %cst_45 {dimension_numbers = #tpu.dot_dimension_numbers<[1], [0], [0], [1], [0, 0, 1, 1], [], []>} : vector<108x120xf32>, vector<120x80xf32>, vector<108x80xf32> -> vector<108x80xf32>
    %86 = vector.extract_strided_slice %85 {offsets = [8, 0], sizes = [100, 80], strides = [1, 1]} : vector<108x80xf32> to vector<100x80xf32>
    %87 = vector.extract_strided_slice %85 {offsets = [0, 0], sizes = [8, 80], strides = [1, 1]} : vector<108x80xf32> to vector<8x80xf32>
    %88 = tpu.concatenate %86, %87 in 0 : vector<100x80xf32>, vector<8x80xf32> -> vector<108x80xf32>
    %89 = arith.addf %82, %88 : vector<108x80xf32>
    %c3 = arith.constant 3 : index
    %c0_46 = arith.constant 0 : index
    %c0_47 = arith.constant 0 : index
    %90 = vector.load %arg4[%c3, %c0_46, %c0_47] : memref<5x120x80xf32, #tpu.memory_space<vmem>>, vector<1x120x80xf32>
    %91 = vector.shape_cast %90 : vector<1x120x80xf32> to vector<120x80xf32>
    %cst_48 = arith.constant dense<0.000000e+00> : vector<108x80xf32>
    %92 = tpu.matmul %71, %91, %cst_48 {dimension_numbers = #tpu.dot_dimension_numbers<[1], [0], [0], [1], [0, 0, 1, 1], [], []>} : vector<108x120xf32>, vector<120x80xf32>, vector<108x80xf32> -> vector<108x80xf32>
    %93 = vector.extract_strided_slice %92 {offsets = [12, 0], sizes = [96, 80], strides = [1, 1]} : vector<108x80xf32> to vector<96x80xf32>
    %94 = vector.extract_strided_slice %92 {offsets = [0, 0], sizes = [12, 80], strides = [1, 1]} : vector<108x80xf32> to vector<12x80xf32>
    %95 = tpu.concatenate %93, %94 in 0 : vector<96x80xf32>, vector<12x80xf32> -> vector<108x80xf32>
    %96 = arith.addf %89, %95 : vector<108x80xf32>
    %c4 = arith.constant 4 : index
    %c0_49 = arith.constant 0 : index
    %c0_50 = arith.constant 0 : index
    %97 = vector.load %arg4[%c4, %c0_49, %c0_50] : memref<5x120x80xf32, #tpu.memory_space<vmem>>, vector<1x120x80xf32>
    %98 = vector.shape_cast %97 : vector<1x120x80xf32> to vector<120x80xf32>
    %cst_51 = arith.constant dense<0.000000e+00> : vector<108x80xf32>
    %99 = tpu.matmul %71, %98, %cst_51 {dimension_numbers = #tpu.dot_dimension_numbers<[1], [0], [0], [1], [0, 0, 1, 1], [], []>} : vector<108x120xf32>, vector<120x80xf32>, vector<108x80xf32> -> vector<108x80xf32>
    %100 = vector.extract_strided_slice %99 {offsets = [16, 0], sizes = [92, 80], strides = [1, 1]} : vector<108x80xf32> to vector<92x80xf32>
    %101 = vector.extract_strided_slice %99 {offsets = [0, 0], sizes = [16, 80], strides = [1, 1]} : vector<108x80xf32> to vector<16x80xf32>
    %102 = tpu.concatenate %100, %101 in 0 : vector<92x80xf32>, vector<16x80xf32> -> vector<108x80xf32>
    %103 = arith.addf %96, %102 : vector<108x80xf32>
    %104 = vector.broadcast %72 : vector<1x80xf32> to vector<108x80xf32>
    %105 = arith.addf %103, %104 : vector<108x80xf32>
    %cst_52 = arith.constant 0.000000e+00 : f32
    %106 = vector.broadcast %cst_52 : f32 to vector<108x80xf32>
    %107 = arith.maximumf %105, %106 : vector<108x80xf32>
    %108 = tpu.iota {dimensions = array<i32: 0>} : vector<80x80xi32>
    %109 = tpu.iota {dimensions = array<i32: 1>} : vector<80x80xi32>
    %c1_i32_53 = arith.constant 1 : i32
    %110 = vector.broadcast %c1_i32_53 : i32 to vector<80x80xi32>
    %111 = arith.addi %109, %110 : vector<80x80xi32>
    %112 = arith.cmpi eq, %108, %111 : vector<80x80xi32>
    %113 = arith.extui %112 : vector<80x80xi1> to vector<80x80xi32>
    %114 = arith.sitofp %113 : vector<80x80xi32> to vector<80x80xf32>
    %cst_54 = arith.constant dense<0.000000e+00> : vector<108x80xf32>
    %115 = tpu.matmul %107, %114, %cst_54 {dimension_numbers = #tpu.dot_dimension_numbers<[1], [0], [0], [1], [0, 0, 1, 1], [], []>} : vector<108x80xf32>, vector<80x80xf32>, vector<108x80xf32> -> vector<108x80xf32>
    %116 = arith.maximumf %107, %115 : vector<108x80xf32>
    %117 = vector.extract_strided_slice %116 {offsets = [4, 0], sizes = [104, 80], strides = [1, 1]} : vector<108x80xf32> to vector<104x80xf32>
    %118 = vector.extract_strided_slice %116 {offsets = [0, 0], sizes = [4, 80], strides = [1, 1]} : vector<108x80xf32> to vector<4x80xf32>
    %119 = tpu.concatenate %117, %118 in 0 : vector<104x80xf32>, vector<4x80xf32> -> vector<108x80xf32>
    %120 = arith.maximumf %116, %119 : vector<108x80xf32>
    %c0_55 = arith.constant 0 : index
    %c0_56 = arith.constant 0 : index
    %c0_57 = arith.constant 0 : index
    %121 = vector.load %arg6[%c0_55, %c0_56, %c0_57] : memref<4x2x108xf32, #tpu.memory_space<vmem>>, vector<1x2x108xf32>
    %122 = vector.shape_cast %121 : vector<1x2x108xf32> to vector<2x108xf32>
    %cst_58 = arith.constant dense<0.000000e+00> : vector<2x80xf32>
    %123 = tpu.matmul %122, %120, %cst_58 {dimension_numbers = #tpu.dot_dimension_numbers<[1], [0], [0], [1], [0, 0, 1, 1], [], []>} : vector<2x108xf32>, vector<108x80xf32>, vector<2x80xf32> -> vector<2x80xf32>
    %c0_59 = arith.constant 0 : index
    %c0_60 = arith.constant 0 : index
    %c0_61 = arith.constant 0 : index
    %124 = vector.load %arg7[%c0_59, %c0_60, %c0_61] : memref<4x80x3xf32, #tpu.memory_space<vmem>>, vector<1x80x3xf32>
    %125 = vector.shape_cast %124 : vector<1x80x3xf32> to vector<80x3xf32>
    %cst_62 = arith.constant dense<0.000000e+00> : vector<2x3xf32>
    %126 = tpu.matmul %123, %125, %cst_62 {dimension_numbers = #tpu.dot_dimension_numbers<[1], [0], [0], [1], [0, 0, 1, 1], [], []>} : vector<2x80xf32>, vector<80x3xf32>, vector<2x3xf32> -> vector<2x3xf32>
    %c1_63 = arith.constant 1 : index
    %c0_64 = arith.constant 0 : index
    %c0_65 = arith.constant 0 : index
    %127 = vector.load %arg6[%c1_63, %c0_64, %c0_65] : memref<4x2x108xf32, #tpu.memory_space<vmem>>, vector<1x2x108xf32>
    %128 = vector.shape_cast %127 : vector<1x2x108xf32> to vector<2x108xf32>
    %cst_66 = arith.constant dense<0.000000e+00> : vector<2x80xf32>
    %129 = tpu.matmul %128, %120, %cst_66 {dimension_numbers = #tpu.dot_dimension_numbers<[1], [0], [0], [1], [0, 0, 1, 1], [], []>} : vector<2x108xf32>, vector<108x80xf32>, vector<2x80xf32> -> vector<2x80xf32>
    %c1_67 = arith.constant 1 : index
    %c0_68 = arith.constant 0 : index
    %c0_69 = arith.constant 0 : index
    %130 = vector.load %arg7[%c1_67, %c0_68, %c0_69] : memref<4x80x3xf32, #tpu.memory_space<vmem>>, vector<1x80x3xf32>
    %131 = vector.shape_cast %130 : vector<1x80x3xf32> to vector<80x3xf32>
    %cst_70 = arith.constant dense<0.000000e+00> : vector<2x3xf32>
    %132 = tpu.matmul %129, %131, %cst_70 {dimension_numbers = #tpu.dot_dimension_numbers<[1], [0], [0], [1], [0, 0, 1, 1], [], []>} : vector<2x80xf32>, vector<80x3xf32>, vector<2x3xf32> -> vector<2x3xf32>
    %133 = arith.addf %126, %132 : vector<2x3xf32>
    %c2_71 = arith.constant 2 : index
    %c0_72 = arith.constant 0 : index
    %c0_73 = arith.constant 0 : index
    %134 = vector.load %arg6[%c2_71, %c0_72, %c0_73] : memref<4x2x108xf32, #tpu.memory_space<vmem>>, vector<1x2x108xf32>
    %135 = vector.shape_cast %134 : vector<1x2x108xf32> to vector<2x108xf32>
    %cst_74 = arith.constant dense<0.000000e+00> : vector<2x80xf32>
    %136 = tpu.matmul %135, %120, %cst_74 {dimension_numbers = #tpu.dot_dimension_numbers<[1], [0], [0], [1], [0, 0, 1, 1], [], []>} : vector<2x108xf32>, vector<108x80xf32>, vector<2x80xf32> -> vector<2x80xf32>
    %c2_75 = arith.constant 2 : index
    %c0_76 = arith.constant 0 : index
    %c0_77 = arith.constant 0 : index
    %137 = vector.load %arg7[%c2_75, %c0_76, %c0_77] : memref<4x80x3xf32, #tpu.memory_space<vmem>>, vector<1x80x3xf32>
    %138 = vector.shape_cast %137 : vector<1x80x3xf32> to vector<80x3xf32>
    %cst_78 = arith.constant dense<0.000000e+00> : vector<2x3xf32>
    %139 = tpu.matmul %136, %138, %cst_78 {dimension_numbers = #tpu.dot_dimension_numbers<[1], [0], [0], [1], [0, 0, 1, 1], [], []>} : vector<2x80xf32>, vector<80x3xf32>, vector<2x3xf32> -> vector<2x3xf32>
    %140 = arith.addf %133, %139 : vector<2x3xf32>
    %c3_79 = arith.constant 3 : index
    %c0_80 = arith.constant 0 : index
    %c0_81 = arith.constant 0 : index
    %141 = vector.load %arg6[%c3_79, %c0_80, %c0_81] : memref<4x2x108xf32, #tpu.memory_space<vmem>>, vector<1x2x108xf32>
    %142 = vector.shape_cast %141 : vector<1x2x108xf32> to vector<2x108xf32>
    %cst_82 = arith.constant dense<0.000000e+00> : vector<2x80xf32>
    %143 = tpu.matmul %142, %120, %cst_82 {dimension_numbers = #tpu.dot_dimension_numbers<[1], [0], [0], [1], [0, 0, 1, 1], [], []>} : vector<2x108xf32>, vector<108x80xf32>, vector<2x80xf32> -> vector<2x80xf32>
    %c3_83 = arith.constant 3 : index
    %c0_84 = arith.constant 0 : index
    %c0_85 = arith.constant 0 : index
    %144 = vector.load %arg7[%c3_83, %c0_84, %c0_85] : memref<4x80x3xf32, #tpu.memory_space<vmem>>, vector<1x80x3xf32>
    %145 = vector.shape_cast %144 : vector<1x80x3xf32> to vector<80x3xf32>
    %cst_86 = arith.constant dense<0.000000e+00> : vector<2x3xf32>
    %146 = tpu.matmul %143, %145, %cst_86 {dimension_numbers = #tpu.dot_dimension_numbers<[1], [0], [0], [1], [0, 0, 1, 1], [], []>} : vector<2x80xf32>, vector<80x3xf32>, vector<2x3xf32> -> vector<2x3xf32>
    %147 = arith.addf %140, %146 : vector<2x3xf32>
    %c0_87 = arith.constant 0 : index
    %c0_88 = arith.constant 0 : index
    %148 = vector.load %arg8[%c0_87, %c0_88] : memref<5x10xf32, #tpu.memory_space<vmem>>, vector<1x3xf32>
    %149 = vector.broadcast %148 : vector<1x3xf32> to vector<2x3xf32>
    %150 = arith.addf %147, %149 : vector<2x3xf32>
    %cst_89 = arith.constant 0.000000e+00 : f32
    %151 = vector.broadcast %cst_89 : f32 to vector<2x3xf32>
    %152 = arith.maximumf %150, %151 : vector<2x3xf32>
    %c1_90 = arith.constant 1 : index
    %c0_91 = arith.constant 0 : index
    %153 = vector.load %arg8[%c1_90, %c0_91] : memref<5x10xf32, #tpu.memory_space<vmem>>, vector<3x10xf32>
    %cst_92 = arith.constant dense<0.000000e+00> : vector<2x10xf32>
    %154 = tpu.matmul %152, %153, %cst_92 {dimension_numbers = #tpu.dot_dimension_numbers<[1], [0], [0], [1], [0, 0, 1, 1], [], []>} : vector<2x3xf32>, vector<3x10xf32>, vector<2x10xf32> -> vector<2x10xf32>
    %c4_93 = arith.constant 4 : index
    %c0_94 = arith.constant 0 : index
    %155 = vector.load %arg8[%c4_93, %c0_94] : memref<5x10xf32, #tpu.memory_space<vmem>>, vector<1x10xf32>
    %156 = vector.broadcast %155 : vector<1x10xf32> to vector<2x10xf32>
    %157 = arith.addf %154, %156 : vector<2x10xf32>
    %c0_95 = arith.constant 0 : index
    %c0_96 = arith.constant 0 : index
    %c0_97 = arith.constant 0 : index
    %158 = vector.load %arg9[%c0_95, %c0_96, %c0_97] : memref<1x2x10xf32, #tpu.memory_space<vmem>>, vector<1x2x10xf32>
    %159 = vector.shape_cast %158 : vector<1x2x10xf32> to vector<2x10xf32>
    %160 = vector.shape_cast %157 : vector<2x10xf32> to vector<1x2x10xf32>
    tpu.vector_store %arg9[%c0_95, %c0_96, %c0_97], %160 {strides = array<i32>} : memref<1x2x10xf32, #tpu.memory_space<vmem>>, vector<1x2x10xf32>,
    return
  }
  func.func @transform_0(%arg0: i32) -> (i32, i32, i32) {
    %c0_i32 = arith.constant 0 : i32
    %c0_i32_0 = arith.constant 0 : i32
    %c0_i32_1 = arith.constant 0 : i32
    return %arg0, %c0_i32, %c0_i32_0 : i32, i32, i32
  }
  func.func @transform_1(%arg0: i32) -> (i32, i32, i32) {
    %c0_i32 = arith.constant 0 : i32
    %c0_i32_0 = arith.constant 0 : i32
    %c0_i32_1 = arith.constant 0 : i32
    %c0_i32_2 = arith.constant 0 : i32
    return %c0_i32, %c0_i32_0, %c0_i32_1 : i32, i32, i32
  }
  func.func @transform_2(%arg0: i32) -> (i32, i32, i32) {
    %c0_i32 = arith.constant 0 : i32
    %c0_i32_0 = arith.constant 0 : i32
    %c0_i32_1 = arith.constant 0 : i32
    %c0_i32_2 = arith.constant 0 : i32
    return %c0_i32, %c0_i32_0, %c0_i32_1 : i32, i32, i32
  }
  func.func @transform_3(%arg0: i32) -> (i32, i32, i32) {
    %c0_i32 = arith.constant 0 : i32
    %c0_i32_0 = arith.constant 0 : i32
    %c0_i32_1 = arith.constant 0 : i32
    %c0_i32_2 = arith.constant 0 : i32
    return %c0_i32, %c0_i32_0, %c0_i32_1 : i32, i32, i32
  }
  func.func @transform_4(%arg0: i32) -> (i32, i32) {
    %c0_i32 = arith.constant 0 : i32
    %c0_i32_0 = arith.constant 0 : i32
    %c0_i32_1 = arith.constant 0 : i32
    return %c0_i32, %c0_i32_0 : i32, i32
  }
  func.func @transform_5(%arg0: i32) -> (i32, i32, i32) {
    %c0_i32 = arith.constant 0 : i32
    %c0_i32_0 = arith.constant 0 : i32
    %c0_i32_1 = arith.constant 0 : i32
    %c0_i32_2 = arith.constant 0 : i32
    return %c0_i32, %c0_i32_0, %c0_i32_1 : i32, i32, i32
  }
  func.func @transform_6(%arg0: i32) -> (i32, i32, i32) {
    %c0_i32 = arith.constant 0 : i32
    %c0_i32_0 = arith.constant 0 : i32
    %c0_i32_1 = arith.constant 0 : i32
    %c0_i32_2 = arith.constant 0 : i32
    return %c0_i32, %c0_i32_0, %c0_i32_1 : i32, i32, i32
  }
  func.func @transform_7(%arg0: i32) -> (i32, i32) {
    %c0_i32 = arith.constant 0 : i32
    %c0_i32_0 = arith.constant 0 : i32
    %c0_i32_1 = arith.constant 0 : i32
    return %c0_i32, %c0_i32_0 : i32, i32
  }
  func.func @transform_8(%arg0: i32) -> (i32, i32, i32) {
    %c0_i32 = arith.constant 0 : i32
    %c0_i32_0 = arith.constant 0 : i32
    %c0_i32_1 = arith.constant 0 : i32
    return %arg0, %c0_i32, %c0_i32_0 : i32, i32, i32
  }
}

</mosaic_0001>

<bundles_post_ra>
// kernel: convnn_pt6_small_forward.1
= control target key start
LH: loop header
LB: loop body
LE: loop exit
PB: predicated region body
PF: predicated region fallthrough
CT: control target
= control target key end

     0   :  { %vm5376_vm0 = vcmask 1041408   ;;  %vm102_vm1 = vcmask 277504   ;;  %s5355_s0 = inlined_call_operand.vmem [shape: f32[1,108,162], index: 0, kind: input, shape index: {}]   ;;  %s5356_s1 = inlined_call_operand.vmem [shape: f32[3,162,104], index: 1, kind: input, shape index: {}]   ;;  %s5357_s2 = inlined_call_operand.vmem [shape: f32[3,104,120], index: 2, kind: input, shape index: {}]   ;;  %s5358_s3 = inlined_call_operand.vmem [shape: f32[5,120,80], index: 3, kind: input, shape index: {}]   ;;  %s5359_s4 = inlined_call_operand.vmem [shape: f32[3,128], index: 4, kind: input, shape index: {}]   ;;  %s5360_s5 = inlined_call_operand.vmem [shape: f32[4,2,108], index: 5, kind: input, shape index: {}]   ;;  %s5361_s6 = inlined_call_operand.vmem [shape: f32[4,80,3], index: 6, kind: input, shape index: {}]   ;;  %s5362_s7 = inlined_call_operand.vmem [shape: f32[5,10], index: 7, kind: input, shape index: {}]   ;;  %s5363_s8 = inlined_call_operand.hbm [shape: f32[1,2,10], index: 8, kind: output, shape index: {}]  }
   0x1   :  { %v2646_v0 = vld [vmem:[%s5356_s1 + $0x120] sm:$0xff]  ;;  %v2651_v1 = vld [vmem:[%s5356_s1 + $0x148] sm:$0x3]  ;;  %v2645_v2 = vld [vmem:[%s5356_s1 + $0x118] sm:$0xff] }
   0x2   :  { %149 = vmatpush.msra.mxu0 %v2646_v0  ;;  %3058 = vmatpush.msk.msra.mxu2 %vm5376_vm0, %v2651_v1  ;;  %v2650_v3 = vld [vmem:[%s5356_s1 + $0x140] sm:$0xff]  ;;  %v2644_v4 = vld [vmem:[%s5356_s1 + $0x110] sm:$0xff]  ;;  %v2649_v5 = vld [vmem:[%s5356_s1 + $0x138] sm:$0xff] }
   0x3   :  { %3059 = vmatpush.msk.msra.mxu3 %vm5376_vm0, %v2651_v1  ;;  %2652 = vmatpush.msk.msra.mxu1 %vm5376_vm0, %v2651_v1  ;;  %v2643_v6 = vld [vmem:[%s5356_s1 + $0x108] sm:$0xff]  ;;  %v2648_v7 = vld [vmem:[%s5356_s1 + $0x130] sm:$0xff]  ;;  %v2642_v8 = vld [vmem:[%s5356_s1 + $0x100] sm:$0xff] }
   0x4   :  { %150 = vmatpush.msra.mxu0 %v2645_v2  ;;  %3060 = vmatpush.msra.mxu2 %v2650_v3  ;;  %v2647_v9 = vld [vmem:[%s5356_s1 + $0x128] sm:$0xff]  ;;  %v3184_v10 = vld [vmem:[%s5355_s0 + $0x98] sm:$0xff]  ;;  %v79_v11 = vld [vmem:[%s5356_s1 + $0xa0] sm:$0x3] }
   0x5   :  { %3061 = vmatpush.msra.mxu3 %v2650_v3  ;;  %220 = vmatpush.msra.mxu1 %v2650_v3  ;;  %v2641_v12 = vld [vmem:[%s5356_s1 + $0xf8] sm:$0xff]  ;;  %v2640_v16 = vld [vmem:[%s5356_s1 + $0xf0] sm:$0xff]  ;;  %v2639_v19 = vld [vmem:[%s5356_s1 + $0xe8] sm:$0xff] }
   0x6   :  { %151 = vmatpush.msra.mxu0 %v2644_v4  ;;  %3062 = vmatpush.msra.mxu2 %v2649_v5  ;;  %v3195_v13 = vld [vmem:[%s5355_s0 + $0xd8] sm:$0xf]  ;;  %v73_v17 = vld [vmem:[%s5356_s1 + $0x70] sm:$0xff]  ;;  %v72_v20 = vld [vmem:[%s5356_s1 + $0x68] sm:$0xff] }
   0x7   :  { %3063 = vmatpush.msra.mxu3 %v2649_v5  ;;  %221 = vmatpush.msra.mxu1 %v2649_v5  ;;  %v74_v14 = vld [vmem:[%s5356_s1 + $0x78] sm:$0xff]  ;;  %v77_v18 = vld [vmem:[%s5356_s1 + $0x90] sm:$0xff]  ;;  %v76_v21 = vld [vmem:[%s5356_s1 + $0x88] sm:$0xff] }
   0x8   :  { %152 = vmatpush.msra.mxu0 %v2643_v6  ;;  %3064 = vmatpush.msra.mxu2 %v2648_v7  ;;  %v78_v15 = vld [vmem:[%s5356_s1 + $0x98] sm:$0xff]  ;;  %v2638_v22 = vld [vmem:[%s5356_s1 + $0xe0] sm:$0xff]  ;;  %v3235_v24 = vld [vmem:[%s5355_s0 + $0x8] sm:$0xff] }
   0x9   :  { %3065 = vmatpush.msra.mxu3 %v2648_v7  ;;  %222 = vmatpush.msra.mxu1 %v2648_v7  ;;  %v71_v23 = vld [vmem:[%s5356_s1 + $0x60] sm:$0xff]  ;;  %v3240_v25 = vld [vmem:[%s5355_s0 + $0xa8] sm:$0xff]  ;;  %v2637_v27 = vld [vmem:[%s5356_s1 + $0xd8] sm:$0xff] }
   0xa   :  { %153 = vmatpush.msra.mxu0 %v2642_v8  ;;  %3066 = vmatpush.msra.mxu2 %v2647_v9  ;;  %v75_v26 = vld [vmem:[%s5356_s1 + $0x80] sm:$0xff]  ;;  %v70_v28 = vld [vmem:[%s5356_s1 + $0x58] sm:$0xff]  ;;  %v2636_v29 = vld [vmem:[%s5356_s1 + $0xd0] sm:$0xff] }
   0xb   :  { %3067 = vmatpush.msra.mxu3 %v2647_v9  ;;  %2662 = vmatmul.msk.f32.vlgmr.msra.gmra.mxu2 %vm102_vm1, %v3184_v10  ;;  %v69_v30 = vld [vmem:[%s5356_s1 + $0x50] sm:$0xff] }
   0xc   :  { %154 = vmatpush.msra.mxu0 %v2641_v12  ;;  %2666 = vmatmul.msk.f32.vlgmr.msra.gmra.mxu3 %vm102_vm1, %v3195_v13 }
   0xd   :  { %2667 = vmatpush.msk.msrb.mxu3 %vm5376_vm0, %v79_v11  ;;  %330 = vmatpush.msrb.mxu2 %v74_v14 }
   0xe   :  { %155 = vmatpush.msra.mxu0 %v2640_v16  ;;  %223 = vmatpush.msra.mxu1 %v2647_v9 }
   0xf   :  { %401 = vmatpush.msrb.mxu3 %v78_v15  ;;  %331 = vmatpush.msrb.mxu2 %v73_v17 }
  0x10   :  { %156 = vmatpush.msra.mxu0 %v2639_v19  ;;  %2653 = vmatmul.msk.f32.vlgmr.msra.gmra.mxu1 %vm102_vm1, %v3235_v24 }
  0x11   :  { %402 = vmatpush.msrb.mxu3 %v77_v18  ;;  %332 = vmatpush.msrb.mxu2 %v72_v20 }
  0x12   :  { %157 = vmatpush.msra.mxu0 %v2638_v22 }
  0x13   :  { %403 = vmatpush.msrb.mxu3 %v76_v21  ;;  %333 = vmatpush.msrb.mxu2 %v71_v23 }
  0x14   :  { %2663 = vmatmul.msk.f32.gmra.mxu2 %vm102_vm1, %v3240_v25  ;;  %158 = vmatpush.msra.mxu0 %v2637_v27 }
  0x15   :  { %404 = vmatpush.msrb.mxu3 %v75_v26  ;;  %334 = vmatpush.msrb.mxu2 %v70_v28 }
  0x16   :  { %13 = vsyncpa [#allocation3], 0  ;;  %2668 = vmatmul.msk.f32.vlgmr.msrb.gmra.mxu3 %vm102_vm1, %v3235_v24  ;;  %v2635_v31 = vld [vmem:[%s5356_s1 + $0xc8] sm:$0xff]  ;;  %159 = vmatpush.msra.mxu0 %v2636_v29  ;;  %v2634_v33 = vld [vmem:[%s5356_s1 + $0xc0] sm:$0xff]  ;;  %vm281_vm15 = vcmask 1046528   ;;  %s3102_s28 = smov [#allocation2]  }
  0x17   :  { %v68_v32 = vld [vmem:[%s5356_s1 + $0x48] sm:$0xff]  ;;  %335 = vmatpush.msrb.mxu2 %v69_v30  ;;  %v67_v34 = vld [vmem:[%s5356_s1 + $0x40] sm:$0xff]  ;;  %v3278_v35 = vld [vmem:[%s5355_s0 + $0xb8] sm:$0xff]  ;;  %s2620_s29 = sshll.u32 %s3102_s28, 4  ;;  %s2621_s29 = int_to_ptr.vmem [resolvable:$true] %s2620_s29 }
  0x18   :  { %160 = vmatpush.msra.mxu0 %v2635_v31  ;;  %v3283_v36 = vld [vmem:[%s5355_s0 + $0x18] sm:$0xff]  ;;  %v2632_v39 = vld [vmem:[%s5356_s1 + $0xb0] sm:$0xff]  ;;  %v2631_v41 = vld [vmem:[%s5356_s1 + $0xa8] sm:$0xff] }
  0x19   :  { %336 = vmatpush.msrb.mxu2 %v68_v32  ;;  %v2633_v37 = vld [vmem:[%s5356_s1 + $0xb8] sm:$0xff]  ;;  %2654 = vmatmul.msk.f32.gmra.mxu1 %vm102_vm1, %v3283_v36  ;;  %v65_v40 = vld [vmem:[%s5356_s1 + $0x30] sm:$0xff]  ;;  %v64_v42 = vld [vmem:[%s5356_s1 + $0x28] sm:$0xff] }
  0x1a   :  { %v66_v38 = vld [vmem:[%s5356_s1 + $0x38] sm:$0xff]  ;;  %161 = vmatpush.msra.mxu0 %v2634_v33  ;;  %v3312_v43 = vld [vmem:[%s5355_s0] sm:$0xff]  ;;  %v3320_v45 = vld [vmem:[%s5355_s0 + $0xc8] sm:$0xff] }
  0x1b   :  { %337 = vmatpush.msrb.mxu2 %v67_v34  ;;  %v63_v44 = vld [vmem:[%s5356_s1 + $0x20] sm:$0xff]  ;;  %v3325_v46 = vld [vmem:[%s5355_s0 + $0x28] sm:$0xff]  ;;  %v62_v47 = vld [vmem:[%s5356_s1 + $0x18] sm:$0xff] }
  0x1c   :  { %2664 = vmatmul.msk.f32.gmra.mxu2 %vm102_vm1, %v3278_v35  ;;  %162 = vmatpush.msra.mxu0 %v2633_v37  ;;  %v61_v48 = vld [vmem:[%s5356_s1 + $0x10] sm:$0xff]  ;;  %v60_v49 = vld [vmem:[%s5356_s1 + $0x8] sm:$0xff]  ;;  %v59_v51 = vld [vmem:[%s5356_s1] sm:$0xff] }
  0x1d   :  { %338 = vmatpush.msrb.mxu2 %v66_v38  ;;  %v3346_v50 = vld [vmem:[%s5355_s0 + $0x10] sm:$0xff]  ;;  %v3354_v52 = vld [vmem:[%s5355_s0 + $0x38] sm:$0xff]  ;;  %v3365_v53 = vld [vmem:[%s5355_s0 + $0x20] sm:$0xff] }
  0x1e   :  { %2669 = vmatmul.msk.f32.gmra.mxu3 %vm102_vm1, %v3283_v36  ;;  %163 = vmatpush.msra.mxu0 %v2632_v39  ;;  %v3370_v54 = vld [vmem:[%s5355_s0 + $0x48] sm:$0xff]  ;;  %v3381_v55 = vld [vmem:[%s5355_s0 + $0x30] sm:$0xff]  ;;  %v3386_v56 = vld [vmem:[%s5355_s0 + $0x58] sm:$0xff] }
  0x1f   :  { %339 = vmatpush.msrb.mxu2 %v65_v40  ;;  %v3397_v57 = vld [vmem:[%s5355_s0 + $0x40] sm:$0xff]  ;;  %v3402_v58 = vld [vmem:[%s5355_s0 + $0x68] sm:$0xff]  ;;  %v2702_v59 = vld [vmem:[%s5356_s1 + $0x1f0] sm:$0x3] }
  0x20   :  { %164 = vmatpush.msra.mxu0 %v2631_v41  ;;  %v3416_v60 = vld [vmem:[%s5355_s0 + $0x50] sm:$0xff]  ;;  %2703 = vmatpush.msk.msra.mxu3 %vm5376_vm0, %v2702_v59  ;;  %v3422_v61 = vld [vmem:[%s5355_s0 + $0x78] sm:$0xff]  ;;  %v2697_v62 = vld [vmem:[%s5356_s1 + $0x1c8] sm:$0xff] }
  0x21   :  { %340 = vmatpush.msrb.mxu2 %v64_v42  ;;  %165 = vmatmul.f32.vlgmr.msra.gmra.mxu0 %v3312_v43  ;;  %v2696_v63 = vld [vmem:[%s5356_s1 + $0x1c0] sm:$0xff]  ;;  %v2695_v0 = vld [vmem:[%s5356_s1 + $0x1b8] sm:$0xff]  ;;  %v3447_v2 = vld [vmem:[%s5355_s0 + $0x88] sm:$0xff] }
  0x22   :  { %2655 = vmatmul.msk.f32.gmra.mxu1 %vm102_vm1, %v3325_v46  ;;  %v3442_v1 = vld [vmem:[%s5355_s0 + $0x60] sm:$0xff]  ;;  %v2694_v3 = vld [vmem:[%s5356_s1 + $0x1b0] sm:$0xff]  ;;  %v2693_v4 = vld [vmem:[%s5356_s1 + $0x1a8] sm:$0xff] }
  0x23   :  { %341 = vmatpush.msrb.mxu2 %v63_v44  ;;  %473 = vmatpush.msrb.mxu1 %v2697_v62  ;;  %v2692_v5 = vld [vmem:[%s5356_s1 + $0x1a0] sm:$0xff]  ;;  %v2691_v6 = vld [vmem:[%s5356_s1 + $0x198] sm:$0xff]  ;;  %v3470_v7 = vld [vmem:[%s5355_s0 + $0x70] sm:$0xff] }
  0x24   :  { %2665 = vmatmul.msk.f32.gmra.mxu2 %vm102_vm1, %v3320_v45  ;;  %v2690_v8 = vld [vmem:[%s5356_s1 + $0x190] sm:$0xff]  ;;  %v2689_v9 = vld [vmem:[%s5356_s1 + $0x188] sm:$0xff]  ;;  %v2688_v11 = vld [vmem:[%s5356_s1 + $0x180] sm:$0xff] }
  0x25   :  { %342 = vmatpush.msrb.mxu2 %v62_v47  ;;  %474 = vmatpush.msrb.mxu1 %v2696_v63  ;;  %v2701_v12 = vld [vmem:[%s5356_s1 + $0x1e8] sm:$0xff]  ;;  %v2687_v14 = vld [vmem:[%s5356_s1 + $0x178] sm:$0xff]  ;;  %v46_v15 = vld [vmem:[%s5355_s0 + $0x80] sm:$0xff] }
  0x26   :  { %2670 = vmatmul.msk.f32.gmra.mxu3 %vm102_vm1, %v3325_v46  ;;  %v2700_v16 = vld [vmem:[%s5356_s1 + $0x1e0] sm:$0xff]  ;;  %v2686_v17 = vld [vmem:[%s5356_s1 + $0x170] sm:$0xff]  ;;  %v2699_v18 = vld [vmem:[%s5356_s1 + $0x1d8] sm:$0xff] }
  0x27   :  { %343 = vmatpush.msrb.mxu2 %v61_v48  ;;  %475 = vmatpush.msrb.mxu1 %v2695_v0  ;;  %v2685_v19 = vld [vmem:[%s5356_s1 + $0x168] sm:$0xff]  ;;  %v2698_v20 = vld [vmem:[%s5356_s1 + $0x1d0] sm:$0xff]  ;;  %v2684_v21 = vld [vmem:[%s5356_s1 + $0x160] sm:$0xff] }
  0x28   :  { %544 = vmatpush.msra.mxu3 %v2701_v12  ;;  %v2683_v22 = vld [vmem:[%s5356_s1 + $0x158] sm:$0xff]  ;;  %v48_v23 = vld [vmem:[%s5355_s0 + $0x90] sm:$0xff]  ;;  %v50_v27 = vld [vmem:[%s5355_s0 + $0xa0] sm:$0xff] }
  0x29   :  { %344 = vmatpush.msrb.mxu2 %v60_v49  ;;  %168 = vmatmul.f32.gmra.mxu0 %v3346_v50  ;;  %v2682_v26 = vld [vmem:[%s5356_s1 + $0x150] sm:$0xff]  ;;  %v54_v29 = vld [vmem:[%s5355_s0 + $0xc0] sm:$0xff] }
  0x2a   :  { %2656 = vmatmul.msk.f32.gmra.mxu1 %vm102_vm1, %v3354_v52  ;;  %545 = vmatpush.msra.mxu3 %v2700_v16  ;;  %v52_v28 = vld [vmem:[%s5355_s0 + $0xb0] sm:$0xff] }
  0x2b   :  { %345 = vmatpush.msrb.mxu2 %v59_v51  ;;  %476 = vmatpush.msrb.mxu1 %v2694_v3  ;;  %v56_v30 = vld [vmem:[%s5355_s0 + $0xd0] sm:$0xf]  ;;  %s2622_s0 = sshll.u32 %s5363_s8, 4  ;;  %s2623_s0 = int_to_ptr.hbm [resolvable:$true] %s2622_s0 }
  0x2c   :  { %346 = vmatmul.f32.vlgmr.msrb.gmra.mxu2 %v3312_v43  ;;  %546 = vmatpush.msra.mxu3 %v2699_v18 }
  0x2d   :  { %477 = vmatpush.msrb.mxu1 %v2693_v4 }
  0x2e   :  { %2671 = vmatmul.msk.f32.gmra.mxu3 %vm102_vm1, %v3354_v52 }
  0x2f   :  { %478 = vmatpush.msrb.mxu1 %v2692_v5  ;;  %547 = vmatpush.msra.mxu3 %v2698_v20 }
  0x31   :  { %171 = vmatmul.f32.gmra.mxu0 %v3365_v53  ;;  %479 = vmatpush.msrb.mxu1 %v2691_v6 }
  0x32   :  { %2657 = vmatmul.msk.f32.gmra.mxu1 %vm102_vm1, %v3370_v54 }
  0x33   :  { %480 = vmatpush.msrb.mxu1 %v2690_v8 }
  0x34   :  { %349 = vmatmul.f32.gmra.mxu2 %v3346_v50 }
  0x35   :  { %481 = vmatpush.msrb.mxu1 %v2689_v9 }
  0x36   :  { %2672 = vmatmul.msk.f32.gmra.mxu3 %vm102_vm1, %v3370_v54 }
  0x37   :  { %482 = vmatpush.msrb.mxu1 %v2688_v11 }
  0x39   :  { %174 = vmatmul.f32.gmra.mxu0 %v3381_v55  ;;  %483 = vmatpush.msrb.mxu1 %v2687_v14 }
  0x3a   :  { %2658 = vmatmul.msk.f32.gmra.mxu1 %vm102_vm1, %v3386_v56 }
  0x3b   :  { %484 = vmatpush.msrb.mxu1 %v2686_v17 }
  0x3c   :  { %352 = vmatmul.f32.gmra.mxu2 %v3365_v53 }
  0x3d   :  { %485 = vmatpush.msrb.mxu1 %v2685_v19 }
  0x3e   :  { %2673 = vmatmul.msk.f32.gmra.mxu3 %vm102_vm1, %v3386_v56 }
  0x3f   :  { %486 = vmatpush.msrb.mxu1 %v2684_v21 }
  0x41   :  { %177 = vmatmul.f32.gmra.mxu0 %v3397_v57  ;;  %487 = vmatpush.msrb.mxu1 %v2683_v22 }
  0x42   :  { %2659 = vmatmul.msk.f32.gmra.mxu1 %vm102_vm1, %v3402_v58 }
  0x43   :  { %488 = vmatpush.msrb.mxu1 %v2682_v26 }
  0x44   :  { %355 = vmatmul.f32.gmra.mxu2 %v3381_v55 }
  0x46   :  { %2674 = vmatmul.msk.f32.gmra.mxu3 %vm102_vm1, %v3402_v58 }
  0x49   :  { %180 = vmatmul.f32.gmra.mxu0 %v3416_v60 }
  0x4a   :  { %2660 = vmatmul.msk.f32.gmra.mxu1 %vm102_vm1, %v3422_v61 }
  0x4c   :  { %358 = vmatmul.f32.gmra.mxu2 %v3397_v57 }
  0x4e   :  { %2675 = vmatmul.msk.f32.gmra.mxu3 %vm102_vm1, %v3422_v61 }
  0x51   :  { %183 = vmatmul.f32.gmra.mxu0 %v3442_v1 }
  0x52   :  { %2661 = vmatmul.msk.f32.gmra.mxu1 %vm102_vm1, %v3447_v2 }
  0x54   :  { %361 = vmatmul.f32.gmra.mxu2 %v3416_v60 }
  0x56   :  { %2676 = vmatmul.msk.f32.gmra.mxu3 %vm102_vm1, %v3447_v2 }
  0x59   :  { %186 = vmatmul.f32.gmra.mxu0 %v3470_v7 }
  0x5a   :  { %489 = vmatmul.f32.vlgmr.msrb.gmra.mxu1 %v3312_v43 }
  0x5c   :  { %364 = vmatmul.f32.gmra.mxu2 %v3442_v1 }
  0x5e   :  { %2677 = vmatmul.msk.f32.gmra.mxu3 %vm102_vm1, %v3184_v10 }
  0x61   :  { %189 = vmatmul.f32.gmra.mxu0 %v46_v15 }
  0x62   :  { %492 = vmatmul.f32.gmra.mxu1 %v3346_v50 }
  0x64   :  { %367 = vmatmul.f32.gmra.mxu2 %v3470_v7 }
  0x66   :  { %2678 = vmatmul.msk.f32.gmra.mxu3 %vm102_vm1, %v3240_v25 }
  0x69   :  { %192 = vmatmul.f32.gmra.mxu0 %v48_v23 }
  0x6a   :  { %495 = vmatmul.f32.gmra.mxu1 %v3365_v53  ;;  %v693_v53 = vlaneseq }
  0x6c   :  { %370 = vmatmul.f32.gmra.mxu2 %v46_v15 }
  0x6e   :  { %2679 = vmatmul.msk.f32.gmra.mxu3 %vm102_vm1, %v3278_v35 }
  0x71   :  { %195 = vmatmul.f32.gmra.mxu0 %v50_v27 }
  0x72   :  { %498 = vmatmul.f32.gmra.mxu1 %v3381_v55 }
  0x74   :  { %373 = vmatmul.f32.gmra.mxu2 %v48_v23 }
  0x76   :  { %2680 = vmatmul.msk.f32.gmra.mxu3 %vm102_vm1, %v3320_v45 }
  0x79   :  { %198 = vmatmul.f32.gmra.mxu0 %v52_v28 }
  0x7a   :  { %501 = vmatmul.f32.gmra.mxu1 %v3397_v57 }
  0x7c   :  { %376 = vmatmul.f32.gmra.mxu2 %v50_v27 }
  0x7e   :  { %2681 = vmatmul.msk.f32.gmra.mxu3 %vm102_vm1, %v3195_v13 }
  0x81   :  { %201 = vmatmul.f32.gmra.mxu0 %v54_v29 }
  0x82   :  { %504 = vmatmul.f32.gmra.mxu1 %v3416_v60 }
  0x84   :  { %379 = vmatmul.f32.gmra.mxu2 %v52_v28 }
  0x86   :  { %2704 = vmatmul.msk.f32.vlgmr.msra.gmra.mxu3 %vm102_vm1, %v3235_v24 }
  0x89   :  { %204 = vmatmul.f32.gmra.mxu0 %v56_v30 }
  0x8a   :  { %507 = vmatmul.f32.gmra.mxu1 %v3442_v1 }
  0x8c   :  { %382 = vmatmul.f32.gmra.mxu2 %v54_v29 }
  0x8d   :  { %v3554_v32 = vpop.f32.mrf.mxu1 }
  0x8e   :  { %2705 = vmatmul.msk.f32.gmra.mxu3 %vm102_vm1, %v3283_v36  ;;  %v3590_v43 = vpop.f32.mrf.mxu2 }
  0x8f   :  { %v3551_v31 = vpop.f32.mrf.mxu3 }
  0x92   :  { %510 = vmatmul.f32.gmra.mxu1 %v3470_v7 }
  0x94   :  { %385 = vmatmul.f32.gmra.mxu2 %v56_v30 }
  0x96   :  { %2706 = vmatmul.msk.f32.gmra.mxu3 %vm102_vm1, %v3325_v46  ;;  %v3563_v33 = vpop.f32.mrf.mxu1 }
  0x97   :  { %v3598_v47 = vpop.f32.mrf.mxu2 }
  0x99   :  { %v3558_v24 = vpop.f32.mrf.mxu3 }
  0x9a   :  { %513 = vmatmul.f32.gmra.mxu1 %v46_v15 }
  0x9e   :  { %2707 = vmatmul.msk.f32.gmra.mxu3 %vm102_vm1, %v3354_v52 }
  0x9f   :  { %v3572_v37 = vpop.f32.mrf.mxu1  ;;  %v3608_v50 = vpop.f32.mrf.mxu2 }
  0xa1   :  { %v3565_v34 = vpop.f32.mrf.mxu3 }
  0xa2   :  { %516 = vmatmul.f32.gmra.mxu1 %v48_v23 }
  0xa6   :  { %2708 = vmatmul.msk.f32.gmra.mxu3 %vm102_vm1, %v3370_v54  ;;  %v3616_v54 = vshrl.u32 %v693_v53, 7 }
  0xa7   :  { %v3578_v39 = vpop.f32.mrf.mxu1 }
  0xa8   :  { %v3628_v59 = vadd.s32 88, %v3616_v54  ;;  %v3652_v62 = vadd.s32 72, %v3616_v54  ;;  %v3672_v0 = vadd.s32 56, %v3616_v54  ;;  %v3681_v4 = vadd.s32 48, %v3616_v54 }
  0xa9   :  { %v3570_v36 = vpop.f32.mrf.mxu3  ;;  %v3692_v5 = vadd.s32 40, %v3616_v54  ;;  %v3712_v7 = vadd.s32 24, %v3616_v54  ;;  %v3721_v8 = vadd.s32 16, %v3616_v54  ;;  %v3730_v14 = vadd.s32 8, %v3616_v54 }
  0xaa   :  { %519 = vmatmul.f32.gmra.mxu1 %v50_v27 }
  0xab   :  { %5379 = vst [vmem:[#allocation6_spill] sm:$0xff] %v3712_v7 }
  0xac   :  { %5380 = vst [vmem:[#allocation7_spill] sm:$0xff] %v3721_v8 }
  0xad   :  { %5381 = vst [vmem:[#allocation8_spill] sm:$0xff] %v3730_v14 }
  0xae   :  { %2709 = vmatmul.msk.f32.gmra.mxu3 %vm102_vm1, %v3386_v56  ;;  %v3621_v56 = vadd.s32 96, %v3616_v54 }
  0xaf   :  { %v3584_v41 = vpop.f32.mrf.mxu1 }
  0xb1   :  { %v3576_v38 = vpop.f32.mrf.mxu3 }
  0xb2   :  { %522 = vmatmul.f32.gmra.mxu1 %v52_v28 }
  0xb6   :  { %2710 = vmatmul.msk.f32.gmra.mxu3 %vm102_vm1, %v3402_v58  ;;  %v3625_v58 = vpop.f32.mrf.mxu2 }
  0xb7   :  { %v3594_v44 = vpop.f32.mrf.mxu1 }
  0xb9   :  { %v3582_v40 = vpop.f32.mrf.mxu3 }
  0xba   :  { %525 = vmatmul.f32.gmra.mxu1 %v54_v29 }
  0xbe   :  { %2711 = vmatmul.msk.f32.gmra.mxu3 %vm102_vm1, %v3422_v61  ;;  %v3641_v61 = vadd.s32 80, %v3616_v54 }
  0xbf   :  { %v3604_v49 = vpop.f32.mrf.mxu1 }
  0xc1   :  { %v3588_v42 = vpop.f32.mrf.mxu3 }
  0xc2   :  { %528 = vmatmul.f32.gmra.mxu1 %v56_v30 }
  0xc6   :  { %2712 = vmatmul.msk.f32.gmra.mxu3 %vm102_vm1, %v3447_v2  ;;  %v347_v2 = vpop.f32.mrf.mxu2 }
  0xc7   :  { %v3612_v52 = vpop.f32.mrf.mxu1 }
  0xc9   :  { %v3596_v46 = vpop.f32.mrf.mxu3 }
  0xce   :  { %2713 = vmatmul.msk.f32.gmra.mxu3 %vm102_vm1, %v3184_v10  ;;  %v708_v10 = vand.u32 127, %v693_v53  ;;  %v350_v11 = vpop.f32.mrf.mxu2 }
  0xcf   :  { %v3638_v60 = vpop.f32.mrf.mxu1 }
  0xd0   :  { %v3623_v57 = vadd.s32 1, %v708_v10 }
  0xd1   :  { %v3602_v48 = vpop.f32.mrf.mxu3 }
  0xd2   :  { %vm722_vm2 = vcmp.eq.s32.totalorder %v3621_v56, %v3623_v57  ;;  %vm721_vm3 = vcmp.eq.s32.totalorder %v3628_v59, %v3623_v57  ;;  %vm720_vm4 = vcmp.eq.s32.totalorder %v3641_v61, %v3623_v57  ;;  %vm719_vm5 = vcmp.eq.s32.totalorder %v3652_v62, %v3623_v57 }
  0xd3   :  { %vm717_vm7 = vcmp.eq.s32.totalorder %v3672_v0, %v3623_v57  ;;  %vm716_vm8 = vcmp.eq.s32.totalorder %v3681_v4, %v3623_v57  ;;  %vm715_vm9 = vcmp.eq.s32.totalorder %v3692_v5, %v3623_v57  ;;  %vm713_vm11 = vcmp.eq.s32.totalorder %v3712_v7, %v3623_v57 }
  0xd4   :  { %vm712_vm12 = vcmp.eq.s32.totalorder %v3721_v8, %v3623_v57  ;;  %vm5375_vm13 = vcmp.eq.s32.totalorder %v3730_v14, %v3623_v57  ;;  %vm5372_vm14 = vcmp.eq.s32.totalorder %v3616_v54, %v3623_v57 }
  0xd6   :  { %2714 = vmatmul.msk.f32.gmra.mxu3 %vm102_vm1, %v3240_v25  ;;  %v166_v25 = vpop.f32.mrf.mxu0  ;;  %v353_v17 = vpop.f32.mrf.mxu2 }
  0xd7   :  { %v490_v3 = vpop.f32.mrf.mxu1  ;;  %v3753_v20 = vadd.f32 %v3554_v32, %v166_v25 }
  0xd9   :  { %v3610_v51 = vpop.f32.mrf.mxu3  ;;  %v282_v23 = vrot.slane %v3753_v20, 1 }
  0xde   :  { %2715 = vmatmul.msk.f32.gmra.mxu3 %vm102_vm1, %v3278_v35  ;;  %v5364_v35 = vmov 1.0   ;;  %v169_v1 = vpop.f32.mrf.mxu0  ;;  %v356_v28 = vpop.f32.mrf.mxu2 }
  0xdf   :  { %2731 = vmatpush.msk.msrb.mxu0 %vm722_vm2, %v5364_v35  ;;  %v493_v12 = vpop.f32.mrf.mxu1  ;;  %v229_v21 = vadd.f32 %v3563_v33, %v169_v1 }
  0xe1   :  { %v3618_v55 = vpop.f32.mrf.mxu3  ;;  %2732 = vmatpush.msk.msrb.mxu0 %vm721_vm3, %v5364_v35  ;;  %v283_v26 = vrot.slane %v229_v21, 1 }
  0xe3   :  { %2733 = vmatpush.msk.msrb.mxu0 %vm720_vm4, %v5364_v35  ;;  %v284_v30 = vsel %vm281_vm15, %v282_v23, %v283_v26  ;;  %v3766_v23 = vld [vmem:[%s5359_s4] ss:$0 sm:$0xff] }
  0xe5   :  { %2734 = vmatpush.msk.msrb.mxu0 %vm719_vm5, %v5364_v35 }
  0xe6   :  { %2716 = vmatmul.msk.f32.gmra.mxu3 %vm102_vm1, %v3320_v45  ;;  %v3663_v45 = vadd.s32 64, %v3616_v54  ;;  %v172_v9 = vpop.f32.mrf.mxu0  ;;  %v359_v1 = vpop.f32.mrf.mxu2 }
  0xe7   :  { %v496_v19 = vpop.f32.mrf.mxu1  ;;  %v232_v53 = vadd.f32 %v3572_v37, %v172_v9 }
  0xe8   :  { %vm718_vm6 = vcmp.eq.s32.totalorder %v3663_v45, %v3623_v57 }
  0xe9   :  { %v3658_v63 = vpop.f32.mrf.mxu3  ;;  %2735 = vmatpush.msk.msrb.mxu0 %vm718_vm6, %v5364_v35  ;;  %v285_v32 = vrot.slane %v232_v53, 1 }
  0xeb   :  { %2736 = vmatpush.msk.msrb.mxu0 %vm717_vm7, %v5364_v35 }
  0xed   :  { %2737 = vmatpush.msk.msrb.mxu0 %vm716_vm8, %v5364_v35 }
  0xee   :  { %2717 = vmatmul.msk.f32.gmra.mxu3 %vm102_vm1, %v3195_v13  ;;  %v3703_v13 = vadd.s32 32, %v3616_v54  ;;  %v175_v16 = vpop.f32.mrf.mxu0  ;;  %vm5377_vm1 = vcmask 1045504  }
  0xef   :  { %2738 = vmatpush.msk.msrb.mxu0 %vm715_vm9, %v5364_v35  ;;  %v499_v29 = vpop.f32.mrf.mxu1 }
  0xf0   :  { %5378 = vst [vmem:[#allocation5_spill] sm:$0xff] %v3703_v13  ;;  %vm714_vm10 = vcmp.eq.s32.totalorder %v3703_v13, %v3623_v57 }
  0xf1   :  { %v3698_v6 = vpop.f32.mrf.mxu3  ;;  %2739 = vmatpush.msk.msrb.mxu0 %vm714_vm10, %v5364_v35 }
  0xf3   :  { %2740 = vmatpush.msk.msrb.mxu0 %vm713_vm11, %v5364_v35 }
  0xf5   :  { %2741 = vmatpush.msk.msrb.mxu0 %vm712_vm12, %v5364_v35 }
  0xf6   :  { %v178_v27 = vpop.f32.mrf.mxu0 }
  0xf7   :  { %2742 = vmatpush.msk.msrb.mxu0 %vm5375_vm13, %v5364_v35  ;;  %v502_v37 = vpop.f32.mrf.mxu1  ;;  %vm325_vm13 = vcmask 1042432  }
  0xf9   :  { %v3736_v15 = vpop.f32.mrf.mxu3  ;;  %2743 = vmatpush.msk.msrb.mxu0 %vm5372_vm14, %v5364_v35  ;;  %v348_v35 = vadd.f32 %v347_v2, %v284_v30  ;;  %v235_v2 = vadd.f32 %v3578_v39, %v175_v16  ;;  %vm749_vm14 = vcmask 850944  }
  0xfb   :  { %v407_v7 = vadd.f32 %v3558_v24, %v348_v35  ;;  %v287_v53 = vrot.slane %v235_v2, 1 }
  0xfd   :  { %v288_v39 = vsel %vm281_vm15, %v285_v32, %v287_v53 }
  0xfe   :  { %v181_v33 = vpop.f32.mrf.mxu0 }
 0x101   :  { %v3750_v18 = vpop.f32.mrf.mxu3 }
 0x109   :  { %v549_v22 = vpop.f32.mrf.mxu3 }
 0x10a   :  { %v3759_v10 = vadd.f32 %v549_v22, %v490_v3  ;;  %v286_v3 = vsel %vm281_vm15, %v283_v26, %v285_v32 }
 0x10c   :  { %v606_v8 = vrot.slane %v3759_v10, 2 }
 0x111   :  { %v552_v14 = vpop.f32.mrf.mxu3 }
 0x112   :  { %v553_v25 = vadd.f32 %v552_v14, %v493_v12  ;;  %v351_v14 = vadd.f32 %v350_v11, %v286_v3  ;;  %v362_v11 = vpop.f32.mrf.mxu2  ;;  %v354_v3 = vadd.f32 %v353_v17, %v288_v39 }
 0x114   :  { %v607_v21 = vrot.slane %v553_v25, 2  ;;  %v410_v13 = vadd.f32 %v3565_v34, %v351_v14  ;;  %v413_v32 = vadd.f32 %v3570_v36, %v354_v3 }
 0x116   :  { %v608_v9 = vsel %vm5377_vm1, %v606_v8, %v607_v21  ;;  %v184_v8 = vpop.f32.mrf.mxu0 }
 0x117   :  { %v650_v12 = vadd.f32 %v608_v9, %v407_v7  ;;  %v238_v7 = vadd.f32 %v3584_v41, %v178_v27 }
 0x119   :  { %v555_v22 = vpop.f32.mrf.mxu3  ;;  %v3772_v30 = vadd.f32 %v3766_v23, %v650_v12  ;;  %v289_v34 = vrot.slane %v238_v7, 1 }
 0x11a   :  { %v556_v24 = vadd.f32 %v555_v22, %v496_v19  ;;  %v505_v19 = vpop.f32.mrf.mxu1 }
 0x11b   :  { %v679_v35 = vmax.f32 %v3772_v30, 0.0  ;;  %v290_v41 = vsel %vm281_vm15, %v287_v53, %v289_v34 }
 0x11c   :  { %v609_v25 = vrot.slane %v556_v24, 2  ;;  %v365_v24 = vpop.f32.mrf.mxu2  ;;  %v357_v39 = vadd.f32 %v356_v28, %v290_v41  ;;  %v244_v28 = vadd.f32 %v3604_v49, %v184_v8 }
 0x11d   :  { %2744 = vmatmul.msk.f32.vlgmr.msrb.gmra.mxu0 %vm749_vm14, %v679_v35 }
 0x11e   :  { %v610_v16 = vsel %vm5377_vm1, %v607_v21, %v609_v25  ;;  %v187_v21 = vpop.f32.mrf.mxu0  ;;  %v416_v53 = vadd.f32 %v3576_v38, %v357_v39  ;;  %v293_v41 = vrot.slane %v244_v28, 1 }
 0x11f   :  { %v651_v26 = vadd.f32 %v610_v16, %v410_v13  ;;  %v241_v13 = vadd.f32 %v3594_v44, %v181_v33 }
 0x121   :  { %v558_v2 = vpop.f32.mrf.mxu3  ;;  %v3783_v9 = vadd.f32 %v3766_v23, %v651_v26  ;;  %v291_v36 = vrot.slane %v241_v13, 1 }
 0x122   :  { %v559_v12 = vadd.f32 %v558_v2, %v499_v29  ;;  %v508_v16 = vpop.f32.mrf.mxu1 }
 0x123   :  { %v680_v14 = vmax.f32 %v3783_v9, 0.0  ;;  %v292_v44 = vsel %vm281_vm15, %v289_v34, %v291_v36  ;;  %v294_v49 = vsel %vm281_vm15, %v291_v36, %v293_v41 }
 0x124   :  { %v611_v22 = vrot.slane %v559_v12, 2  ;;  %v360_v12 = vadd.f32 %v359_v1, %v292_v44  ;;  %v247_v1 = vadd.f32 %v3612_v52, %v187_v21 }
 0x125   :  { %2745 = vmatmul.msk.f32.gmra.mxu0 %vm749_vm14, %v680_v14 }
 0x126   :  { %v612_v17 = vsel %vm5377_vm1, %v609_v25, %v611_v22  ;;  %v190_v13 = vpop.f32.mrf.mxu0  ;;  %v419_v34 = vadd.f32 %v3582_v40, %v360_v12  ;;  %v295_v44 = vrot.slane %v247_v1, 1 }
 0x127   :  { %v652_v27 = vadd.f32 %v612_v17, %v413_v32  ;;  %v368_v17 = vpop.f32.mrf.mxu2  ;;  %v250_v21 = vadd.f32 %v3638_v60, %v190_v13 }
 0x129   :  { %v561_v29 = vpop.f32.mrf.mxu3  ;;  %v3794_v7 = vadd.f32 %v3766_v23, %v652_v27 }
 0x12a   :  { %v562_v26 = vadd.f32 %v561_v29, %v502_v37  ;;  %v511_v39 = vpop.f32.mrf.mxu1 }
 0x12b   :  { %v681_v3 = vmax.f32 %v3794_v7, 0.0 }
 0x12c   :  { %v613_v2 = vrot.slane %v562_v26, 2  ;;  %v363_v26 = vadd.f32 %v362_v11, %v294_v49  ;;  %v296_v11 = vsel %vm281_vm15, %v293_v41, %v295_v44  ;;  %v297_v49 = vrot.slane %v250_v21, 1 }
 0x12d   :  { %2746 = vmatmul.msk.f32.gmra.mxu0 %vm749_vm14, %v681_v3 }
 0x12e   :  { %v614_v33 = vsel %vm5377_vm1, %v611_v22, %v613_v2  ;;  %v298_v41 = vsel %vm281_vm15, %v295_v44, %v297_v49 }
 0x12f   :  { %v653_v25 = vadd.f32 %v614_v33, %v416_v53  ;;  %v193_v33 = vpop.f32.mrf.mxu0 }
 0x130   :  { %v253_v60 = vadd.f32 %v3590_v43, %v193_v33 }
 0x131   :  { %v564_v32 = vpop.f32.mrf.mxu3  ;;  %v3805_v37 = vadd.f32 %v3766_v23, %v653_v25  ;;  %v371_v25 = vpop.f32.mrf.mxu2 }
 0x132   :  { %v565_v38 = vadd.f32 %v564_v32, %v505_v19  ;;  %v422_v32 = vadd.f32 %v3588_v42, %v363_v26  ;;  %v514_v52 = vpop.f32.mrf.mxu1 }
 0x133   :  { %v682_v27 = vmax.f32 %v3805_v37, 0.0 }
 0x134   :  { %v615_v29 = vrot.slane %v565_v38, 2 }
 0x135   :  { %2747 = vmatmul.msk.f32.gmra.mxu0 %vm749_vm14, %v682_v27 }
 0x136   :  { %v616_v8 = vsel %vm5377_vm1, %v613_v2, %v615_v29 }
 0x137   :  { %v654_v22 = vadd.f32 %v616_v8, %v419_v34 }
 0x139   :  { %v567_v53 = vpop.f32.mrf.mxu3  ;;  %v3816_v19 = vadd.f32 %v3766_v23, %v654_v22  ;;  %v374_v13 = vpop.f32.mrf.mxu2 }
 0x13a   :  { %v568_v28 = vadd.f32 %v567_v53, %v508_v16  ;;  %v366_v16 = vadd.f32 %v365_v24, %v296_v11  ;;  %v196_v24 = vpop.f32.mrf.mxu0  ;;  %v517_v53 = vpop.f32.mrf.mxu1 }
 0x13b   :  { %v683_v40 = vmax.f32 %v3816_v19, 0.0  ;;  %v256_v44 = vadd.f32 %v3598_v47, %v196_v24 }
 0x13c   :  { %v617_v12 = vrot.slane %v568_v28, 2  ;;  %v425_v22 = vadd.f32 %v3596_v46, %v366_v16  ;;  %v299_v46 = vrot.slane %v253_v60, 1 }
 0x13d   :  { %2748 = vmatmul.msk.f32.gmra.mxu0 %vm749_vm14, %v683_v40 }
 0x13e   :  { %v618_v36 = vsel %vm5377_vm1, %v615_v29, %v617_v12  ;;  %v300_v33 = vsel %vm281_vm15, %v297_v49, %v299_v46 }
 0x13f   :  { %v655_v2 = vadd.f32 %v618_v36, %v422_v32 }
 0x141   :  { %v570_v38 = vpop.f32.mrf.mxu3  ;;  %v3827_v34 = vadd.f32 %v3766_v23, %v655_v2  ;;  %v377_v16 = vpop.f32.mrf.mxu2 }
 0x142   :  { %v571_v1 = vadd.f32 %v570_v38, %v511_v39  ;;  %v369_v39 = vadd.f32 %v368_v17, %v298_v41  ;;  %v199_v2 = vpop.f32.mrf.mxu0  ;;  %v372_v38 = vadd.f32 %v371_v25, %v300_v33 }
 0x143   :  { %v684_v42 = vmax.f32 %v3827_v34, 0.0  ;;  %v259_v49 = vadd.f32 %v3608_v50, %v199_v2 }
 0x144   :  { %v619_v8 = vrot.slane %v571_v1, 2  ;;  %v428_v43 = vadd.f32 %v3602_v48, %v369_v39  ;;  %v301_v48 = vrot.slane %v256_v44, 1  ;;  %v431_v47 = vadd.f32 %v3610_v51, %v372_v38 }
 0x145   :  { %2749 = vmatmul.msk.f32.gmra.mxu0 %vm749_vm14, %v684_v42 }
 0x146   :  { %v620_v29 = vsel %vm5377_vm1, %v617_v12, %v619_v8  ;;  %v302_v25 = vsel %vm281_vm15, %v299_v46, %v301_v48 }
 0x147   :  { %v656_v26 = vadd.f32 %v620_v29, %v425_v22  ;;  %v520_v22 = vpop.f32.mrf.mxu1 }
 0x149   :  { %v573_v28 = vpop.f32.mrf.mxu3  ;;  %v3838_v32 = vadd.f32 %v3766_v23, %v656_v26  ;;  %v375_v26 = vadd.f32 %v374_v13, %v302_v25 }
 0x14a   :  { %v574_v11 = vadd.f32 %v573_v28, %v514_v52  ;;  %v303_v28 = vrot.slane %v259_v49, 1  ;;  %v202_v51 = vpop.f32.mrf.mxu0 }
 0x14b   :  { %v685_v21 = vmax.f32 %v3838_v32, 0.0  ;;  %v434_v50 = vadd.f32 %v3618_v55, %v375_v26  ;;  %v3868_v13 = vadd.f32 %v3625_v58, %v202_v51  ;;  %v2769_v26 = vld [vmem:[%s5357_s2 + $0xc0] sm:$0xff] }
 0x14c   :  { %v621_v36 = vrot.slane %v574_v11, 2  ;;  %v380_v11 = vpop.f32.mrf.mxu2  ;;  %v304_v46 = vsel %vm281_vm15, %v301_v48, %v303_v28 }
 0x14d   :  { %2750 = vmatmul.msk.f32.gmra.mxu0 %vm749_vm14, %v685_v21  ;;  %v378_v2 = vadd.f32 %v377_v16, %v304_v46  ;;  %v2770_v16 = vld [vmem:[%s5357_s2 + $0xc8] sm:$0xff] }
 0x14e   :  { %v622_v17 = vsel %vm5377_vm1, %v619_v8, %v621_v36  ;;  %1010 = vmatpush.msra.mxu2 %v2770_v16 }
 0x14f   :  { %v657_v12 = vadd.f32 %v622_v17, %v428_v43  ;;  %v523_v33 = vpop.f32.mrf.mxu1  ;;  %v437_v58 = vadd.f32 %v3658_v63, %v378_v2 }
 0x150   :  { %1011 = vmatpush.msra.mxu2 %v2769_v26 }
 0x151   :  { %v576_v52 = vpop.f32.mrf.mxu3  ;;  %v3849_v1 = vadd.f32 %v3766_v23, %v657_v12 }
 0x152   :  { %v577_v60 = vadd.f32 %v576_v52, %v517_v53  ;;  %v205_v25 = vpop.f32.mrf.mxu0 }
 0x153   :  { %v686_v41 = vmax.f32 %v3849_v1, 0.0 }
 0x154   :  { %v623_v29 = vrot.slane %v577_v60, 2 }
 0x155   :  { %2751 = vmatmul.msk.f32.gmra.mxu0 %vm749_vm14, %v686_v41 }
 0x156   :  { %v624_v8 = vsel %vm5377_vm1, %v621_v36, %v623_v29 }
 0x157   :  { %v658_v24 = vadd.f32 %v624_v8, %v431_v47  ;;  %v383_v47 = vpop.f32.mrf.mxu2  ;;  %v526_v48 = vpop.f32.mrf.mxu1  ;;  %v950_v8 = vld [vmem:[%s5357_s2 + $0x60] sm:$0xff] }
 0x158   :  { %1127 = vmatpush.msra.mxu1 %v950_v8  ;;  %v323_v8 = vrot.slane %v3753_v20, 5 }
 0x159   :  { %v579_v39 = vpop.f32.mrf.mxu3  ;;  %v3860_v53 = vadd.f32 %v3766_v23, %v658_v24 }
 0x15a   :  { %v580_v43 = vadd.f32 %v579_v39, %v520_v22  ;;  %v305_v22 = vrot.slane %v3868_v13, 1  ;;  %v949_v39 = vld [vmem:[%s5357_s2 + $0x58] sm:$0xff] }
 0x15b   :  { %v687_v44 = vmax.f32 %v3860_v53, 0.0  ;;  %1128 = vmatpush.msra.mxu1 %v949_v39 }
 0x15c   :  { %v625_v17 = vrot.slane %v580_v43, 2  ;;  %v306_v63 = vsel %vm281_vm15, %v303_v28, %v305_v22  ;;  %v2810_v43 = vld [vmem:[%s5357_s2 + $0x128] sm:$0xff]  ;;  %v2768_v28 = vld [vmem:[%s5357_s2 + $0xb8] sm:$0xff] }
 0x15d   :  { %2752 = vmatmul.msk.f32.gmra.mxu0 %vm749_vm14, %v687_v44  ;;  %v381_v13 = vadd.f32 %v380_v11, %v306_v63  ;;  %1012 = vmatpush.msra.mxu2 %v2768_v28  ;;  %v947_v11 = vld [vmem:[%s5357_s2 + $0x48] sm:$0xff] }
 0x15e   :  { %v626_v36 = vsel %vm5377_vm1, %v623_v29, %v625_v17  ;;  %v2811_v29 = vld [vmem:[%s5357_s2 + $0x130] sm:$0xff] }
 0x15f   :  { %v659_v12 = vadd.f32 %v626_v36, %v434_v50  ;;  %1200 = vmatpush.msrb.mxu3 %v2811_v29  ;;  %v948_v50 = vld [vmem:[%s5357_s2 + $0x50] sm:$0xff]  ;;  %v440_v29 = vadd.f32 %v3698_v6, %v381_v13  ;;  %v386_v63 = vpop.f32.mrf.mxu2  ;;  %v529_v39 = vpop.f32.mrf.mxu1 }
 0x160   :  { %1129 = vmatpush.msra.mxu1 %v948_v50 }
 0x161   :  { %v582_v38 = vpop.f32.mrf.mxu3  ;;  %v3873_v52 = vadd.f32 %v3766_v23, %v659_v12  ;;  %1201 = vmatpush.msrb.mxu3 %v2810_v43  ;;  %v2767_v12 = vld [vmem:[%s5357_s2 + $0xb0] sm:$0xff] }
 0x162   :  { %v583_v55 = vadd.f32 %v582_v38, %v523_v33  ;;  %v2809_v33 = vld [vmem:[%s5357_s2 + $0x120] sm:$0xff]  ;;  %1013 = vmatpush.msra.mxu2 %v2767_v12  ;;  %1130 = vmatpush.msra.mxu1 %v947_v11 }
 0x163   :  { %v688_v60 = vmax.f32 %v3873_v52, 0.0  ;;  %1202 = vmatpush.msrb.mxu3 %v2809_v33 }
 0x164   :  { %v627_v49 = vrot.slane %v583_v55, 2  ;;  %v2766_v55 = vld [vmem:[%s5357_s2 + $0xa8] sm:$0xff] }
 0x165   :  { %2753 = vmatmul.msk.f32.gmra.mxu0 %vm749_vm14, %v688_v60  ;;  %1014 = vmatpush.msra.mxu2 %v2766_v55 }
 0x166   :  { %v628_v24 = vsel %vm5377_vm1, %v625_v17, %v627_v49  ;;  %v265_v17 = vadd.f32 %v3551_v31, %v205_v25  ;;  %v2808_v31 = vld [vmem:[%s5357_s2 + $0x118] sm:$0xff] }
 0x167   :  { %v660_v51 = vadd.f32 %v628_v24, %v437_v58  ;;  %v2807_v58 = vld [vmem:[%s5357_s2 + $0x110] sm:$0xff]  ;;  %1203 = vmatpush.msrb.mxu3 %v2808_v31 }
 0x168   :  { %v307_v25 = vrot.slane %v265_v17, 1 }
 0x169   :  { %v585_v46 = vpop.f32.mrf.mxu3  ;;  %v3912_v36 = vadd.f32 %v3766_v23, %v660_v51  ;;  %1204 = vmatpush.msrb.mxu3 %v2807_v58  ;;  %v2764_v58 = vld [vmem:[%s5357_s2 + $0x98] sm:$0xff] }
 0x16a   :  { %v586_v2 = vadd.f32 %v585_v46, %v526_v48  ;;  %v946_v48 = vld [vmem:[%s5357_s2 + $0x40] sm:$0xff]  ;;  %v308_v43 = vsel %vm281_vm15, %v305_v22, %v307_v25  ;;  %v326_v6 = vsel %vm325_vm13, %v307_v25, %v323_v8  ;;  %v944_v25 = vld [vmem:[%s5357_s2 + $0x30] sm:$0xff]  ;;  %v2804_v8 = vld [vmem:[%s5357_s2 + $0xf8] sm:$0xff] }
 0x16b   :  { %v689_v38 = vmax.f32 %v3912_v36, 0.0  ;;  %1131 = vmatpush.msra.mxu1 %v946_v48  ;;  %v384_v51 = vadd.f32 %v383_v47, %v308_v43  ;;  %v387_v28 = vadd.f32 %v386_v63, %v326_v6  ;;  %v2763_v48 = vld [vmem:[%s5357_s2 + $0x90] sm:$0xff]  ;;  %v2762_v63 = vld [vmem:[%s5357_s2 + $0x88] sm:$0xff]  ;;  %v2761_v43 = vld [vmem:[%s5357_s2 + $0x80] sm:$0xff]  ;;  %v1354_v36 = vadd.s32 104, %v3616_v54 }
 0x16c   :  { %v629_v16 = vrot.slane %v586_v2, 2  ;;  %v2802_v6 = vld [vmem:[%s5357_s2 + $0xe8] sm:$0xff] }
 0x16d   :  { %2754 = vmatmul.msk.f32.gmra.mxu0 %vm749_vm14, %v689_v38  ;;  %v443_v46 = vadd.f32 %v3736_v15, %v384_v51  ;;  %v446_v12 = vadd.f32 %v3750_v18, %v387_v28  ;;  %v945_v15 = vld [vmem:[%s5357_s2 + $0x38] sm:$0xff]  ;;  %v2806_v18 = vld [vmem:[%s5357_s2 + $0x108] sm:$0xff] }
 0x16e   :  { %v630_v24 = vsel %vm5377_vm1, %v627_v49, %v629_v16  ;;  %v647_v49 = vrot.slane %v3759_v10, 6  ;;  %v2765_v10 = vld [vmem:[%s5357_s2 + $0xa0] sm:$0xff]  ;;  %1132 = vmatpush.msra.mxu1 %v945_v15  ;;  %1205 = vmatpush.msrb.mxu3 %v2806_v18  ;;  %v2760_v28 = vld [vmem:[%s5357_s2 + $0x78] sm:$0xff] }
 0x16f   :  { %v661_v26 = vadd.f32 %v630_v24, %v440_v29  ;;  %1015 = vmatpush.msra.mxu2 %v2765_v10  ;;  %v943_v29 = vld [vmem:[%s5357_s2 + $0x28] sm:$0xff] }
 0x170   :  { %1133 = vmatpush.msra.mxu1 %v944_v25 }
 0x171   :  { %v588_v33 = vpop.f32.mrf.mxu3  ;;  %v3942_v17 = vadd.f32 %v3766_v23, %v661_v26  ;;  %1016 = vmatpush.msra.mxu2 %v2764_v58  ;;  %v942_v26 = vld [vmem:[%s5357_s2 + $0x20] sm:$0xff] }
 0x172   :  { %v589_v50 = vadd.f32 %v588_v33, %v529_v39  ;;  %v2803_v39 = vld [vmem:[%s5357_s2 + $0xf0] sm:$0xff]  ;;  %1134 = vmatpush.msra.mxu1 %v943_v29 }
 0x173   :  { %v690_v20 = vmax.f32 %v3942_v17, 0.0  ;;  %1017 = vmatpush.msra.mxu2 %v2763_v48  ;;  %v940_v33 = vld [vmem:[%s5357_s2 + $0x10] sm:$0xff] }
 0x174   :  { %v631_v13 = vrot.slane %v589_v50, 2  ;;  %1135 = vmatpush.msra.mxu1 %v942_v26  ;;  %v2801_v50 = vld [vmem:[%s5357_s2 + $0xe0] sm:$0xff] }
 0x175   :  { %2755 = vmatmul.msk.f32.gmra.mxu0 %vm749_vm14, %v690_v20  ;;  %1018 = vmatpush.msra.mxu2 %v2762_v63 }
 0x176   :  { %v632_v22 = vsel %vm5377_vm1, %v629_v16, %v631_v13  ;;  %v649_v47 = vsel %vm5376_vm0, %v631_v13, %v647_v49  ;;  %v2805_v16 = vld [vmem:[%s5357_s2 + $0x100] sm:$0xff]  ;;  %v2759_v49 = vld [vmem:[%s5357_s2 + $0x70] sm:$0xff]  ;;  %v939_v13 = vld [vmem:[%s5357_s2 + $0x8] sm:$0xff]  ;;  %vm1356_vm1 = vcmp.eq.s32.totalorder %v1354_v36, %v3623_v57 }
 0x177   :  { %v662_v31 = vadd.f32 %v632_v22, %v443_v46  ;;  %v663_v2 = vadd.f32 %v649_v47, %v446_v12  ;;  %1206 = vmatpush.msrb.mxu3 %v2805_v16  ;;  %1019 = vmatpush.msra.mxu2 %v2761_v43  ;;  %v2800_v46 = vld [vmem:[%s5357_s2 + $0xd8] sm:$0xff]  ;;  %v2758_v12 = vld [vmem:[%s5357_s2 + $0x68] sm:$0xff]  ;;  %v938_v22 = vld [vmem:[%s5357_s2] sm:$0xff] }
 0x178   :  { %v2799_v47 = vld [vmem:[%s5357_s2 + $0xd0] sm:$0xff] }
 0x179   :  { %v3954_v11 = vadd.f32 %v3766_v23, %v662_v31  ;;  %v3991_v24 = vadd.f32 %v3766_v23, %v663_v2  ;;  %1207 = vmatpush.msrb.mxu3 %v2804_v8  ;;  %v941_v23 = vld [vmem:[%s5357_s2 + $0x18] sm:$0xff]  ;;  %1020 = vmatpush.msra.mxu2 %v2760_v28 }
 0x17a   :  { %1136 = vmatpush.msra.mxu1 %v941_v23 }
 0x17b   :  { %v691_v55 = vmax.f32 %v3954_v11, 0.0  ;;  %1208 = vmatpush.msrb.mxu3 %v2803_v39  ;;  %v692_v51 = vmax.f32 %v3991_v24, 0.0  ;;  %1021 = vmatpush.msra.mxu2 %v2759_v49 }
 0x17c   :  { %1137 = vmatpush.msra.mxu1 %v940_v33 }
 0x17d   :  { %2756 = vmatmul.msk.f32.gmra.mxu0 %vm749_vm14, %v691_v55  ;;  %1209 = vmatpush.msrb.mxu3 %v2802_v6 }
 0x17e   :  { %1138 = vmatpush.msra.mxu1 %v939_v13  ;;  %1022 = vmatpush.msra.mxu2 %v2758_v12 }
 0x17f   :  { %1210 = vmatpush.msrb.mxu3 %v2801_v50 }
 0x180   :  { %1139 = vmatpush.msra.mxu1 %v938_v22 }
 0x181   :  { %1211 = vmatpush.msrb.mxu3 %v2800_v46 }
 0x183   :  { %1212 = vmatpush.msrb.mxu3 %v2799_v47 }
 0x185   :  { %2757 = vmatmul.msk.f32.gmra.mxu0 %vm749_vm14, %v692_v51 }
 0x19a   :  { %v809_v31 = vpop.f32.mrf.mxu0 }
 0x19b   :  { %v4041_v2 = vmax.f32 %v679_v35, %v809_v31 }
 0x19d   :  { %v879_v18 = vrot.slane %v4041_v2, 1 }
 0x1a2   :  { %v812_v10 = vpop.f32.mrf.mxu0 }
 0x1a3   :  { %v852_v15 = vmax.f32 %v680_v14, %v812_v10 }
 0x1a5   :  { %v880_v58 = vrot.slane %v852_v15, 1 }
 0x1a7   :  { %v881_v25 = vsel %vm281_vm15, %v879_v18, %v880_v58 }
 0x1a8   :  { %v923_v16 = vmax.f32 %v4041_v2, %v881_v25 }
 0x1aa   :  { %v815_v48 = vpop.f32.mrf.mxu0  ;;  %2771 = vmatmul.msk.f32.vlgmr.msra.gmra.mxu2 %vm749_vm14, %v923_v16  ;;  %2785 = vmatmul.msk.f32.vlgmr.msra.gmra.mxu1 %vm749_vm14, %v923_v16 }
 0x1ab   :  { %v853_v30 = vmax.f32 %v681_v3, %v815_v48  ;;  %2812 = vmatmul.msk.f32.vlgmr.msrb.gmra.mxu3 %vm749_vm14, %v923_v16 }
 0x1ad   :  { %v882_v35 = vrot.slane %v853_v30, 1 }
 0x1af   :  { %v883_v9 = vsel %vm281_vm15, %v880_v58, %v882_v35 }
 0x1b0   :  { %v924_v14 = vmax.f32 %v852_v15, %v883_v9  ;;  %v5382_v9 = vmov 1.0  }
 0x1b2   :  { %v818_v29 = vpop.f32.mrf.mxu0  ;;  %2772 = vmatmul.msk.f32.gmra.mxu2 %vm749_vm14, %v924_v14  ;;  %2786 = vmatmul.msk.f32.gmra.mxu1 %vm749_vm14, %v924_v14 }
 0x1b3   :  { %v854_v8 = vmax.f32 %v682_v27, %v818_v29  ;;  %2813 = vmatmul.msk.f32.gmra.mxu3 %vm749_vm14, %v924_v14 }
 0x1b5   :  { %v884_v63 = vrot.slane %v854_v8, 1 }
 0x1b7   :  { %v885_v7 = vsel %vm281_vm15, %v882_v35, %v884_v63  ;;  %v1355_v35 = vadd.s32 112, %v3616_v54 }
 0x1b8   :  { %v925_v3 = vmax.f32 %v853_v30, %v885_v7 }
 0x1b9   :  { %vm1357_vm0 = vcmp.eq.s32.totalorder %v1355_v35, %v3623_v57 }
 0x1ba   :  { %v821_v26 = vpop.f32.mrf.mxu0  ;;  %2773 = vmatmul.msk.f32.gmra.mxu2 %vm749_vm14, %v925_v3  ;;  %2787 = vmatmul.msk.f32.gmra.mxu1 %vm749_vm14, %v925_v3 }
 0x1bb   :  { %v855_v39 = vmax.f32 %v683_v40, %v821_v26  ;;  %2814 = vmatmul.msk.f32.gmra.mxu3 %vm749_vm14, %v925_v3  ;;  %2828 = vmatpush.msk.msra.mxu0 %vm1357_vm0, %v5382_v9 }
 0x1bd   :  { %v886_v43 = vrot.slane %v855_v39, 1  ;;  %2829 = vmatpush.msk.msra.mxu0 %vm1356_vm1, %v5382_v9 }
 0x1bf   :  { %v887_v37 = vsel %vm281_vm15, %v884_v63, %v886_v43  ;;  %2830 = vmatpush.msk.msra.mxu0 %vm722_vm2, %v5382_v9  ;;  %vm5388_vm2 = vcmp.eq.s32.totalorder %v3616_v54, %v3623_v57 }
 0x1c0   :  { %v926_v27 = vmax.f32 %v854_v8, %v887_v37 }
 0x1c1   :  { %2831 = vmatpush.msk.msra.mxu0 %vm721_vm3, %v5382_v9  ;;  %vm1270_vm3 = vcmask 1043456  }
 0x1c2   :  { %v824_v23 = vpop.f32.mrf.mxu0  ;;  %2774 = vmatmul.msk.f32.gmra.mxu2 %vm749_vm14, %v926_v27  ;;  %2788 = vmatmul.msk.f32.gmra.mxu1 %vm749_vm14, %v926_v27 }
 0x1c3   :  { %v856_v6 = vmax.f32 %v684_v42, %v824_v23  ;;  %2815 = vmatmul.msk.f32.gmra.mxu3 %vm749_vm14, %v926_v27  ;;  %2832 = vmatpush.msk.msra.mxu0 %vm720_vm4, %v5382_v9  ;;  %vm5389_vm4 = vcmask 1045504  }
 0x1c4   :  { %vm5391_vm1 = vmmov %vm5389_vm4 }
 0x1c5   :  { %v888_v28 = vrot.slane %v856_v6, 1  ;;  %2833 = vmatpush.msk.msra.mxu0 %vm719_vm5, %v5382_v9 }
 0x1c7   :  { %v889_v19 = vsel %vm281_vm15, %v886_v43, %v888_v28  ;;  %2834 = vmatpush.msk.msra.mxu0 %vm718_vm6, %v5382_v9  ;;  %v5386_v43 = vld [vmem:[#allocation8_spill] sm:$0xff] }
 0x1c8   :  { %v927_v40 = vmax.f32 %v855_v39, %v889_v19  ;;  %vm5387_vm0 = vcmp.eq.s32.totalorder %v5386_v43, %v3623_v57 }
 0x1c9   :  { %2835 = vmatpush.msk.msra.mxu0 %vm717_vm7, %v5382_v9 }
 0x1ca   :  { %v827_v33 = vpop.f32.mrf.mxu0  ;;  %2775 = vmatmul.msk.f32.gmra.mxu2 %vm749_vm14, %v927_v40  ;;  %2789 = vmatmul.msk.f32.gmra.mxu1 %vm749_vm14, %v927_v40 }
 0x1cb   :  { %v857_v50 = vmax.f32 %v685_v21, %v827_v33  ;;  %2816 = vmatmul.msk.f32.gmra.mxu3 %vm749_vm14, %v927_v40  ;;  %2836 = vmatpush.msk.msra.mxu0 %vm716_vm8, %v5382_v9 }
 0x1cd   :  { %v890_v49 = vrot.slane %v857_v50, 1  ;;  %2837 = vmatpush.msk.msra.mxu0 %vm715_vm9, %v5382_v9 }
 0x1cf   :  { %v891_v34 = vsel %vm281_vm15, %v888_v28, %v890_v49  ;;  %2838 = vmatpush.msk.msra.mxu0 %vm714_vm10, %v5382_v9 }
 0x1d0   :  { %v928_v42 = vmax.f32 %v856_v6, %v891_v34 }
 0x1d1   :  { %2839 = vmatpush.msk.msra.mxu0 %vm713_vm11, %v5382_v9 }
 0x1d2   :  { %v830_v13 = vpop.f32.mrf.mxu0  ;;  %2776 = vmatmul.msk.f32.gmra.mxu2 %vm749_vm14, %v928_v42  ;;  %2790 = vmatmul.msk.f32.gmra.mxu1 %vm749_vm14, %v928_v42 }
 0x1d3   :  { %v858_v46 = vmax.f32 %v686_v41, %v830_v13  ;;  %2817 = vmatmul.msk.f32.gmra.mxu3 %vm749_vm14, %v928_v42  ;;  %2840 = vmatpush.msk.msra.mxu0 %vm712_vm12, %v5382_v9 }
 0x1d5   :  { %v892_v12 = vrot.slane %v858_v46, 1  ;;  %2841 = vmatpush.msk.msra.mxu0 %vm5387_vm0, %v5382_v9  ;;  %vm5392_vm0 = vmmov %vm5391_vm1 }
 0x1d7   :  { %v893_v32 = vsel %vm281_vm15, %v890_v49, %v892_v12  ;;  %2842 = vmatpush.msk.msra.mxu0 %vm5388_vm2, %v5382_v9  ;;  %vm5393_vm2 = vmmov %vm5392_vm0 }
 0x1d8   :  { %v929_v21 = vmax.f32 %v857_v50, %v893_v32 }
 0x1da   :  { %v833_v22 = vpop.f32.mrf.mxu0  ;;  %2777 = vmatmul.msk.f32.gmra.mxu2 %vm749_vm14, %v929_v21  ;;  %2791 = vmatmul.msk.f32.gmra.mxu1 %vm749_vm14, %v929_v21 }
 0x1db   :  { %v859_v47 = vmax.f32 %v687_v44, %v833_v22  ;;  %2818 = vmatmul.msk.f32.gmra.mxu3 %vm749_vm14, %v929_v21 }
 0x1dd   :  { %v894_v31 = vrot.slane %v859_v47, 1 }
 0x1df   :  { %v895_v1 = vsel %vm281_vm15, %v892_v12, %v894_v31 }
 0x1e0   :  { %v930_v41 = vmax.f32 %v858_v46, %v895_v1  ;;  %v4196_v46 = vld [vmem:[%s5359_s4 + $0x1] ss:$0 sm:$0xff] }
 0x1e2   :  { %v836_v10 = vpop.f32.mrf.mxu0  ;;  %2778 = vmatmul.msk.f32.gmra.mxu2 %vm749_vm14, %v930_v41  ;;  %2792 = vmatmul.msk.f32.gmra.mxu1 %vm749_vm14, %v930_v41 }
 0x1e3   :  { %v860_v15 = vmax.f32 %v688_v60, %v836_v10  ;;  %2819 = vmatmul.msk.f32.gmra.mxu3 %vm749_vm14, %v930_v41 }
 0x1e5   :  { %v896_v18 = vrot.slane %v860_v15, 1 }
 0x1e7   :  { %v897_v53 = vsel %vm281_vm15, %v894_v31, %v896_v18 }
 0x1e8   :  { %v931_v44 = vmax.f32 %v859_v47, %v897_v53 }
 0x1ea   :  { %v839_v58 = vpop.f32.mrf.mxu0  ;;  %2779 = vmatmul.msk.f32.gmra.mxu2 %vm749_vm14, %v931_v44  ;;  %2793 = vmatmul.msk.f32.gmra.mxu1 %vm749_vm14, %v931_v44 }
 0x1eb   :  { %v861_v25 = vmax.f32 %v689_v38, %v839_v58  ;;  %2820 = vmatmul.msk.f32.gmra.mxu3 %vm749_vm14, %v931_v44 }
 0x1ed   :  { %v898_v16 = vrot.slane %v861_v25, 1 }
 0x1ef   :  { %v899_v52 = vsel %vm281_vm15, %v896_v18, %v898_v16 }
 0x1f0   :  { %v932_v60 = vmax.f32 %v860_v15, %v899_v52 }
 0x1f2   :  { %v842_v48 = vpop.f32.mrf.mxu0  ;;  %2780 = vmatmul.msk.f32.gmra.mxu2 %vm749_vm14, %v932_v60  ;;  %2794 = vmatmul.msk.f32.gmra.mxu1 %vm749_vm14, %v932_v60 }
 0x1f3   :  { %v862_v30 = vmax.f32 %v690_v20, %v842_v48  ;;  %2821 = vmatmul.msk.f32.gmra.mxu3 %vm749_vm14, %v932_v60 }
 0x1f5   :  { %v900_v38 = vrot.slane %v862_v30, 1 }
 0x1f7   :  { %v901_v14 = vsel %vm281_vm15, %v898_v16, %v900_v38 }
 0x1f8   :  { %v933_v29 = vmax.f32 %v861_v25, %v901_v14 }
 0x1fa   :  { %v845_v17 = vpop.f32.mrf.mxu0  ;;  %2781 = vmatmul.msk.f32.gmra.mxu2 %vm749_vm14, %v933_v29  ;;  %2795 = vmatmul.msk.f32.gmra.mxu1 %vm749_vm14, %v933_v29 }
 0x1fb   :  { %v863_v20 = vmax.f32 %v691_v55, %v845_v17  ;;  %2822 = vmatmul.msk.f32.gmra.mxu3 %vm749_vm14, %v933_v29 }
 0x1fd   :  { %v902_v8 = vrot.slane %v863_v20, 1 }
 0x1ff   :  { %v903_v63 = vsel %vm281_vm15, %v900_v38, %v902_v8 }
 0x200   :  { %v934_v11 = vmax.f32 %v862_v30, %v903_v63 }
 0x202   :  { %v848_v56 = vpop.f32.mrf.mxu0  ;;  %2782 = vmatmul.msk.f32.gmra.mxu2 %vm749_vm14, %v934_v11  ;;  %2796 = vmatmul.msk.f32.gmra.mxu1 %vm749_vm14, %v934_v11 }
 0x203   :  { %v864_v59 = vmax.f32 %v692_v51, %v848_v56  ;;  %2823 = vmatmul.msk.f32.gmra.mxu3 %vm749_vm14, %v934_v11  ;;  %v920_v51 = vrot.slane %v4041_v2, 5 }
 0x205   :  { %v904_v61 = vrot.slane %v864_v59, 1 }
 0x207   :  { %v905_v55 = vsel %vm281_vm15, %v902_v8, %v904_v61  ;;  %v922_v3 = vsel %vm325_vm13, %v904_v61, %v920_v51  ;;  %vm5390_vm15 = vmmov %vm5389_vm4 }
 0x208   :  { %v935_v24 = vmax.f32 %v863_v20, %v905_v55  ;;  %v936_v2 = vmax.f32 %v864_v59, %v922_v3 }
 0x20a   :  { %2783 = vmatmul.msk.f32.gmra.mxu2 %vm749_vm14, %v935_v24  ;;  %2797 = vmatmul.msk.f32.gmra.mxu1 %vm749_vm14, %v935_v24 }
 0x20b   :  { %2824 = vmatmul.msk.f32.gmra.mxu3 %vm749_vm14, %v935_v24 }
 0x212   :  { %2784 = vmatmul.msk.f32.gmra.mxu2 %vm749_vm14, %v936_v2  ;;  %2798 = vmatmul.msk.f32.gmra.mxu1 %vm749_vm14, %v936_v2 }
 0x213   :  { %2825 = vmatmul.msk.f32.gmra.mxu3 %vm749_vm14, %v936_v2  ;;  %vm1362_vm14 = vcmask 982016  }
 0x227   :  { %v1141_v37 = vpop.f32.mrf.mxu1 }
 0x22d   :  { %v4186_v27 = vpop.f32.mrf.mxu2 }
 0x22e   :  { %v4188_v23 = vpop.f32.mrf.mxu3  ;;  %v1080_v19 = vrot.slane %v4186_v27, 2 }
 0x22f   :  { %v1144_v6 = vpop.f32.mrf.mxu1  ;;  %v1271_v34 = vrot.slane %v4188_v23, 4 }
 0x235   :  { %v1027_v28 = vpop.f32.mrf.mxu2 }
 0x236   :  { %v1081_v40 = vrot.slane %v1027_v28, 2  ;;  %v1217_v33 = vpop.f32.mrf.mxu3 }
 0x237   :  { %v1272_v50 = vrot.slane %v1217_v33, 4  ;;  %v1147_v49 = vpop.f32.mrf.mxu1 }
 0x238   :  { %v1082_v42 = vsel %vm5389_vm4, %v1080_v19, %v1081_v40  ;;  %vm5394_vm4 = vmmov %vm5392_vm0 }
 0x239   :  { %v1142_v13 = vadd.f32 %v1141_v37, %v1082_v42  ;;  %v1273_v12 = vsel %vm1270_vm3, %v1271_v34, %v1272_v50 }
 0x23b   :  { %v1311_v32 = vadd.f32 %v1273_v12, %v1142_v13 }
 0x23d   :  { %v4200_v21 = vadd.f32 %v4196_v46, %v1311_v32  ;;  %v1030_v22 = vpop.f32.mrf.mxu2 }
 0x23e   :  { %v1083_v47 = vrot.slane %v1030_v22, 2  ;;  %v1220_v31 = vpop.f32.mrf.mxu3 }
 0x23f   :  { %v1340_v1 = vmax.f32 %v4200_v21, 0.0  ;;  %v1274_v41 = vrot.slane %v1220_v31, 4  ;;  %v1150_v10 = vpop.f32.mrf.mxu1 }
 0x240   :  { %v1084_v15 = vsel %vm5390_vm15, %v1081_v40, %v1083_v47  ;;  %vm5395_vm15 = vmmov %vm5392_vm0 }
 0x241   :  { %v1145_v18 = vadd.f32 %v1144_v6, %v1084_v15  ;;  %2843 = vmatmul.msk.f32.vlgmr.msra.gmra.mxu0 %vm1362_vm14, %v1340_v1  ;;  %v1275_v53 = vsel %vm1270_vm3, %v1272_v50, %v1274_v41 }
 0x243   :  { %v1312_v44 = vadd.f32 %v1275_v53, %v1145_v18 }
 0x245   :  { %v1033_v58 = vpop.f32.mrf.mxu2  ;;  %v4209_v25 = vadd.f32 %v4196_v46, %v1312_v44 }
 0x246   :  { %v1085_v16 = vrot.slane %v1033_v58, 2  ;;  %v1223_v52 = vpop.f32.mrf.mxu3 }
 0x247   :  { %v1276_v60 = vrot.slane %v1223_v52, 4  ;;  %v1153_v48 = vpop.f32.mrf.mxu1  ;;  %v1341_v30 = vmax.f32 %v4209_v25, 0.0 }
 0x248   :  { %v1086_v35 = vsel %vm5391_vm1, %v1083_v47, %v1085_v16  ;;  %vm5396_vm1 = vmmov %vm5392_vm0 }
 0x249   :  { %v1148_v36 = vadd.f32 %v1147_v49, %v1086_v35  ;;  %2844 = vmatmul.msk.f32.gmra.mxu0 %vm1362_vm14, %v1341_v30  ;;  %v1277_v38 = vsel %vm1270_vm3, %v1274_v41, %v1276_v60 }
 0x24b   :  { %v1313_v14 = vadd.f32 %v1277_v38, %v1148_v36 }
 0x24d   :  { %v1036_v29 = vpop.f32.mrf.mxu2  ;;  %v4218_v17 = vadd.f32 %v4196_v46, %v1313_v14 }
 0x24e   :  { %v1087_v20 = vrot.slane %v1036_v29, 2  ;;  %v1226_v8 = vpop.f32.mrf.mxu3 }
 0x24f   :  { %v1278_v63 = vrot.slane %v1226_v8, 4  ;;  %v1156_v11 = vpop.f32.mrf.mxu1  ;;  %v1342_v56 = vmax.f32 %v4218_v17, 0.0 }
 0x250   :  { %v1088_v59 = vsel %vm5392_vm0, %v1085_v16, %v1087_v20 }
 0x251   :  { %v1151_v61 = vadd.f32 %v1150_v10, %v1088_v59  ;;  %2845 = vmatmul.msk.f32.gmra.mxu0 %vm1362_vm14, %v1342_v56  ;;  %v1279_v55 = vsel %vm1270_vm3, %v1276_v60, %v1278_v63 }
 0x253   :  { %v1314_v24 = vadd.f32 %v1279_v55, %v1151_v61 }
 0x255   :  { %v1039_v51 = vpop.f32.mrf.mxu2  ;;  %v4227_v3 = vadd.f32 %v4196_v46, %v1314_v24 }
 0x256   :  { %v1089_v2 = vrot.slane %v1039_v51, 2  ;;  %v1229_v37 = vpop.f32.mrf.mxu3 }
 0x257   :  { %v1280_v6 = vrot.slane %v1229_v37, 4  ;;  %v1159_v28 = vpop.f32.mrf.mxu1  ;;  %v1343_v19 = vmax.f32 %v4227_v3, 0.0 }
 0x258   :  { %v1090_v40 = vsel %vm5393_vm2, %v1087_v20, %v1089_v2  ;;  %vm5397_vm2 = vmmov %vm5392_vm0 }
 0x259   :  { %v1154_v33 = vadd.f32 %v1153_v48, %v1090_v40  ;;  %2846 = vmatmul.msk.f32.gmra.mxu0 %vm1362_vm14, %v1343_v19  ;;  %v1281_v50 = vsel %vm1270_vm3, %v1278_v63, %v1280_v6 }
 0x25b   :  { %v1315_v49 = vadd.f32 %v1281_v50, %v1154_v33 }
 0x25d   :  { %v1042_v34 = vpop.f32.mrf.mxu2  ;;  %v4236_v42 = vadd.f32 %v4196_v46, %v1315_v49 }
 0x25e   :  { %v1091_v13 = vrot.slane %v1042_v34, 2  ;;  %v1232_v12 = vpop.f32.mrf.mxu3 }
 0x25f   :  { %v1282_v32 = vrot.slane %v1232_v12, 4  ;;  %v1162_v22 = vpop.f32.mrf.mxu1  ;;  %v1344_v47 = vmax.f32 %v4236_v42, 0.0 }
 0x260   :  { %v1092_v31 = vsel %vm5394_vm4, %v1089_v2, %v1091_v13  ;;  %vm5398_vm4 = vmmov %vm5392_vm0 }
 0x261   :  { %v1157_v41 = vadd.f32 %v1156_v11, %v1092_v31  ;;  %2847 = vmatmul.msk.f32.gmra.mxu0 %vm1362_vm14, %v1344_v47  ;;  %v1283_v10 = vsel %vm1270_vm3, %v1280_v6, %v1282_v32 }
 0x263   :  { %v1316_v15 = vadd.f32 %v1283_v10, %v1157_v41 }
 0x265   :  { %v1045_v18 = vpop.f32.mrf.mxu2  ;;  %v4245_v53 = vadd.f32 %v4196_v46, %v1316_v15 }
 0x266   :  { %v1093_v44 = vrot.slane %v1045_v18, 2  ;;  %v1235_v58 = vpop.f32.mrf.mxu3 }
 0x267   :  { %v1284_v16 = vrot.slane %v1235_v58, 4  ;;  %v1345_v52 = vmax.f32 %v4245_v53, 0.0  ;;  %v1165_v48 = vpop.f32.mrf.mxu1 }
 0x268   :  { %v1094_v60 = vsel %vm5395_vm15, %v1091_v13, %v1093_v44  ;;  %vm5399_vm15 = vmmov %vm5392_vm0 }
 0x269   :  { %v1160_v35 = vadd.f32 %v1159_v28, %v1094_v60  ;;  %2848 = vmatmul.msk.f32.gmra.mxu0 %vm1362_vm14, %v1345_v52  ;;  %v1285_v36 = vsel %vm1270_vm3, %v1282_v32, %v1284_v16 }
 0x26b   :  { %v1317_v38 = vadd.f32 %v1285_v36, %v1160_v35 }
 0x26d   :  { %v1048_v14 = vpop.f32.mrf.mxu2  ;;  %v4254_v29 = vadd.f32 %v4196_v46, %v1317_v38 }
 0x26e   :  { %v1095_v20 = vrot.slane %v1048_v14, 2  ;;  %v1238_v8 = vpop.f32.mrf.mxu3 }
 0x26f   :  { %v1286_v63 = vrot.slane %v1238_v8, 4  ;;  %v1346_v11 = vmax.f32 %v4254_v29, 0.0  ;;  %v1168_v24 = vpop.f32.mrf.mxu1 }
 0x270   :  { %v1096_v59 = vsel %vm5396_vm1, %v1093_v44, %v1095_v20  ;;  %vm5400_vm1 = vmmov %vm5392_vm0 }
 0x271   :  { %v1163_v61 = vadd.f32 %v1162_v22, %v1096_v59  ;;  %2849 = vmatmul.msk.f32.gmra.mxu0 %vm1362_vm14, %v1346_v11  ;;  %v1287_v55 = vsel %vm1270_vm3, %v1284_v16, %v1286_v63  ;;  %v2871_v59 = vld [vmem:[%s5358_s3 + $0xe8] sm:$0xff] }
 0x272   :  { %1625 = vmatpush.msrb.mxu2 %v2871_v59 }
 0x273   :  { %v1318_v51 = vadd.f32 %v1287_v55, %v1163_v61  ;;  %v1565_v61 = vld [vmem:[%s5358_s3 + $0x70] sm:$0xff]  ;;  %v2914_v55 = vld [vmem:[%s5358_s3 + $0x160] sm:$0xff] }
 0x274   :  { %1738 = vmatpush.msrb.mxu1 %v1565_v61  ;;  %1813 = vmatpush.msra.mxu3 %v2914_v55  ;;  %v1561_v61 = vld [vmem:[%s5358_s3 + $0x50] sm:$0xff]  ;;  %v2910_v55 = vld [vmem:[%s5358_s3 + $0x140] sm:$0xff] }
 0x275   :  { %v1051_v2 = vpop.f32.mrf.mxu2  ;;  %v4263_v37 = vadd.f32 %v4196_v46, %v1318_v51  ;;  %v2943_v51 = vld [vmem:[%s5358_s3 + $0x1d8] sm:$0xff] }
 0x276   :  { %v1097_v6 = vrot.slane %v1051_v2, 2  ;;  %v1241_v28 = vpop.f32.mrf.mxu3  ;;  %v2870_v2 = vld [vmem:[%s5358_s3 + $0xe0] sm:$0xff]  ;;  %1906 = vmatpush.msrb.mxu0 %v2943_v51 }
 0x277   :  { %v1288_v40 = vrot.slane %v1241_v28, 4  ;;  %v1347_v33 = vmax.f32 %v4263_v37, 0.0  ;;  %v1171_v12 = vpop.f32.mrf.mxu1  ;;  %1626 = vmatpush.msrb.mxu2 %v2870_v2  ;;  %v2866_v51 = vld [vmem:[%s5358_s3 + $0xc0] sm:$0xff] }
 0x278   :  { %v1098_v50 = vsel %vm5392_vm0, %v1095_v20, %v1097_v6  ;;  %vm5401_vm0 = vcmask 1041408  }
 0x279   :  { %v1166_v49 = vadd.f32 %v1165_v48, %v1098_v50  ;;  %2850 = vmatmul.msk.f32.gmra.mxu0 %vm1362_vm14, %v1347_v33  ;;  %v1289_v34 = vsel %vm1270_vm3, %v1286_v63, %v1288_v40  ;;  %v2942_v50 = vld [vmem:[%s5358_s3 + $0x1d0] sm:$0xff] }
 0x27a   :  { %1907 = vmatpush.msrb.mxu0 %v2942_v50  ;;  %v1559_v50 = vld [vmem:[%s5358_s3 + $0x40] sm:$0xff] }
 0x27b   :  { %v1319_v13 = vadd.f32 %v1289_v34, %v1166_v49  ;;  %v2869_v49 = vld [vmem:[%s5358_s3 + $0xd8] sm:$0xff]  ;;  %v1563_v34 = vld [vmem:[%s5358_s3 + $0x60] sm:$0xff] }
 0x27c   :  { %1627 = vmatpush.msrb.mxu2 %v2869_v49  ;;  %v2908_v49 = vld [vmem:[%s5358_s3 + $0x130] sm:$0xff] }
 0x27d   :  { %v1054_v32 = vpop.f32.mrf.mxu2  ;;  %v4272_v22 = vadd.f32 %v4196_v46, %v1319_v13  ;;  %v2912_v13 = vld [vmem:[%s5358_s3 + $0x150] sm:$0xff] }
 0x27e   :  { %v1099_v31 = vrot.slane %v1054_v32, 2  ;;  %v1244_v41 = vpop.f32.mrf.mxu3 }
 0x27f   :  { %v1290_v10 = vrot.slane %v1244_v41, 4  ;;  %v1348_v15 = vmax.f32 %v4272_v22, 0.0  ;;  %v1174_v35 = vpop.f32.mrf.mxu1  ;;  %v2868_v41 = vld [vmem:[%s5358_s3 + $0xd0] sm:$0xff] }
 0x280   :  { %v1100_v18 = vsel %vm5397_vm2, %v1097_v6, %v1099_v31  ;;  %v1564_v6 = vld [vmem:[%s5358_s3 + $0x68] sm:$0xff]  ;;  %1628 = vmatpush.msrb.mxu2 %v2868_v41  ;;  %vm5410_vm2 = vmmov %vm5400_vm1 }
 0x281   :  { %v1169_v44 = vadd.f32 %v1168_v24, %v1100_v18  ;;  %2851 = vmatmul.msk.f32.gmra.mxu0 %vm1362_vm14, %v1348_v15  ;;  %v1291_v58 = vsel %vm1270_vm3, %v1288_v40, %v1290_v10  ;;  %v2913_v40 = vld [vmem:[%s5358_s3 + $0x158] sm:$0xff]  ;;  %1739 = vmatpush.msrb.mxu1 %v1564_v6 }
 0x282   :  { %1814 = vmatpush.msra.mxu3 %v2913_v40  ;;  %v2909_v6 = vld [vmem:[%s5358_s3 + $0x138] sm:$0xff]  ;;  %v2938_v40 = vld [vmem:[%s5358_s3 + $0x1b0] sm:$0xff] }
 0x283   :  { %v1320_v16 = vadd.f32 %v1291_v58, %v1169_v44  ;;  %1740 = vmatpush.msrb.mxu1 %v1563_v34  ;;  %v2911_v58 = vld [vmem:[%s5358_s3 + $0x148] sm:$0xff] }
 0x284   :  { %1815 = vmatpush.msra.mxu3 %v2912_v13 }
 0x285   :  { %v1057_v60 = vpop.f32.mrf.mxu2  ;;  %v4281_v48 = vadd.f32 %v4196_v46, %v1320_v16 }
 0x286   :  { %v1101_v36 = vrot.slane %v1057_v60, 2  ;;  %v1247_v38 = vpop.f32.mrf.mxu3  ;;  %1816 = vmatpush.msra.mxu3 %v2911_v58 }
 0x287   :  { %v1292_v14 = vrot.slane %v1247_v38, 4  ;;  %v1349_v20 = vmax.f32 %v4281_v48, 0.0  ;;  %v2940_v38 = vld [vmem:[%s5358_s3 + $0x1c0] sm:$0xff] }
 0x288   :  { %v1102_v8 = vsel %vm5398_vm4, %v1099_v31, %v1101_v36  ;;  %1817 = vmatpush.msra.mxu3 %v2910_v55  ;;  %vm5411_vm4 = vmmov %vm5400_vm1 }
 0x289   :  { %v1172_v63 = vadd.f32 %v1171_v12, %v1102_v8  ;;  %2852 = vmatmul.msk.f32.gmra.mxu0 %vm1362_vm14, %v1349_v20  ;;  %v1293_v24 = vsel %vm1270_vm3, %v1290_v10, %v1292_v14  ;;  %v2941_v12 = vld [vmem:[%s5358_s3 + $0x1c8] sm:$0xff]  ;;  %v1562_v10 = vld [vmem:[%s5358_s3 + $0x58] sm:$0xff] }
 0x28a   :  { %1908 = vmatpush.msrb.mxu0 %v2941_v12  ;;  %v2867_v8 = vld [vmem:[%s5358_s3 + $0xc8] sm:$0xff]  ;;  %1741 = vmatpush.msrb.mxu1 %v1562_v10 }
 0x28b   :  { %v1321_v28 = vadd.f32 %v1293_v24, %v1172_v63  ;;  %v1177_v63 = vpop.f32.mrf.mxu1  ;;  %1629 = vmatpush.msrb.mxu2 %v2867_v8  ;;  %1818 = vmatpush.msra.mxu3 %v2909_v6  ;;  %v2937_v12 = vld [vmem:[%s5358_s3 + $0x1a8] sm:$0xff]  ;;  %v1557_v6 = vld [vmem:[%s5358_s3 + $0x30] sm:$0xff] }
 0x28c   :  { %1909 = vmatpush.msrb.mxu0 %v2940_v38  ;;  %1742 = vmatpush.msrb.mxu1 %v1561_v61 }
 0x28d   :  { %v1060_v32 = vpop.f32.mrf.mxu2  ;;  %v4326_v31 = vadd.f32 %v4196_v46, %v1321_v28  ;;  %1630 = vmatpush.msrb.mxu2 %v2866_v51  ;;  %1819 = vmatpush.msra.mxu3 %v2908_v49 }
 0x28e   :  { %v1103_v18 = vrot.slane %v1060_v32, 2  ;;  %v1250_v44 = vpop.f32.mrf.mxu3  ;;  %v1121_v32 = vrot.slane %v4186_v27, 6 }
 0x28f   :  { %v1294_v16 = vrot.slane %v1250_v44, 4  ;;  %v1350_v60 = vmax.f32 %v4326_v31, 0.0 }
 0x290   :  { %v1104_v59 = vsel %vm5399_vm15, %v1101_v36, %v1103_v18  ;;  %v2939_v36 = vld [vmem:[%s5358_s3 + $0x1b8] sm:$0xff]  ;;  %vm5412_vm15 = vmmov %vm5400_vm1 }
 0x291   :  { %v1175_v24 = vadd.f32 %v1174_v35, %v1104_v59  ;;  %2853 = vmatmul.msk.f32.gmra.mxu0 %vm1362_vm14, %v1350_v60  ;;  %v1295_v2 = vsel %vm1270_vm3, %v1292_v14, %v1294_v16  ;;  %v1560_v35 = vld [vmem:[%s5358_s3 + $0x48] sm:$0xff]  ;;  %v2865_v14 = vld [vmem:[%s5358_s3 + $0xb8] sm:$0xff] }
 0x292   :  { %1910 = vmatpush.msrb.mxu0 %v2939_v36  ;;  %1743 = vmatpush.msrb.mxu1 %v1560_v35  ;;  %v2863_v35 = vld [vmem:[%s5358_s3 + $0xa8] sm:$0xff] }
 0x293   :  { %v1322_v28 = vadd.f32 %v1295_v2, %v1175_v24  ;;  %1631 = vmatpush.msrb.mxu2 %v2865_v14  ;;  %v1180_v27 = vpop.f32.mrf.mxu1  ;;  %v1558_v2 = vld [vmem:[%s5358_s3 + $0x38] sm:$0xff]  ;;  %v2862_v14 = vld [vmem:[%s5358_s3 + $0xa0] sm:$0xff] }
 0x294   :  { %1911 = vmatpush.msrb.mxu0 %v2938_v40  ;;  %1744 = vmatpush.msrb.mxu1 %v1559_v50  ;;  %v2935_v40 = vld [vmem:[%s5358_s3 + $0x198] sm:$0xff]  ;;  %v1556_v50 = vld [vmem:[%s5358_s3 + $0x28] sm:$0xff] }
 0x295   :  { %v1063_v34 = vpop.f32.mrf.mxu2  ;;  %v4380_v13 = vadd.f32 %v4196_v46, %v1322_v28  ;;  %v2906_v28 = vld [vmem:[%s5358_s3 + $0x120] sm:$0xff] }
 0x296   :  { %v1105_v41 = vrot.slane %v1063_v34, 2  ;;  %v1253_v10 = vpop.f32.mrf.mxu3  ;;  %1912 = vmatpush.msrb.mxu0 %v2937_v12  ;;  %1745 = vmatpush.msrb.mxu1 %v1558_v2  ;;  %v2905_v34 = vld [vmem:[%s5358_s3 + $0x118] sm:$0xff]  ;;  %v2934_v12 = vld [vmem:[%s5358_s3 + $0x190] sm:$0xff]  ;;  %v1552_v2 = vld [vmem:[%s5358_s3 + $0x8] sm:$0xff] }
 0x297   :  { %v1296_v44 = vrot.slane %v1253_v10, 4  ;;  %v1351_v58 = vmax.f32 %v4380_v13, 0.0  ;;  %v2933_v10 = vld [vmem:[%s5358_s3 + $0x188] sm:$0xff] }
 0x298   :  { %v1106_v38 = vsel %vm5400_vm1, %v1103_v18, %v1105_v41  ;;  %v1123_v8 = vsel %vm5401_vm0, %v1105_v41, %v1121_v32  ;;  %1746 = vmatpush.msrb.mxu1 %v1557_v6  ;;  %v2861_v32 = vld [vmem:[%s5358_s3 + $0x98] sm:$0xff]  ;;  %v2904_v41 = vld [vmem:[%s5358_s3 + $0x110] sm:$0xff]  ;;  %v1551_v6 = vld [vmem:[%s5358_s3] sm:$0xff] }
 0x299   :  { %v1178_v59 = vadd.f32 %v1177_v63, %v1106_v38  ;;  %2854 = vmatmul.msk.f32.gmra.mxu0 %vm1362_vm14, %v1351_v58  ;;  %v1297_v61 = vsel %vm1270_vm3, %v1294_v16, %v1296_v44  ;;  %v1181_v55 = vadd.f32 %v1180_v27, %v1123_v8  ;;  %v2864_v63 = vld [vmem:[%s5358_s3 + $0xb0] sm:$0xff]  ;;  %v2907_v16 = vld [vmem:[%s5358_s3 + $0x128] sm:$0xff]  ;;  %v1554_v8 = vld [vmem:[%s5358_s3 + $0x18] sm:$0xff] }
 0x29a   :  { %1632 = vmatpush.msrb.mxu2 %v2864_v63  ;;  %1820 = vmatpush.msra.mxu3 %v2907_v16  ;;  %v2860_v38 = vld [vmem:[%s5358_s3 + $0x90] sm:$0xff]  ;;  %v2932_v27 = vld [vmem:[%s5358_s3 + $0x180] sm:$0xff]  ;;  %v2901_v16 = vld [vmem:[%s5358_s3 + $0xf8] sm:$0xff] }
 0x29b   :  { %v1323_v24 = vadd.f32 %v1297_v61, %v1178_v59  ;;  %v1324_v51 = vadd.f32 %v4188_v23, %v1181_v55  ;;  %v2936_v23 = vld [vmem:[%s5358_s3 + $0x1a0] sm:$0xff]  ;;  %1747 = vmatpush.msrb.mxu1 %v1556_v50  ;;  %v2903_v59 = vld [vmem:[%s5358_s3 + $0x108] sm:$0xff]  ;;  %v1553_v55 = vld [vmem:[%s5358_s3 + $0x10] sm:$0xff] }
 0x29c   :  { %1913 = vmatpush.msrb.mxu0 %v2936_v23  ;;  %1633 = vmatpush.msrb.mxu2 %v2863_v35  ;;  %v2859_v61 = vld [vmem:[%s5358_s3 + $0x88] sm:$0xff]  ;;  %v2858_v63 = vld [vmem:[%s5358_s3 + $0x80] sm:$0xff]  ;;  %v2930_v23 = vld [vmem:[%s5358_s3 + $0x170] sm:$0xff] }
 0x29d   :  { %v4394_v36 = vadd.f32 %v4196_v46, %v1323_v24  ;;  %v4432_v49 = vadd.f32 %v4196_v46, %v1324_v51  ;;  %1821 = vmatpush.msra.mxu3 %v2906_v28  ;;  %v1555_v46 = vld [vmem:[%s5358_s3 + $0x20] sm:$0xff]  ;;  %v2931_v51 = vld [vmem:[%s5358_s3 + $0x178] sm:$0xff]  ;;  %v2900_v28 = vld [vmem:[%s5358_s3 + $0xf0] sm:$0xff] }
 0x29e   :  { %1914 = vmatpush.msrb.mxu0 %v2935_v40  ;;  %1634 = vmatpush.msrb.mxu2 %v2862_v14  ;;  %v2902_v24 = vld [vmem:[%s5358_s3 + $0x100] sm:$0xff]  ;;  %v2857_v35 = vld [vmem:[%s5358_s3 + $0x78] sm:$0xff]  ;;  %v2929_v40 = vld [vmem:[%s5358_s3 + $0x168] sm:$0xff] }
 0x29f   :  { %v1352_v18 = vmax.f32 %v4394_v36, 0.0  ;;  %1822 = vmatpush.msra.mxu3 %v2905_v34  ;;  %v1353_v44 = vmax.f32 %v4432_v49, 0.0  ;;  %1748 = vmatpush.msrb.mxu1 %v1555_v46  ;;  %vm5413_vm0 = vmmov %vm5400_vm1 }
 0x2a0   :  { %1915 = vmatpush.msrb.mxu0 %v2934_v12  ;;  %1635 = vmatpush.msrb.mxu2 %v2861_v32 }
 0x2a1   :  { %2855 = vmatmul.msk.f32.gmra.mxu0 %vm1362_vm14, %v1352_v18  ;;  %1823 = vmatpush.msra.mxu3 %v2904_v41 }
 0x2a2   :  { %1916 = vmatpush.msrb.mxu0 %v2933_v10  ;;  %1636 = vmatpush.msrb.mxu2 %v2860_v38 }
 0x2a3   :  { %1749 = vmatpush.msrb.mxu1 %v1554_v8  ;;  %1824 = vmatpush.msra.mxu3 %v2903_v59 }
 0x2a4   :  { %1917 = vmatpush.msrb.mxu0 %v2932_v27  ;;  %1637 = vmatpush.msrb.mxu2 %v2859_v61 }
 0x2a5   :  { %1750 = vmatpush.msrb.mxu1 %v1553_v55  ;;  %1825 = vmatpush.msra.mxu3 %v2902_v24  ;;  %v2972_v55 = vld [vmem:[%s5358_s3 + $0x250] sm:$0xff] }
 0x2a6   :  { %1918 = vmatpush.msrb.mxu0 %v2931_v51  ;;  %1638 = vmatpush.msrb.mxu2 %v2858_v63  ;;  %v2971_v51 = vld [vmem:[%s5358_s3 + $0x248] sm:$0xff] }
 0x2a7   :  { %1751 = vmatpush.msrb.mxu1 %v1552_v2  ;;  %1826 = vmatpush.msra.mxu3 %v2901_v16  ;;  %v2969_v16 = vld [vmem:[%s5358_s3 + $0x238] sm:$0xff] }
 0x2a8   :  { %1919 = vmatpush.msrb.mxu0 %v2930_v23  ;;  %1639 = vmatpush.msrb.mxu2 %v2857_v35  ;;  %v2968_v35 = vld [vmem:[%s5358_s3 + $0x230] sm:$0xff] }
 0x2a9   :  { %2856 = vmatmul.msk.f32.gmra.mxu0 %vm1362_vm14, %v1353_v44  ;;  %1752 = vmatpush.msrb.mxu1 %v1551_v6  ;;  %v2967_v6 = vld [vmem:[%s5358_s3 + $0x228] sm:$0xff] }
 0x2aa   :  { %1827 = vmatpush.msra.mxu3 %v2900_v28  ;;  %1920 = vmatpush.msrb.mxu0 %v2929_v40 }
 0x2ab   :  { %2987 = vmatpush.msk.msra.mxu1 %vm719_vm5, %v5382_v9  ;;  %vm5402_vm5 = vcmp.eq.s32.totalorder %v5386_v43, %v3623_v57  ;;  %2045 = vmatpush.msra.mxu2 %v2972_v55 }
 0x2ad   :  { %2988 = vmatpush.msk.msra.mxu1 %vm718_vm6, %v5382_v9  ;;  %vm5403_vm6 = vcmp.eq.s32.totalorder %v3616_v54, %v3623_v57  ;;  %2046 = vmatpush.msra.mxu2 %v2971_v51 }
 0x2af   :  { %2989 = vmatpush.msk.msra.mxu1 %vm717_vm7, %v5382_v9  ;;  %vm5404_vm7 = vmmov %vm5400_vm1 }
 0x2b1   :  { %2990 = vmatpush.msk.msra.mxu1 %vm716_vm8, %v5382_v9  ;;  %vm5405_vm8 = vmmov %vm5400_vm1 }
 0x2b3   :  { %2991 = vmatpush.msk.msra.mxu1 %vm715_vm9, %v5382_v9  ;;  %vm5406_vm9 = vmmov %vm5400_vm1 }
 0x2b5   :  { %2992 = vmatpush.msk.msra.mxu1 %vm714_vm10, %v5382_v9  ;;  %vm5407_vm10 = vmmov %vm5400_vm1 }
 0x2b7   :  { %2993 = vmatpush.msk.msra.mxu1 %vm713_vm11, %v5382_v9  ;;  %vm5408_vm11 = vmmov %vm5400_vm1 }
 0x2b9   :  { %2994 = vmatpush.msk.msra.mxu1 %vm712_vm12, %v5382_v9  ;;  %vm5409_vm12 = vmmov %vm5400_vm1 }
 0x2bb   :  { %2995 = vmatpush.msk.msra.mxu1 %vm5402_vm5, %v5382_v9  ;;  %vm5414_vm5 = vmmov %vm5413_vm0 }
 0x2bd   :  { %2996 = vmatpush.msk.msra.mxu1 %vm5403_vm6, %v5382_v9  ;;  %vm5415_vm6 = vmmov %vm5413_vm0 }
 0x2be   :  { %v1422_v62 = vpop.f32.mrf.mxu0 }
 0x2bf   :  { %v4546_v45 = vmax.f32 %v1340_v1, %v1422_v62  ;;  %v2966_v62 = vld [vmem:[%s5358_s3 + $0x220] sm:$0xff] }
 0x2c1   :  { %v1492_v5 = vrot.slane %v4546_v45, 2  ;;  %v1533_v49 = vrot.slane %v4546_v45, 6 }
 0x2c6   :  { %v1425_v0 = vpop.f32.mrf.mxu0 }
 0x2c7   :  { %v1465_v4 = vmax.f32 %v1341_v30, %v1425_v0 }
 0x2c9   :  { %v1493_v7 = vrot.slane %v1465_v4, 2 }
 0x2cb   :  { %v1494_v26 = vsel %vm5404_vm7, %v1492_v5, %v1493_v7  ;;  %v2964_v5 = vld [vmem:[%s5358_s3 + $0x210] sm:$0xff]  ;;  %vm5416_vm7 = vcmask 1041408  }
 0x2cc   :  { %v4553_v39 = vmax.f32 %v4546_v45, %v1494_v26 }
 0x2ce   :  { %v1428_v43 = vpop.f32.mrf.mxu0  ;;  %2872 = vmatmul.msk.f32.vlgmr.msrb.gmra.mxu2 %vm1362_vm14, %v4553_v39  ;;  %2886 = vmatmul.msk.f32.vlgmr.msrb.gmra.mxu1 %vm1362_vm14, %v4553_v39 }
 0x2cf   :  { %v1466_v54 = vmax.f32 %v1342_v56, %v1428_v43  ;;  %2915 = vmatmul.msk.f32.vlgmr.msra.gmra.mxu3 %vm1362_vm14, %v4553_v39  ;;  %2944 = vmatmul.msk.f32.vlgmr.msrb.gmra.mxu0 %vm1362_vm14, %v4553_v39  ;;  %v2963_v43 = vld [vmem:[%s5358_s3 + $0x208] sm:$0xff] }
 0x2d1   :  { %v1495_v57 = vrot.slane %v1466_v54, 2 }
 0x2d3   :  { %v1496_v9 = vsel %vm5405_vm8, %v1493_v7, %v1495_v57  ;;  %vm2340_vm8 = vcmask 883712  }
 0x2d4   :  { %v4566_v21 = vmax.f32 %v1465_v4, %v1496_v9  ;;  %v2965_v4 = vld [vmem:[%s5358_s3 + $0x218] sm:$0xff] }
 0x2d5   :  { %v2961_v9 = vld [vmem:[%s5358_s3 + $0x1f8] sm:$0xff] }
 0x2d6   :  { %v1431_v1 = vpop.f32.mrf.mxu0  ;;  %2873 = vmatmul.msk.f32.gmra.mxu2 %vm1362_vm14, %v4566_v21  ;;  %2887 = vmatmul.msk.f32.gmra.mxu1 %vm1362_vm14, %v4566_v21 }
 0x2d7   :  { %v1467_v25 = vmax.f32 %v1343_v19, %v1431_v1  ;;  %2916 = vmatmul.msk.f32.gmra.mxu3 %vm1362_vm14, %v4566_v21  ;;  %2945 = vmatmul.msk.f32.gmra.mxu0 %vm1362_vm14, %v4566_v21 }
 0x2d9   :  { %v1497_v30 = vrot.slane %v1467_v25, 2 }
 0x2db   :  { %v1498_v17 = vsel %vm5406_vm9, %v1495_v57, %v1497_v30  ;;  %v2962_v57 = vld [vmem:[%s5358_s3 + $0x200] sm:$0xff] }
 0x2dc   :  { %v4579_v56 = vmax.f32 %v1466_v54, %v1498_v17 }
 0x2de   :  { %v1434_v14 = vpop.f32.mrf.mxu0  ;;  %2874 = vmatmul.msk.f32.gmra.mxu2 %vm1362_vm14, %v4579_v56  ;;  %2888 = vmatmul.msk.f32.gmra.mxu1 %vm1362_vm14, %v4579_v56 }
 0x2df   :  { %v1468_v3 = vmax.f32 %v1344_v47, %v1434_v14  ;;  %2917 = vmatmul.msk.f32.gmra.mxu3 %vm1362_vm14, %v4579_v56  ;;  %2946 = vmatmul.msk.f32.gmra.mxu0 %vm1362_vm14, %v4579_v56  ;;  %v2959_v14 = vld [vmem:[%s5358_s3 + $0x1e8] sm:$0xff] }
 0x2e1   :  { %v1499_v19 = vrot.slane %v1468_v3, 2 }
 0x2e3   :  { %v1500_v50 = vsel %vm5407_vm10, %v1497_v30, %v1499_v19  ;;  %v2960_v30 = vld [vmem:[%s5358_s3 + $0x1f0] sm:$0xff] }
 0x2e4   :  { %v4592_v34 = vmax.f32 %v1467_v25, %v1500_v50 }
 0x2e6   :  { %v1437_v12 = vpop.f32.mrf.mxu0  ;;  %2875 = vmatmul.msk.f32.gmra.mxu2 %vm1362_vm14, %v4592_v34  ;;  %2889 = vmatmul.msk.f32.gmra.mxu1 %vm1362_vm14, %v4592_v34 }
 0x2e7   :  { %v1469_v42 = vmax.f32 %v1345_v52, %v1437_v12  ;;  %2918 = vmatmul.msk.f32.gmra.mxu3 %vm1362_vm14, %v4592_v34  ;;  %2947 = vmatmul.msk.f32.gmra.mxu0 %vm1362_vm14, %v4592_v34 }
 0x2e9   :  { %v1501_v47 = vrot.slane %v1469_v42, 2 }
 0x2eb   :  { %v1502_v32 = vsel %vm5408_vm11, %v1499_v19, %v1501_v47 }
 0x2ec   :  { %v4605_v46 = vmax.f32 %v1468_v3, %v1502_v32  ;;  %v2958_v3 = vld [vmem:[%s5358_s3 + $0x1e0] sm:$0xff] }
 0x2ee   :  { %v1440_v41 = vpop.f32.mrf.mxu0  ;;  %2876 = vmatmul.msk.f32.gmra.mxu2 %vm1362_vm14, %v4605_v46  ;;  %2890 = vmatmul.msk.f32.gmra.mxu1 %vm1362_vm14, %v4605_v46 }
 0x2ef   :  { %v1470_v53 = vmax.f32 %v1346_v11, %v1440_v41  ;;  %2919 = vmatmul.msk.f32.gmra.mxu3 %vm1362_vm14, %v4605_v46  ;;  %2948 = vmatmul.msk.f32.gmra.mxu0 %vm1362_vm14, %v4605_v46 }
 0x2f1   :  { %v1503_v52 = vrot.slane %v1470_v53, 2 }
 0x2f3   :  { %v1504_v10 = vsel %vm5409_vm12, %v1501_v47, %v1503_v52 }
 0x2f4   :  { %v4618_v38 = vmax.f32 %v1469_v42, %v1504_v10 }
 0x2f6   :  { %v1443_v8 = vpop.f32.mrf.mxu0  ;;  %2877 = vmatmul.msk.f32.gmra.mxu2 %vm1362_vm14, %v4618_v38  ;;  %2891 = vmatmul.msk.f32.gmra.mxu1 %vm1362_vm14, %v4618_v38 }
 0x2f7   :  { %v1471_v29 = vmax.f32 %v1347_v33, %v1443_v8  ;;  %2920 = vmatmul.msk.f32.gmra.mxu3 %vm1362_vm14, %v4618_v38  ;;  %2949 = vmatmul.msk.f32.gmra.mxu0 %vm1362_vm14, %v4618_v38 }
 0x2f9   :  { %v1505_v11 = vrot.slane %v1471_v29, 2 }
 0x2fb   :  { %v1506_v59 = vsel %vm5410_vm2, %v1503_v52, %v1505_v11 }
 0x2fc   :  { %v4631_v27 = vmax.f32 %v1470_v53, %v1506_v59 }
 0x2fe   :  { %v1446_v61 = vpop.f32.mrf.mxu0  ;;  %2878 = vmatmul.msk.f32.gmra.mxu2 %vm1362_vm14, %v4631_v27  ;;  %2892 = vmatmul.msk.f32.gmra.mxu1 %vm1362_vm14, %v4631_v27 }
 0x2ff   :  { %v1472_v37 = vmax.f32 %v1348_v15, %v1446_v61  ;;  %2921 = vmatmul.msk.f32.gmra.mxu3 %vm1362_vm14, %v4631_v27  ;;  %2950 = vmatmul.msk.f32.gmra.mxu0 %vm1362_vm14, %v4631_v27  ;;  %v2970_v15 = vld [vmem:[%s5358_s3 + $0x240] sm:$0xff] }
 0x300   :  { %2047 = vmatpush.msra.mxu2 %v2970_v15 }
 0x301   :  { %v1507_v33 = vrot.slane %v1472_v37, 2 }
 0x302   :  { %2048 = vmatpush.msra.mxu2 %v2969_v16 }
 0x303   :  { %v1508_v24 = vsel %vm5411_vm4, %v1505_v11, %v1507_v33 }
 0x304   :  { %v4650_v22 = vmax.f32 %v1471_v29, %v1508_v24  ;;  %2049 = vmatpush.msra.mxu2 %v2968_v35 }
 0x306   :  { %v1449_v63 = vpop.f32.mrf.mxu0  ;;  %2879 = vmatmul.msk.f32.gmra.mxu2 %vm1362_vm14, %v4650_v22  ;;  %2893 = vmatmul.msk.f32.gmra.mxu1 %vm1362_vm14, %v4650_v22 }
 0x307   :  { %v1473_v2 = vmax.f32 %v1349_v20, %v1449_v63  ;;  %2922 = vmatmul.msk.f32.gmra.mxu3 %vm1362_vm14, %v4650_v22  ;;  %2951 = vmatmul.msk.f32.gmra.mxu0 %vm1362_vm14, %v4650_v22 }
 0x308   :  { %2050 = vmatpush.msra.mxu2 %v2967_v6 }
 0x309   :  { %v1509_v23 = vrot.slane %v1473_v2, 2 }
 0x30a   :  { %2051 = vmatpush.msra.mxu2 %v2966_v62 }
 0x30b   :  { %v1510_v48 = vsel %vm5412_vm15, %v1507_v33, %v1509_v23 }
 0x30c   :  { %v4672_v20 = vmax.f32 %v1472_v37, %v1510_v48  ;;  %2052 = vmatpush.msra.mxu2 %v2965_v4 }
 0x30e   :  { %v1452_v28 = vpop.f32.mrf.mxu0  ;;  %2880 = vmatmul.msk.f32.gmra.mxu2 %vm1362_vm14, %v4672_v20  ;;  %2894 = vmatmul.msk.f32.gmra.mxu1 %vm1362_vm14, %v4672_v20 }
 0x30f   :  { %v1474_v40 = vmax.f32 %v1350_v60, %v1452_v28  ;;  %2923 = vmatmul.msk.f32.gmra.mxu3 %vm1362_vm14, %v4672_v20  ;;  %2952 = vmatmul.msk.f32.gmra.mxu0 %vm1362_vm14, %v4672_v20 }
 0x310   :  { %2053 = vmatpush.msra.mxu2 %v2964_v5 }
 0x311   :  { %v1511_v0 = vrot.slane %v1474_v40, 2 }
 0x312   :  { %2054 = vmatpush.msra.mxu2 %v2963_v43 }
 0x313   :  { %v1512_v31 = vsel %vm5400_vm1, %v1509_v23, %v1511_v0 }
 0x314   :  { %v4694_v60 = vmax.f32 %v1473_v2, %v1512_v31  ;;  %2055 = vmatpush.msra.mxu2 %v2962_v57 }
 0x316   :  { %v1455_v7 = vpop.f32.mrf.mxu0  ;;  %2881 = vmatmul.msk.f32.gmra.mxu2 %vm1362_vm14, %v4694_v60  ;;  %2895 = vmatmul.msk.f32.gmra.mxu1 %vm1362_vm14, %v4694_v60 }
 0x317   :  { %v1475_v26 = vmax.f32 %v1351_v58, %v1455_v7  ;;  %2924 = vmatmul.msk.f32.gmra.mxu3 %vm1362_vm14, %v4694_v60  ;;  %2953 = vmatmul.msk.f32.gmra.mxu0 %vm1362_vm14, %v4694_v60 }
 0x318   :  { %2056 = vmatpush.msra.mxu2 %v2961_v9 }
 0x319   :  { %v1513_v54 = vrot.slane %v1475_v26, 2 }
 0x31a   :  { %2057 = vmatpush.msra.mxu2 %v2960_v30 }
 0x31b   :  { %v1514_v13 = vsel %vm5413_vm0, %v1511_v0, %v1513_v54 }
 0x31c   :  { %v4716_v58 = vmax.f32 %v1474_v40, %v1514_v13  ;;  %2058 = vmatpush.msra.mxu2 %v2959_v14 }
 0x31e   :  { %v1458_v1 = vpop.f32.mrf.mxu0  ;;  %2882 = vmatmul.msk.f32.gmra.mxu2 %vm1362_vm14, %v4716_v58  ;;  %2896 = vmatmul.msk.f32.gmra.mxu1 %vm1362_vm14, %v4716_v58 }
 0x31f   :  { %v1476_v25 = vmax.f32 %v1352_v18, %v1458_v1  ;;  %2925 = vmatmul.msk.f32.gmra.mxu3 %vm1362_vm14, %v4716_v58  ;;  %2954 = vmatmul.msk.f32.gmra.mxu0 %vm1362_vm14, %v4716_v58 }
 0x320   :  { %2059 = vmatpush.msra.mxu2 %v2958_v3 }
 0x321   :  { %v1515_v17 = vrot.slane %v1476_v25, 2 }
 0x323   :  { %v1516_v36 = vsel %vm5414_vm5, %v1513_v54, %v1515_v17 }
 0x324   :  { %v4738_v18 = vmax.f32 %v1475_v26, %v1516_v36 }
 0x326   :  { %v1461_v19 = vpop.f32.mrf.mxu0  ;;  %2883 = vmatmul.msk.f32.gmra.mxu2 %vm1362_vm14, %v4738_v18  ;;  %2897 = vmatmul.msk.f32.gmra.mxu1 %vm1362_vm14, %v4738_v18 }
 0x327   :  { %v1477_v50 = vmax.f32 %v1353_v44, %v1461_v19  ;;  %2926 = vmatmul.msk.f32.gmra.mxu3 %vm1362_vm14, %v4738_v18  ;;  %2955 = vmatmul.msk.f32.gmra.mxu0 %vm1362_vm14, %v4738_v18 }
 0x329   :  { %v1517_v12 = vrot.slane %v1477_v50, 2 }
 0x32b   :  { %v1518_v42 = vsel %vm5415_vm6, %v1515_v17, %v1517_v12  ;;  %v1535_v44 = vsel %vm5416_vm7, %v1517_v12, %v1533_v49 }
 0x32c   :  { %v4754_v47 = vmax.f32 %v1476_v25, %v1518_v42  ;;  %v4766_v32 = vmax.f32 %v1477_v50, %v1535_v44 }
 0x32e   :  { %2884 = vmatmul.msk.f32.gmra.mxu2 %vm1362_vm14, %v4754_v47  ;;  %2898 = vmatmul.msk.f32.gmra.mxu1 %vm1362_vm14, %v4754_v47 }
 0x32f   :  { %2927 = vmatmul.msk.f32.gmra.mxu3 %vm1362_vm14, %v4754_v47  ;;  %2956 = vmatmul.msk.f32.gmra.mxu0 %vm1362_vm14, %v4754_v47 }
 0x336   :  { %2885 = vmatmul.msk.f32.gmra.mxu2 %vm1362_vm14, %v4766_v32  ;;  %2899 = vmatmul.msk.f32.gmra.mxu1 %vm1362_vm14, %v4766_v32 }
 0x337   :  { %2928 = vmatmul.msk.f32.gmra.mxu3 %vm1362_vm14, %v4766_v32  ;;  %2957 = vmatmul.msk.f32.gmra.mxu0 %vm1362_vm14, %v4766_v32 }
 0x33e   :  { %2973 = vmatmul.msk.f32.vlgmr.msra.gmra.mxu2 %vm1362_vm14, %v4553_v39 }
 0x346   :  { %2974 = vmatmul.msk.f32.gmra.mxu2 %vm1362_vm14, %v4566_v21 }
 0x34b   :  { %v4780_v45 = vpop.f32.mrf.mxu1 }
 0x34c   :  { %v1922_v43 = vpop.f32.mrf.mxu0 }
 0x34e   :  { %2975 = vmatmul.msk.f32.gmra.mxu2 %vm1362_vm14, %v4579_v56 }
 0x351   :  { %v4784_v41 = vpop.f32.mrf.mxu2 }
 0x352   :  { %v4786_v53 = vpop.f32.mrf.mxu3 }
 0x353   :  { %v4788_v52 = vpop.f32.mrf.mxu1 }
 0x354   :  { %v1925_v1 = vpop.f32.mrf.mxu0 }
 0x356   :  { %2976 = vmatmul.msk.f32.gmra.mxu2 %vm1362_vm14, %v4592_v34 }
 0x359   :  { %v4792_v10 = vpop.f32.mrf.mxu2 }
 0x35a   :  { %v4794_v39 = vpop.f32.mrf.mxu3  ;;  %v1698_v56 = vrot.slane %v4792_v10, 4 }
 0x35b   :  { %v4796_v8 = vpop.f32.mrf.mxu1 }
 0x35c   :  { %v1928_v50 = vpop.f32.mrf.mxu0 }
 0x35e   :  { %2977 = vmatmul.msk.f32.gmra.mxu2 %vm1362_vm14, %v4605_v46 }
 0x361   :  { %v1647_v21 = vpop.f32.mrf.mxu2 }
 0x362   :  { %v1700_v29 = vrot.slane %v1647_v21, 4  ;;  %v4801_v11 = vpop.f32.mrf.mxu3 }
 0x363   :  { %v4803_v59 = vpop.f32.mrf.mxu1 }
 0x364   :  { %v4808_v34 = vsel %vm1270_vm3, %v1698_v56, %v1700_v29 }
 0x366   :  { %2978 = vmatmul.msk.f32.gmra.mxu2 %vm1362_vm14, %v4618_v38 }
 0x369   :  { %v4812_v61 = vpop.f32.mrf.mxu2 }
 0x36a   :  { %v1702_v46 = vrot.slane %v4812_v61, 4  ;;  %v4815_v37 = vpop.f32.mrf.mxu3 }
 0x36b   :  { %v4817_v33 = vpop.f32.mrf.mxu1 }
 0x36c   :  { %v4822_v55 = vsel %vm1270_vm3, %v1700_v29, %v1702_v46  ;;  %v1931_v29 = vpop.f32.mrf.mxu0 }
 0x36e   :  { %2979 = vmatmul.msk.f32.gmra.mxu2 %vm1362_vm14, %v4631_v27 }
 0x371   :  { %v4826_v24 = vpop.f32.mrf.mxu2 }
 0x372   :  { %v4828_v51 = vpop.f32.mrf.mxu3 }
 0x373   :  { %v4830_v38 = vpop.f32.mrf.mxu1 }
 0x376   :  { %2980 = vmatmul.msk.f32.gmra.mxu2 %vm1362_vm14, %v4650_v22 }
 0x379   :  { %v4834_v15 = vpop.f32.mrf.mxu2 }
 0x37a   :  { %v4836_v63 = vpop.f32.mrf.mxu3 }
 0x37b   :  { %v4838_v2 = vpop.f32.mrf.mxu1 }
 0x37e   :  { %2981 = vmatmul.msk.f32.gmra.mxu2 %vm1362_vm14, %v4672_v20 }
 0x381   :  { %v4842_v16 = vpop.f32.mrf.mxu2 }
 0x382   :  { %v4844_v27 = vpop.f32.mrf.mxu3  ;;  %v1708_v22 = vrot.slane %v4842_v16, 4 }
 0x383   :  { %v4846_v23 = vpop.f32.mrf.mxu1 }
 0x386   :  { %2982 = vmatmul.msk.f32.gmra.mxu2 %vm1362_vm14, %v4694_v60 }
 0x389   :  { %v1662_v35 = vpop.f32.mrf.mxu2 }
 0x38a   :  { %v1710_v48 = vrot.slane %v1662_v35, 4  ;;  %v4851_v6 = vpop.f32.mrf.mxu3 }
 0x38b   :  { %v4858_v20 = vpop.f32.mrf.mxu1 }
 0x38c   :  { %v4856_v28 = vsel %vm1270_vm3, %v1708_v22, %v1710_v48 }
 0x38e   :  { %2983 = vmatmul.msk.f32.gmra.mxu2 %vm1362_vm14, %v4716_v58 }
 0x391   :  { %v1665_v40 = vpop.f32.mrf.mxu2 }
 0x392   :  { %v1712_v62 = vrot.slane %v1665_v40, 4  ;;  %v4862_v0 = vpop.f32.mrf.mxu3 }
 0x393   :  { %v4869_v31 = vpop.f32.mrf.mxu1 }
 0x394   :  { %v4865_v4 = vsel %vm1270_vm3, %v1710_v48, %v1712_v62 }
 0x396   :  { %2984 = vmatmul.msk.f32.gmra.mxu2 %vm1362_vm14, %v4738_v18 }
 0x399   :  { %v1668_v60 = vpop.f32.mrf.mxu2 }
 0x39a   :  { %v1714_v5 = vrot.slane %v1668_v60, 4  ;;  %v4871_v7 = vpop.f32.mrf.mxu3 }
 0x39b   :  { %v4878_v54 = vpop.f32.mrf.mxu1 }
 0x39c   :  { %v4874_v26 = vsel %vm1270_vm3, %v1712_v62, %v1714_v5 }
 0x39e   :  { %2985 = vmatmul.msk.f32.gmra.mxu2 %vm1362_vm14, %v4754_v47 }
 0x3a1   :  { %v1671_v57 = vpop.f32.mrf.mxu2 }
 0x3a2   :  { %v1716_v13 = vrot.slane %v1671_v57, 4  ;;  %v4880_v58 = vpop.f32.mrf.mxu3  ;;  %v1697_v57 = vrot.slane %v4784_v41, 4 }
 0x3a3   :  { %v4889_v14 = vpop.f32.mrf.mxu1 }
 0x3a4   :  { %v4883_v9 = vsel %vm1270_vm3, %v1714_v5, %v1716_v13 }
 0x3a6   :  { %2986 = vmatmul.msk.f32.gmra.mxu2 %vm1362_vm14, %v4766_v32  ;;  %v1872_v32 = vrot.slane %v4786_v53, 4  ;;  %v1934_v53 = vpop.f32.mrf.mxu0  ;;  %vm2155_vm14 = vcmask 654336  }
 0x3a9   :  { %v1674_v25 = vpop.f32.mrf.mxu2 }
 0x3aa   :  { %v1718_v30 = vrot.slane %v1674_v25, 4  ;;  %v4887_v17 = vpop.f32.mrf.mxu3 }
 0x3ab   :  { %v1790_v42 = vpop.f32.mrf.mxu1 }
 0x3ac   :  { %v4892_v36 = vsel %vm1270_vm3, %v1716_v13, %v1718_v30  ;;  %v1699_v13 = vsel %vm1270_vm3, %v1697_v57, %v1698_v56  ;;  %v1977_v56 = vrot.slane %v1925_v1, 4 }
 0x3b1   :  { %v1677_v18 = vpop.f32.mrf.mxu2 }
 0x3b2   :  { %v1720_v3 = vrot.slane %v1677_v18, 4  ;;  %v4894_v19 = vpop.f32.mrf.mxu3 }
 0x3b3   :  { %v1793_v40 = vpop.f32.mrf.mxu1 }
 0x3b4   :  { %v4897_v12 = vsel %vm1270_vm3, %v1718_v30, %v1720_v3  ;;  %v1794_v5 = vadd.f32 %v1793_v40, %v4784_v41  ;;  %v1755_v30 = vadd.f32 %v4780_v45, %v1699_v13  ;;  %v1937_v40 = vpop.f32.mrf.mxu0 }
 0x3b6   :  { %v1888_v25 = vadd.f32 %v1872_v32, %v1794_v5 }
 0x3b9   :  { %v1680_v47 = vpop.f32.mrf.mxu2 }
 0x3ba   :  { %v1722_v49 = vrot.slane %v1680_v47, 4  ;;  %v1868_v44 = vpop.f32.mrf.mxu3 }
 0x3bb   :  { %v1874_v48 = vsel %vm1270_vm3, %v1868_v44, %v1872_v32 }
 0x3bc   :  { %v1723_v21 = vsel %vm1270_vm3, %v1720_v3, %v1722_v49  ;;  %v1978_v49 = vrot.slane %v1928_v50, 4 }
 0x3bd   :  { %v1791_v35 = vadd.f32 %v1790_v42, %v1723_v21  ;;  %v2027_v42 = vadd.f32 %v1925_v1, %v1888_v25  ;;  %v1875_v21 = vadd.f32 %v4794_v39, %v1755_v30  ;;  %v4925_v39 = vld [vmem:[%s5359_s4 + $0x2] ss:$0 sm:$0xff]  ;;  %v1982_v30 = vrot.slane %v1934_v53, 4 }
 0x3be   :  { %v1979_v45 = vsel %vm1270_vm3, %v1977_v56, %v1978_v49 }
 0x3bf   :  { %v1887_v62 = vadd.f32 %v1874_v48, %v1791_v35  ;;  %v1758_v35 = vadd.f32 %v4788_v52, %v4808_v34  ;;  %v2014_v48 = vadd.f32 %v1979_v45, %v1875_v21  ;;  %v1761_v34 = vadd.f32 %v4796_v8, %v4822_v55 }
 0x3c1   :  { %v4902_v60 = vpop.f32.mrf.mxu2  ;;  %v2026_v44 = vadd.f32 %v1922_v43, %v1887_v62  ;;  %v1980_v62 = vrot.slane %v1931_v29, 4  ;;  %v1876_v5 = vadd.f32 %v4801_v11, %v1758_v35  ;;  %v1704_v29 = vrot.slane %v4826_v24, 4 }
 0x3c2   :  { %v2105_v3 = vrot.slane %v4902_v60, 4 }
 0x3c3   :  { %v1981_v52 = vsel %vm1270_vm3, %v1978_v49, %v1980_v62  ;;  %v1705_v8 = vsel %vm1270_vm3, %v1702_v46, %v1704_v29  ;;  %v1983_v49 = vsel %vm1270_vm3, %v1980_v62, %v1982_v30 }
 0x3c4   :  { %v2015_v13 = vadd.f32 %v1981_v52, %v1876_v5 }
 0x3c9   :  { %v2064_v18 = vpop.f32.mrf.mxu2 }
 0x3ca   :  { %v2106_v47 = vrot.slane %v2064_v18, 4  ;;  %v1940_v18 = vpop.f32.mrf.mxu0 }
 0x3cc   :  { %v2107_v41 = vsel %vm1270_vm3, %v2105_v3, %v2106_v47  ;;  %v4915_v10 = vadd.f32 %v2106_v47, %v2027_v42  ;;  %v1877_v42 = vadd.f32 %v4815_v37, %v1761_v34  ;;  %v1706_v37 = vrot.slane %v4834_v15, 4 }
 0x3cd   :  { %v4917_v32 = vadd.f32 %v2107_v41, %v2026_v44  ;;  %v1764_v44 = vadd.f32 %v4803_v59, %v1705_v8  ;;  %v1984_v41 = vrot.slane %v1937_v40, 4 }
 0x3ce   :  { %v2016_v24 = vadd.f32 %v1983_v49, %v1877_v42  ;;  %v1707_v56 = vsel %vm1270_vm3, %v1704_v29, %v1706_v37  ;;  %v1709_v5 = vsel %vm1270_vm3, %v1706_v37, %v1708_v22  ;;  %v5072_v60 = vadd.f32 %v4925_v39, %v4915_v10 }
 0x3cf   :  { %v1878_v61 = vadd.f32 %v4828_v51, %v1764_v44  ;;  %v1985_v35 = vsel %vm1270_vm3, %v1982_v30, %v1984_v41  ;;  %v1986_v51 = vrot.slane %v1940_v18, 4 }
 0x3d1   :  { %v2067_v50 = vpop.f32.mrf.mxu2  ;;  %v2017_v15 = vadd.f32 %v1985_v35, %v1878_v61  ;;  %v1987_v34 = vsel %vm1270_vm3, %v1984_v41, %v1986_v51 }
 0x3d2   :  { %v2112_v43 = vadd.f32 %v2067_v50, %v2014_v48  ;;  %v1943_v45 = vpop.f32.mrf.mxu0  ;;  %v1767_v48 = vadd.f32 %v4817_v33, %v1707_v56 }
 0x3d4   :  { %v4929_v1 = vadd.f32 %v4925_v39, %v2112_v43  ;;  %v1879_v43 = vadd.f32 %v4836_v63, %v1767_v48 }
 0x3d6   :  { %v2141_v57 = vmax.f32 %v4929_v1, 0.0  ;;  %v2018_v29 = vadd.f32 %v1987_v34, %v1879_v43 }
 0x3d8   :  { %2997 = vmatmul.msk.f32.vlgmr.msra.gmra.mxu1 %vm2155_vm14, %v2141_v57 }
 0x3d9   :  { %v2070_v25 = vpop.f32.mrf.mxu2 }
 0x3da   :  { %v2113_v11 = vadd.f32 %v2070_v25, %v2015_v13  ;;  %v1946_v33 = vpop.f32.mrf.mxu0  ;;  %v1770_v13 = vadd.f32 %v4830_v38, %v1709_v5  ;;  %v1773_v38 = vadd.f32 %v4838_v2, %v4856_v28  ;;  %v1776_v2 = vadd.f32 %v4846_v23, %v4865_v4 }
 0x3db   :  { %v1779_v23 = vadd.f32 %v4858_v20, %v4874_v26  ;;  %v1782_v20 = vadd.f32 %v4869_v31, %v4883_v9  ;;  %v1785_v31 = vadd.f32 %v4878_v54, %v4892_v36  ;;  %v1788_v36 = vadd.f32 %v4889_v14, %v4897_v12 }
 0x3dc   :  { %v4941_v47 = vadd.f32 %v4925_v39, %v2113_v11  ;;  %v1988_v11 = vrot.slane %v1943_v45, 4  ;;  %v1880_v30 = vadd.f32 %v4844_v27, %v1770_v13  ;;  %v1881_v27 = vadd.f32 %v4851_v6, %v1773_v38 }
 0x3dd   :  { %v1882_v6 = vadd.f32 %v4862_v0, %v1776_v2  ;;  %v1883_v0 = vadd.f32 %v4871_v7, %v1779_v23  ;;  %v1884_v7 = vadd.f32 %v4880_v58, %v1782_v20  ;;  %v1885_v58 = vadd.f32 %v4887_v17, %v1785_v31 }
 0x3de   :  { %v2142_v55 = vmax.f32 %v4941_v47, 0.0  ;;  %v1989_v18 = vsel %vm1270_vm3, %v1986_v51, %v1988_v11  ;;  %v5064_v23 = vadd.f32 %v4925_v39, %v4917_v32 }
 0x3df   :  { %v2019_v42 = vadd.f32 %v1989_v18, %v1880_v30 }
 0x3e0   :  { %2998 = vmatmul.msk.f32.gmra.mxu1 %vm2155_vm14, %v2142_v55 }
 0x3e1   :  { %v2073_v53 = vpop.f32.mrf.mxu2 }
 0x3e2   :  { %v2114_v21 = vadd.f32 %v2073_v53, %v2016_v24  ;;  %v1949_v8 = vpop.f32.mrf.mxu0  ;;  %v1990_v24 = vrot.slane %v1946_v33, 4 }
 0x3e3   :  { %v1992_v56 = vrot.slane %v1949_v8, 4 }
 0x3e4   :  { %v4955_v46 = vadd.f32 %v4925_v39, %v2114_v21  ;;  %v1991_v21 = vsel %vm1270_vm3, %v1988_v11, %v1990_v24 }
 0x3e5   :  { %v2020_v28 = vadd.f32 %v1991_v21, %v1881_v27 }
 0x3e6   :  { %v2143_v59 = vmax.f32 %v4955_v46, 0.0 }
 0x3e8   :  { %2999 = vmatmul.msk.f32.gmra.mxu1 %vm2155_vm14, %v2143_v59 }
 0x3e9   :  { %v2076_v40 = vpop.f32.mrf.mxu2 }
 0x3ea   :  { %v2115_v50 = vadd.f32 %v2076_v40, %v2017_v15  ;;  %v1952_v45 = vpop.f32.mrf.mxu0  ;;  %v1993_v15 = vsel %vm1270_vm3, %v1990_v24, %v1992_v56 }
 0x3eb   :  { %v2021_v4 = vadd.f32 %v1993_v15, %v1882_v6  ;;  %v1994_v51 = vrot.slane %v1952_v45, 4 }
 0x3ec   :  { %v4966_v62 = vadd.f32 %v4925_v39, %v2115_v50 }
 0x3ed   :  { %v1995_v34 = vsel %vm1270_vm3, %v1992_v56, %v1994_v51 }
 0x3ee   :  { %v2144_v52 = vmax.f32 %v4966_v62, 0.0  ;;  %v2022_v26 = vadd.f32 %v1995_v34, %v1883_v0 }
 0x3f0   :  { %3000 = vmatmul.msk.f32.gmra.mxu1 %vm2155_vm14, %v2144_v52 }
 0x3f1   :  { %v2079_v63 = vpop.f32.mrf.mxu2 }
 0x3f2   :  { %v2116_v25 = vadd.f32 %v2079_v63, %v2018_v29  ;;  %v1955_v5 = vpop.f32.mrf.mxu0 }
 0x3f3   :  { %v1996_v63 = vrot.slane %v1955_v5, 4 }
 0x3f4   :  { %v4979_v16 = vadd.f32 %v4925_v39, %v2116_v25 }
 0x3f5   :  { %v1997_v18 = vsel %vm1270_vm3, %v1994_v51, %v1996_v63 }
 0x3f6   :  { %v2145_v22 = vmax.f32 %v4979_v16, 0.0  ;;  %v2023_v9 = vadd.f32 %v1997_v18, %v1884_v7 }
 0x3f8   :  { %3001 = vmatmul.msk.f32.gmra.mxu1 %vm2155_vm14, %v2145_v22 }
 0x3f9   :  { %v2082_v49 = vpop.f32.mrf.mxu2 }
 0x3fa   :  { %v2117_v44 = vadd.f32 %v2082_v49, %v2019_v42  ;;  %v1958_v30 = vpop.f32.mrf.mxu0 }
 0x3fb   :  { %v1998_v8 = vrot.slane %v1958_v30, 4 }
 0x3fc   :  { %v4990_v37 = vadd.f32 %v4925_v39, %v2117_v44 }
 0x3fd   :  { %v1999_v24 = vsel %vm1270_vm3, %v1996_v63, %v1998_v8 }
 0x3fe   :  { %v2146_v53 = vmax.f32 %v4990_v37, 0.0  ;;  %v2024_v54 = vadd.f32 %v1999_v24, %v1885_v58 }
 0x400   :  { %3002 = vmatmul.msk.f32.gmra.mxu1 %vm2155_vm14, %v2146_v53 }
 0x401   :  { %v2085_v41 = vpop.f32.mrf.mxu2 }
 0x402   :  { %v2118_v61 = vadd.f32 %v2085_v41, %v2020_v28  ;;  %v1961_v27 = vpop.f32.mrf.mxu0  ;;  %v1886_v41 = vadd.f32 %v4894_v19, %v1788_v36  ;;  %v2372_v36 = vld [vmem:[%s5361_s6 + $0x28] sm:$0xff] }
 0x403   :  { %v2000_v28 = vrot.slane %v1961_v27, 4  ;;  %v2371_v27 = vld [vmem:[%s5361_s6 + $0x20] sm:$0xff] }
 0x404   :  { %v5001_v35 = vadd.f32 %v4925_v39, %v2118_v61 }
 0x405   :  { %v2001_v56 = vsel %vm1270_vm3, %v1998_v8, %v2000_v28  ;;  %v2369_v28 = vld [vmem:[%s5361_s6 + $0x10] sm:$0xff] }
 0x406   :  { %v2147_v48 = vmax.f32 %v5001_v35, 0.0  ;;  %v2025_v45 = vadd.f32 %v2001_v56, %v1886_v41  ;;  %v2375_v35 = vld [vmem:[%s5361_s6 + $0x40] sm:$0xff]  ;;  %v2368_v41 = vld [vmem:[%s5361_s6 + $0x8] sm:$0xff] }
 0x407   :  { %v2367_v56 = vld [vmem:[%s5361_s6] sm:$0xff] }
 0x408   :  { %3003 = vmatmul.msk.f32.gmra.mxu1 %vm2155_vm14, %v2147_v48 }
 0x409   :  { %v2088_v40 = vpop.f32.mrf.mxu2 }
 0x40a   :  { %v2119_v50 = vadd.f32 %v2088_v40, %v2021_v4  ;;  %v2153_v4 = vmax.f32 %v5064_v23, 0.0 }
 0x40c   :  { %v5012_v43 = vadd.f32 %v4925_v39, %v2119_v50 }
 0x40e   :  { %v2148_v33 = vmax.f32 %v5012_v43, 0.0 }
 0x410   :  { %3004 = vmatmul.msk.f32.gmra.mxu1 %vm2155_vm14, %v2148_v33 }
 0x411   :  { %v2091_v13 = vpop.f32.mrf.mxu2 }
 0x412   :  { %v2120_v29 = vadd.f32 %v2091_v13, %v2022_v26 }
 0x414   :  { %v5023_v25 = vadd.f32 %v4925_v39, %v2120_v29 }
 0x416   :  { %v2149_v11 = vmax.f32 %v5023_v25, 0.0 }
 0x418   :  { %3005 = vmatmul.msk.f32.gmra.mxu1 %vm2155_vm14, %v2149_v11 }
 0x419   :  { %v2094_v38 = vpop.f32.mrf.mxu2 }
 0x41a   :  { %v2121_v42 = vadd.f32 %v2094_v38, %v2023_v9 }
 0x41c   :  { %v5034_v49 = vadd.f32 %v4925_v39, %v2121_v42 }
 0x41e   :  { %v2150_v44 = vmax.f32 %v5034_v49, 0.0 }
 0x420   :  { %3006 = vmatmul.msk.f32.gmra.mxu1 %vm2155_vm14, %v2150_v44 }
 0x421   :  { %v2097_v21 = vpop.f32.mrf.mxu2 }
 0x422   :  { %v2122_v2 = vadd.f32 %v2097_v21, %v2024_v54  ;;  %v2373_v54 = vld [vmem:[%s5361_s6 + $0x30] sm:$0xff]  ;;  %v2370_v21 = vld [vmem:[%s5361_s6 + $0x18] sm:$0xff] }
 0x424   :  { %v5044_v17 = vadd.f32 %v4925_v39, %v2122_v2 }
 0x426   :  { %v2151_v61 = vmax.f32 %v5044_v17, 0.0 }
 0x428   :  { %3007 = vmatmul.msk.f32.gmra.mxu1 %vm2155_vm14, %v2151_v61 }
 0x429   :  { %v2100_v6 = vpop.f32.mrf.mxu2 }
 0x42a   :  { %v2111_v14 = vsel %vm1270_vm3, %v2100_v6, %v2105_v3  ;;  %v2154_v3 = vmax.f32 %v5072_v60, 0.0 }
 0x42b   :  { %v2123_v12 = vadd.f32 %v2111_v14, %v2025_v45 }
 0x42d   :  { %v5056_v15 = vadd.f32 %v4925_v39, %v2123_v12 }
 0x42f   :  { %v2152_v19 = vmax.f32 %v5056_v15, 0.0 }
 0x431   :  { %3008 = vmatmul.msk.f32.gmra.mxu1 %vm2155_vm14, %v2152_v19 }
 0x439   :  { %3009 = vmatmul.msk.f32.gmra.mxu1 %vm2155_vm14, %v2153_v4 }
 0x441   :  { %3010 = vmatmul.msk.f32.gmra.mxu1 %vm2155_vm14, %v2154_v3 }
 0x455   :  { %v2215_v40 = vpop.f32.mrf.mxu1 }
 0x456   :  { %v5080_v32 = vmax.f32 %v2141_v57, %v2215_v40 }
 0x458   :  { %v2285_v0 = vrot.slane %v5080_v32, 4 }
 0x45d   :  { %v2218_v50 = vpop.f32.mrf.mxu1 }
 0x45e   :  { %v2258_v51 = vmax.f32 %v2142_v55, %v2218_v50 }
 0x460   :  { %v2286_v5 = vrot.slane %v2258_v51, 4 }
 0x462   :  { %v2287_v10 = vsel %vm1270_vm3, %v2285_v0, %v2286_v5 }
 0x463   :  { %v5087_v39 = vmax.f32 %v5080_v32, %v2287_v10 }
 0x465   :  { %v2221_v34 = vpop.f32.mrf.mxu1 }
 0x466   :  { %v2259_v20 = vmax.f32 %v2143_v59, %v2221_v34 }
 0x468   :  { %v2288_v26 = vrot.slane %v2259_v20, 4 }
 0x46a   :  { %v2289_v1 = vsel %vm1270_vm3, %v2286_v5, %v2288_v26 }
 0x46b   :  { %v5092_v57 = vmax.f32 %v2258_v51, %v2289_v1 }
 0x46d   :  { %v2224_v13 = vpop.f32.mrf.mxu1 }
 0x46e   :  { %v2260_v47 = vmax.f32 %v2144_v52, %v2224_v13 }
 0x470   :  { %v2290_v55 = vrot.slane %v2260_v47, 4 }
 0x472   :  { %v2291_v29 = vsel %vm1270_vm3, %v2288_v26, %v2290_v55 }
 0x473   :  { %v5097_v63 = vmax.f32 %v2259_v20, %v2291_v29 }
 0x475   :  { %v2227_v7 = vpop.f32.mrf.mxu1 }
 0x476   :  { %v2261_v30 = vmax.f32 %v2145_v22, %v2227_v7  ;;  %v3013_v7 = vld [vmem:[%s5360_s5 + $0x2] sm:$0x3] }
 0x478   :  { %v2292_v46 = vrot.slane %v2261_v30, 4 }
 0x47a   :  { %v2293_v59 = vsel %vm1270_vm3, %v2290_v55, %v2292_v46 }
 0x47b   :  { %v5102_v18 = vmax.f32 %v2260_v47, %v2293_v59  ;;  %v3024_v59 = vld [vmem:[%s5361_s6 + $0x90] sm:$0xff] }
 0x47d   :  { %v2230_v31 = vpop.f32.mrf.mxu1 }
 0x47e   :  { %v2262_v9 = vmax.f32 %v2146_v53, %v2230_v31  ;;  %v2376_v53 = vld [vmem:[%s5361_s6 + $0x48] sm:$0xff] }
 0x47f   :  { %2445 = vmatpush.msrb.mxu2 %v2376_v53  ;;  %v3023_v31 = vld [vmem:[%s5361_s6 + $0x88] sm:$0xff]  ;;  %v3039_v53 = vld [vmem:[%s5361_s6 + $0xe0] sm:$0xff] }
 0x480   :  { %v2294_v62 = vrot.slane %v2262_v9, 4 }
 0x481   :  { %2446 = vmatpush.msrb.mxu2 %v2375_v35  ;;  %v3032_v35 = vld [vmem:[%s5361_s6 + $0xa8] sm:$0xff] }
 0x482   :  { %v2295_v52 = vsel %vm1270_vm3, %v2292_v46, %v2294_v62  ;;  %v2339_v46 = vld [vmem:[%s5360_s5] sm:$0x3] }
 0x483   :  { %v5107_v38 = vmax.f32 %v2261_v30, %v2295_v52  ;;  %v3025_v30 = vld [vmem:[%s5361_s6 + $0x98] sm:$0xff]  ;;  %v3020_v52 = vld [vmem:[%s5361_s6 + $0x70] sm:$0xff] }
 0x485   :  { %v2233_v42 = vpop.f32.mrf.mxu1 }
 0x486   :  { %v5111_v8 = vmax.f32 %v2147_v48, %v2233_v42  ;;  %v2374_v48 = vld [vmem:[%s5361_s6 + $0x38] sm:$0xff]  ;;  %v3019_v42 = vld [vmem:[%s5361_s6 + $0x68] sm:$0xff] }
 0x487   :  { %2447 = vmatpush.msrb.mxu2 %v2374_v48 }
 0x488   :  { %v2296_v16 = vrot.slane %v5111_v8, 4 }
 0x489   :  { %2448 = vmatpush.msrb.mxu2 %v2373_v54  ;;  %v3054_v54 = vld [vmem:[%s5361_s6 + $0x138] sm:$0xff] }
 0x48a   :  { %v2297_v22 = vsel %vm1270_vm3, %v2294_v62, %v2296_v16  ;;  %v3021_v62 = vld [vmem:[%s5361_s6 + $0x78] sm:$0xff] }
 0x48b   :  { %v5117_v58 = vmax.f32 %v2262_v9, %v2297_v22  ;;  %2449 = vmatpush.msrb.mxu2 %v2372_v36  ;;  %v3022_v9 = vld [vmem:[%s5361_s6 + $0x80] sm:$0xff]  ;;  %v3016_v22 = vld [vmem:[%s5361_s6 + $0x50] sm:$0xff] }
 0x48c   :  { %v3028_v36 = vld [vmem:[%s5360_s5 + $0x4] sm:$0x3] }
 0x48d   :  { %v2236_v37 = vpop.f32.mrf.mxu1  ;;  %2450 = vmatpush.msrb.mxu2 %v2371_v27 }
 0x48e   :  { %v2264_v25 = vmax.f32 %v2148_v33, %v2236_v37  ;;  %v3040_v37 = vld [vmem:[%s5361_s6 + $0xe8] sm:$0xff] }
 0x48f   :  { %2451 = vmatpush.msrb.mxu2 %v2370_v21  ;;  %v3042_v21 = vld [vmem:[%s5360_s5 + $0x6] sm:$0x3] }
 0x490   :  { %v2298_v33 = vrot.slane %v2264_v25, 4 }
 0x491   :  { %2452 = vmatpush.msrb.mxu2 %v2369_v28  ;;  %v3052_v28 = vld [vmem:[%s5361_s6 + $0x128] sm:$0xff] }
 0x492   :  { %v2299_v47 = vsel %vm1270_vm3, %v2296_v16, %v2298_v33  ;;  %v3017_v16 = vld [vmem:[%s5361_s6 + $0x58] sm:$0xff] }
 0x493   :  { %2453 = vmatpush.msrb.mxu2 %v2368_v41  ;;  %v2331_v29 = vmax.f32 %v5111_v8, %v2299_v47  ;;  %v3018_v8 = vld [vmem:[%s5361_s6 + $0x60] sm:$0xff] }
 0x494   :  { %v3051_v41 = vld [vmem:[%s5361_s6 + $0x120] sm:$0xff] }
 0x495   :  { %v2239_v24 = vpop.f32.mrf.mxu1  ;;  %2454 = vmatpush.msrb.mxu2 %v2367_v56  ;;  %v3050_v56 = vld [vmem:[%s5361_s6 + $0x118] sm:$0xff] }
 0x496   :  { %v2265_v15 = vmax.f32 %v2149_v11, %v2239_v24  ;;  %v3031_v24 = vld [vmem:[%s5361_s6 + $0xa0] sm:$0xff] }
 0x49d   :  { %v2242_v2 = vpop.f32.mrf.mxu1 }
 0x49e   :  { %v2266_v10 = vmax.f32 %v2150_v44, %v2242_v2  ;;  %v3053_v2 = vld [vmem:[%s5361_s6 + $0x130] sm:$0xff] }
 0x4a0   :  { %v2302_v11 = vrot.slane %v2266_v10, 4 }
 0x4a5   :  { %v2245_v45 = vpop.f32.mrf.mxu1 }
 0x4a6   :  { %v2267_v51 = vmax.f32 %v2151_v61, %v2245_v45  ;;  %v3049_v45 = vld [vmem:[%s5361_s6 + $0x110] sm:$0xff] }
 0x4ae   :  { %v2248_v6 = vpop.f32.mrf.mxu1 }
 0x4af   :  { %v2268_v40 = vmax.f32 %v2152_v19, %v2248_v6  ;;  %v2304_v19 = vrot.slane %v2267_v51, 4  ;;  %v3048_v6 = vld [vmem:[%s5361_s6 + $0x108] sm:$0xff] }
 0x4b1   :  { %v2306_v34 = vrot.slane %v2268_v40, 4  ;;  %v2305_v60 = vsel %vm1270_vm3, %v2302_v11, %v2304_v19 }
 0x4b3   :  { %v2307_v44 = vsel %vm1270_vm3, %v2304_v19, %v2306_v34 }
 0x4b4   :  { %v5185_v43 = vmax.f32 %v2267_v51, %v2307_v44 }
 0x4b6   :  { %v2251_v14 = vpop.f32.mrf.mxu1 }
 0x4b7   :  { %v2269_v12 = vmax.f32 %v2153_v4, %v2251_v14  ;;  %v2300_v4 = vrot.slane %v2265_v15, 4  ;;  %v3047_v14 = vld [vmem:[%s5361_s6 + $0x100] sm:$0xff] }
 0x4b9   :  { %v2308_v0 = vrot.slane %v2269_v12, 4  ;;  %v2301_v1 = vsel %vm1270_vm3, %v2298_v33, %v2300_v4 }
 0x4ba   :  { %v2332_v55 = vmax.f32 %v2264_v25, %v2301_v1  ;;  %v3074_v25 = vld [vmem:[%s5362_s7 + $0x4] ss:$0 sm:$0xff] }
 0x4bb   :  { %v2309_v23 = vsel %vm1270_vm3, %v2306_v34, %v2308_v0  ;;  %v2583_v34 = vld [vmem:[%s5362_s7 + $0x1] sm:$0x7] }
 0x4bc   :  { %v5179_v61 = vmax.f32 %v2268_v40, %v2309_v23  ;;  %v3045_v40 = vld [vmem:[%s5361_s6 + $0xf0] sm:$0xff] }
 0x4be   :  { %v2254_v50 = vpop.f32.mrf.mxu1 }
 0x4bf   :  { %v2270_v5 = vmax.f32 %v2154_v3, %v2254_v50  ;;  %v2303_v3 = vsel %vm1270_vm3, %v2300_v4, %v2302_v11 }
 0x4c0   :  { %v2333_v13 = vmax.f32 %v2265_v15, %v2303_v3  ;;  %v3073_v15 = vld [vmem:[%s5362_s7] ss:$0 sm:$0xff] }
 0x4c1   :  { %v2310_v20 = vrot.slane %v2270_v5, 4  ;;  %v5160_v26 = vmax.f32 %v2270_v5, %v5080_v32  ;;  %v5191_v32 = vmax.f32 %v2266_v10, %v2305_v60 }
 0x4c3   :  { %v2311_v17 = vsel %vm1270_vm3, %v2308_v0, %v2310_v20  ;;  %3011 = vmatpush.msk.msrb.mxu3 %vm1270_vm3, %v5160_v26  ;;  %3014 = vmatpush.msk.msra.mxu0 %vm1270_vm3, %v5160_v26 }
 0x4c4   :  { %3043 = vmatpush.msk.msra.mxu2 %vm1270_vm3, %v5160_v26  ;;  %v5172_v49 = vmax.f32 %v2269_v12, %v2311_v17  ;;  %v3046_v12 = vld [vmem:[%s5361_s6 + $0xf8] sm:$0xff] }
 0x4c6   :  { %2350 = vmatpush.msrb.mxu3 %v5172_v49  ;;  %2385 = vmatpush.msra.mxu0 %v5172_v49 }
 0x4c7   :  { %2527 = vmatpush.msra.mxu2 %v5172_v49 }
 0x4c8   :  { %2351 = vmatpush.msrb.mxu3 %v5179_v61  ;;  %2386 = vmatpush.msra.mxu0 %v5179_v61 }
 0x4c9   :  { %2528 = vmatpush.msra.mxu2 %v5179_v61 }
 0x4ca   :  { %2352 = vmatpush.msrb.mxu3 %v5185_v43  ;;  %2387 = vmatpush.msra.mxu0 %v5185_v43 }
 0x4cb   :  { %2529 = vmatpush.msra.mxu2 %v5185_v43 }
 0x4cc   :  { %2353 = vmatpush.msrb.mxu3 %v5191_v32  ;;  %2388 = vmatpush.msra.mxu0 %v5191_v32 }
 0x4cd   :  { %2530 = vmatpush.msra.mxu2 %v5191_v32 }
 0x4ce   :  { %2354 = vmatpush.msrb.mxu3 %v2333_v13  ;;  %2389 = vmatpush.msra.mxu0 %v2333_v13 }
 0x4cf   :  { %2531 = vmatpush.msra.mxu2 %v2333_v13 }
 0x4d0   :  { %2355 = vmatpush.msrb.mxu3 %v2332_v55  ;;  %2390 = vmatpush.msra.mxu0 %v2332_v55 }
 0x4d1   :  { %2532 = vmatpush.msra.mxu2 %v2332_v55 }
 0x4d2   :  { %2356 = vmatpush.msrb.mxu3 %v2331_v29  ;;  %2391 = vmatpush.msra.mxu0 %v2331_v29 }
 0x4d3   :  { %2533 = vmatpush.msra.mxu2 %v2331_v29 }
 0x4d4   :  { %2357 = vmatpush.msrb.mxu3 %v5117_v58  ;;  %2392 = vmatpush.msra.mxu0 %v5117_v58 }
 0x4d5   :  { %2534 = vmatpush.msra.mxu2 %v5117_v58 }
 0x4d6   :  { %2358 = vmatpush.msrb.mxu3 %v5107_v38  ;;  %2393 = vmatpush.msra.mxu0 %v5107_v38 }
 0x4d7   :  { %2535 = vmatpush.msra.mxu2 %v5107_v38 }
 0x4d8   :  { %2359 = vmatpush.msrb.mxu3 %v5102_v18  ;;  %2394 = vmatpush.msra.mxu0 %v5102_v18 }
 0x4d9   :  { %2536 = vmatpush.msra.mxu2 %v5102_v18 }
 0x4da   :  { %2360 = vmatpush.msrb.mxu3 %v5097_v63  ;;  %2395 = vmatpush.msra.mxu0 %v5097_v63 }
 0x4db   :  { %2537 = vmatpush.msra.mxu2 %v5097_v63 }
 0x4dc   :  { %2361 = vmatpush.msrb.mxu3 %v5092_v57  ;;  %2396 = vmatpush.msra.mxu0 %v5092_v57 }
 0x4dd   :  { %2538 = vmatpush.msra.mxu2 %v5092_v57 }
 0x4de   :  { %2362 = vmatpush.msrb.mxu3 %v5087_v39  ;;  %2397 = vmatpush.msra.mxu0 %v5087_v39 }
 0x4df   :  { %2539 = vmatpush.msra.mxu2 %v5087_v39  ;;  %3015 = vmatmul.msk.f32.vlgmr.msra.gmra.mxu0 %vm2340_vm8, %v3013_v7 }
 0x4e0   :  { %2422 = vmatpush.msra.mxu3 %v3025_v30  ;;  %2504 = vmatpush.msrb.mxu0 %v3040_v37 }
 0x4e1   :  { %3012 = vmatmul.msk.f32.vlgmr.msrb.gmra.mxu3 %vm2340_vm8, %v2339_v46 }
 0x4e2   :  { %2423 = vmatpush.msra.mxu3 %v3024_v59  ;;  %2505 = vmatpush.msrb.mxu0 %v3039_v53 }
 0x4e4   :  { %2424 = vmatpush.msra.mxu3 %v3023_v31 }
 0x4e6   :  { %2425 = vmatpush.msra.mxu3 %v3022_v9 }
 0x4e8   :  { %2426 = vmatpush.msra.mxu3 %v3021_v62 }
 0x4ea   :  { %2427 = vmatpush.msra.mxu3 %v3020_v52 }
 0x4ec   :  { %2428 = vmatpush.msra.mxu3 %v3019_v42 }
 0x4ee   :  { %2429 = vmatpush.msra.mxu3 %v3018_v8 }
 0x4f0   :  { %2430 = vmatpush.msra.mxu3 %v3017_v16 }
 0x4f2   :  { %2431 = vmatpush.msra.mxu3 %v3016_v22 }
 0x4f4   :  { %3029 = vmatpush.msk.msrb.mxu3 %vm1270_vm3, %v5160_v26  ;;  %vm2586_vm3 = vcmask 23552  }
 0x4f6   :  { %2467 = vmatpush.msrb.mxu3 %v5172_v49 }
 0x4f8   :  { %2468 = vmatpush.msrb.mxu3 %v5179_v61 }
 0x4fa   :  { %2469 = vmatpush.msrb.mxu3 %v5185_v43 }
 0x4fc   :  { %2470 = vmatpush.msrb.mxu3 %v5191_v32 }
 0x4fe   :  { %2471 = vmatpush.msrb.mxu3 %v2333_v13 }
 0x500   :  { %2472 = vmatpush.msrb.mxu3 %v2332_v55 }
 0x502   :  { %2473 = vmatpush.msrb.mxu3 %v2331_v29 }
 0x504   :  { %2474 = vmatpush.msrb.mxu3 %v5117_v58  ;;  %v3033_v58 = vld [vmem:[%s5361_s6 + $0xb0] sm:$0xff] }
 0x506   :  { %2475 = vmatpush.msrb.mxu3 %v5107_v38  ;;  %v3038_v38 = vld [vmem:[%s5361_s6 + $0xd8] sm:$0xff] }
 0x507   :  { %2506 = vmatpush.msrb.mxu0 %v3038_v38 }
 0x508   :  { %2476 = vmatpush.msrb.mxu3 %v5102_v18  ;;  %v3034_v18 = vld [vmem:[%s5361_s6 + $0xb8] sm:$0xff] }
 0x50a   :  { %2477 = vmatpush.msrb.mxu3 %v5097_v63  ;;  %v3035_v63 = vld [vmem:[%s5361_s6 + $0xc0] sm:$0xff] }
 0x50c   :  { %2478 = vmatpush.msrb.mxu3 %v5092_v57  ;;  %v3037_v57 = vld [vmem:[%s5361_s6 + $0xd0] sm:$0xff] }
 0x50d   :  { %2507 = vmatpush.msrb.mxu0 %v3037_v57 }
 0x50e   :  { %2479 = vmatpush.msrb.mxu3 %v5087_v39  ;;  %v3036_v39 = vld [vmem:[%s5361_s6 + $0xc8] sm:$0xff] }
 0x50f   :  { %2508 = vmatpush.msrb.mxu0 %v3036_v39 }
 0x511   :  { %2509 = vmatpush.msrb.mxu0 %v3035_v63 }
 0x513   :  { %2510 = vmatpush.msrb.mxu0 %v3034_v18 }
 0x515   :  { %2511 = vmatpush.msrb.mxu0 %v3033_v58 }
 0x517   :  { %2512 = vmatpush.msrb.mxu0 %v3032_v35 }
 0x519   :  { %2513 = vmatpush.msrb.mxu0 %v3031_v24 }
 0x51b   :  { %2564 = vmatpush.msra.mxu0 %v3054_v54 }
 0x51d   :  { %2565 = vmatpush.msra.mxu0 %v3053_v2 }
 0x51f   :  { %2566 = vmatpush.msra.mxu0 %v3052_v28 }
 0x521   :  { %2567 = vmatpush.msra.mxu0 %v3051_v41 }
 0x523   :  { %2568 = vmatpush.msra.mxu0 %v3050_v56 }
 0x525   :  { %2569 = vmatpush.msra.mxu0 %v3049_v45 }
 0x527   :  { %2570 = vmatpush.msra.mxu0 %v3048_v6 }
 0x529   :  { %2571 = vmatpush.msra.mxu0 %v3047_v14 }
 0x52b   :  { %2572 = vmatpush.msra.mxu0 %v3046_v12 }
 0x52d   :  { %2573 = vmatpush.msra.mxu0 %v3045_v40 }
 0x55c   :  { %v2399_v48 = vpop.f32.mrf.mxu0 }
 0x55d   :  { %3026 = vmatmul.msk.f32.vlgmr.msra.gmra.mxu3 %vm2155_vm14, %v2399_v48 }
 0x55e   :  { %3056 = vmatpush.msk.msra.mxu3 %vm325_vm13, %v2583_v34  ;;  %vm2613_vm13 = vcmask 74752  }
 0x564   :  { %v2364_v27 = vpop.f32.mrf.mxu3 }
 0x565   :  { %3027 = vmatmul.msk.f32.vlgmr.msrb.gmra.mxu2 %vm2155_vm14, %v2364_v27  ;;  %3030 = vmatmul.msk.f32.vlgmr.msrb.gmra.mxu3 %vm2340_vm8, %v3028_v36 }
 0x56d   :  { %3044 = vmatmul.msk.f32.vlgmr.msra.gmra.mxu2 %vm2340_vm8, %v3042_v21 }
 0x5e0   :  { %v2433_v50 = vpop.f32.mrf.mxu3 }
 0x5e8   :  { %v2456_v51 = vpop.f32.mrf.mxu2  ;;  %v2481_v0 = vpop.f32.mrf.mxu3 }
 0x5e9   :  { %v2457_v5 = vadd.f32 %v2456_v51, %v2433_v50  ;;  %3041 = vmatmul.msk.f32.vlgmr.msrb.gmra.mxu0 %vm2155_vm14, %v2481_v0 }
 0x5f0   :  { %v2541_v10 = vpop.f32.mrf.mxu2 }
 0x5f1   :  { %3055 = vmatmul.msk.f32.vlgmr.msra.gmra.mxu0 %vm2155_vm14, %v2541_v10 }
 0x666   :  { %v2515_v20 = vpop.f32.mrf.mxu0 }
 0x667   :  { %v2518_v26 = vadd.f32 %v2515_v20, %v2457_v5 }
 0x66e   :  { %v2575_v19 = vpop.f32.mrf.mxu0 }
 0x66f   :  { %v2578_v23 = vadd.f32 %v2575_v19, %v2518_v26 }
 0x671   :  { %v2581_v17 = vadd.f32 %v3073_v15, %v2578_v23 }
 0x673   :  { %v2582_v49 = vmax.f32 %v2581_v17, 0.0 }
 0x675   :  { %3057 = vmatmul.msk.f32.vlgmr.msra.gmra.mxu3 %vm2586_vm3, %v2582_v49 }
 0x6f8   :  { %v2610_v11 = vpop.f32.mrf.mxu3 }
 0x6f9   :  { %v2611_v44 = vadd.f32 %v3074_v25, %v2610_v11 }
 0x6fb   :  { %2614 = vst.msk [vmem:[#allocation2] sm:$0x3] %vm2613_vm13, %v2611_v44 }
 0x6fc   :  { %2625 = dma.vmem_to_hbm [thread:$0]  %s2621_s29, 32, %s2623_s0, [#allocation3]  }
 0x6fd   :  { %3099 = dma.done.wait [#allocation3], 32  }
 0x6fe   :  { %3100 = vsyncadd [#allocation3], 4294967264 }
 0x6ff   :  { %2630 = vsyncpa [#allocation3], 1 }

</bundles_post_ra>
